<compile_context>
chip_gen: v5e
topology: v5e:2x2
jax: 0.10.0
libtpu: 0.0.40
codegen_flags: <defaults>
</compile_context>

<pallas_src>
import jax
import jax.numpy as jnp
import numpy as np
from jax.experimental import pallas as pl
from jax.experimental.pallas import tpu as pltpu

# ----------------------------- configuration --------------------------------
B = 2                 # batch
DEPTH = 32            # `depth` (latent dim == conv channels)
H1, W1 = 4, 4         # `width`, `height`
COUT = 3              # `out_channels`
K = 3                 # deconv kernel size

H2, W2 = H1 + 2, W1 + 2               # after stride-1 deconv       (6, 6)
H2P, W2P = H2 + 1, W2 + 1             # parity-plane extent          (7, 7)
H3, W3 = 2 * H2 + 2, 2 * W2 + 2       # final spatial size           (14, 14)

S1 = H1 * W1                           # 16
S2 = H2 * W2                           # 36
S3 = H2P * W2P                         # 49
OUT_FLAT = 4 * S3 * COUT               # 588
OUT_PAD = 5 * 128                      # 640 -> lane-dense, unmasked stores


# ------------------------------- kernel -------------------------------------
def _decoder_kernel(x_ref, wfc_ref, bfc_ref, w1_ref, b1_ref, w2_ref, b2_ref,
                    o_ref):
    # fc: (B, DEPTH) @ (DEPTH, S1*DEPTH) + ReLU  -> h1 (channel-last flattened)
    x = x_ref[...].astype(jnp.bfloat16)
    h1 = jnp.maximum(
        jnp.dot(x, wfc_ref[...], preferred_element_type=jnp.float32)
        + bfc_ref[...], 0.0)                                       # (B, S1*DEPTH) f32

    # ConvTranspose2d(depth, depth, 3, stride=1) + ReLU as one dense matmul
    h2 = jnp.maximum(
        jnp.dot(h1.astype(jnp.bfloat16), w1_ref[...],
                preferred_element_type=jnp.float32)
        + b1_ref[...], 0.0)                                        # (B, S2*DEPTH) f32

    # ConvTranspose2d(depth, out, 3, stride=2, output_padding=1) as one dense
    # matmul producing 4 parity planes packed lane-dense.  The Normalize(+0.5)
    # and *255 affine are pre-folded into w2/b2, so this is the final value.
    o_ref[...] = (jnp.dot(h2.astype(jnp.bfloat16), w2_ref[...],
                          preferred_element_type=jnp.float32)
                  + b2_ref[...])                                   # (B, OUT_PAD)


# --------------- host-side weight folding (runs ONCE, pure NumPy) ------------
def _build_fc_wide(fc_w, fc_b):
    # fc_w: (DEPTH*S1, DEPTH) with out index o = c*S1 + s (Unflatten order).
    # We want column index s*DEPTH + c (spatial-major, channel-minor).
    fc_w = np.asarray(fc_w, np.float32)
    fc_b = np.asarray(fc_b, np.float32)
    wfc = fc_w.reshape(DEPTH, S1, DEPTH).transpose(2, 1, 0).reshape(DEPTH, S1 * DEPTH)
    bfc = fc_b.reshape(DEPTH, S1).T.reshape(1, S1 * DEPTH)
    return wfc, bfc


def _build_deconv1_dense(w1, b1):
    # Dense (S1*DEPTH, S2*DEPTH) matrix embedding the stride-1 deconv scatter:
    #   out[(y+ky, x+kx), cout] += in[(y, x), cin] * w1[cin, cout, ky, kx]
    w1 = np.asarray(w1, np.float32)
    b1 = np.asarray(b1, np.float32)
    big = np.zeros((S1, DEPTH, S2, DEPTH), np.float32)
    for y in range(H1):
        for x_ in range(W1):
            s_in = y * W1 + x_
            for ky in range(K):
                for kx in range(K):
                    s_out = (y + ky) * W2 + (x_ + kx)
                    big[s_in, :, s_out, :] += w1[:, :, ky, kx]
    big = big.reshape(S1 * DEPTH, S2 * DEPTH)
    bias = np.tile(b1, S2).reshape(1, S2 * DEPTH)
    return big, bias


def _build_deconv2_dense(w2, b2):
    # Dense (S2*DEPTH, OUT_PAD) matrix for the stride-2 deconv, output packed
    # as parity planes: col = p*S3*COUT + (my*W2P+mx)*COUT + cout,
    #   p = 2*(ky%2)+(kx%2), my = iy + ky//2, mx = ix + kx//2,
    # so plane element (p, my, mx) == output pixel (2*my + ky%2, 2*mx + kx%2).
    # The final (x + 0.5) * 255 affine is folded in here, and the columns are
    # zero-padded from 588 to 640 for lane-dense stores.
    w2 = np.asarray(w2, np.float32)
    b2 = np.asarray(b2, np.float32)
    big = np.zeros((S2, DEPTH, 4 * S3, COUT), np.float32)
    for iy in range(H2):
        for ix in range(W2):
            s_in = iy * W2 + ix
            for ky in range(K):
                for kx in range(K):
                    p = 2 * (ky % 2) + (kx % 2)
                    s_out = p * S3 + (iy + ky // 2) * W2P + (ix + kx // 2)
                    big[s_in, :, s_out, :] += w2[:, :, ky, kx]
    big = big.reshape(S2 * DEPTH, 4 * S3 * COUT) * 255.0
    bias = (np.tile(b2, 4 * S3).reshape(1, 4 * S3 * COUT) + 0.5) * 255.0
    big_p = np.zeros((S2 * DEPTH, OUT_PAD), np.float32)
    big_p[:, :OUT_FLAT] = big
    bias_p = np.zeros((1, OUT_PAD), np.float32)
    bias_p[:, :OUT_FLAT] = bias
    return big_p, bias_p


def prepare_pixel_decoder_params(fc_w, fc_b, w1, b1, w2, b2):
    """Fold PyTorch-layout params into dense matmul operands.

    Call ONCE at parameter-load time (pure NumPy, off the forward hot path);
    pass the returned tuple to pixel_decoder_forward on every call.
    Weights are stored bf16 (halves weight DMA), biases stay f32.
    """
    wfc, bfc = _build_fc_wide(fc_w, fc_b)
    w1d, b1d = _build_deconv1_dense(w1, b1)
    w2d, b2d = _build_deconv2_dense(w2, b2)
    return (jnp.asarray(wfc, jnp.bfloat16), jnp.asarray(bfc, jnp.float32),
            jnp.asarray(w1d, jnp.bfloat16), jnp.asarray(b1d, jnp.float32),
            jnp.asarray(w2d, jnp.bfloat16), jnp.asarray(b2d, jnp.float32))


# ------------------------------- wrapper -------------------------------------
@jax.jit
def pixel_decoder_forward(x, params):
    """x: (B, DEPTH) f32.  params: output of prepare_pixel_decoder_params.
    Returns NCHW (B, COUT, H3, W3)."""
    wfc, bfc, w1d, b1d, w2d, b2d = params
    bsz = x.shape[0]

    out_flat = pl.pallas_call(
        _decoder_kernel,
        out_shape=jax.ShapeDtypeStruct((bsz, OUT_PAD), jnp.float32),
        in_specs=[pl.BlockSpec(memory_space=pltpu.MemorySpace.VMEM)] * 7,
        out_specs=pl.BlockSpec(memory_space=pltpu.MemorySpace.VMEM),
    )(x, wfc, bfc, w1d, b1d, w2d, b2d)

    # drop lane padding, interleave parity planes -> NHWC -> NCHW (layout glue)
    out_flat = out_flat[:, :OUT_FLAT]
    planes = out_flat.reshape(bsz, 2, 2, H2P, W2P, COUT)     # [b, py, px, my, mx, c]
    nhwc = planes.transpose(0, 3, 1, 4, 2, 5).reshape(bsz, H3, W3, COUT)
    return nhwc.transpose(0, 3, 1, 2)                        # NCHW


# ------------------------------ reference ------------------------------------
def _conv_transpose_ref(x, w, b, stride, out_pad):
    Bn, Cin, H, W = x.shape
    _, Cout, kH, kW = w.shape
    Ho = (H - 1) * stride + kH + out_pad
    Wo = (W - 1) * stride + kW + out_pad
    out = jnp.zeros((Bn, Cout, Ho, Wo), jnp.float32)
    for ky in range(kH):
        for kx in range(kW):
            contrib = jnp.einsum('bchw,cd->bdhw', x, w[:, :, ky, kx])
            out = out.at[:, :, ky:ky + stride * H:stride,
                         kx:kx + stride * W:stride].add(contrib)
    return out + b[None, :, None, None]


def _ref_forward(x, fc_w, fc_b, w1, b1, w2, b2):
    z = jnp.maximum(x @ fc_w.T + fc_b, 0.0)
    h = z.reshape(x.shape[0], DEPTH, H1, W1)
    h = jnp.maximum(_conv_transpose_ref(h, w1, b1, 1, 0), 0.0)
    h = _conv_transpose_ref(h, w2, b2, 2, 1)
    return (h + 0.5) * 255.0


# -------------------------------- main ----------------------------------------
if __name__ == "__main__":
    key = jax.random.PRNGKey(0)
    ks = jax.random.split(key, 7)
    fc_w = jax.random.normal(ks[0], (DEPTH * H1 * W1, DEPTH), jnp.float32) / np.sqrt(DEPTH)
    fc_b = 0.1 * jax.random.normal(ks[1], (DEPTH * H1 * W1,), jnp.float32)
    w1 = 0.05 * jax.random.normal(ks[2], (DEPTH, DEPTH, K, K), jnp.float32)
    b1 = 0.1 * jax.random.normal(ks[3], (DEPTH,), jnp.float32)
    w2 = 0.05 * jax.random.normal(ks[4], (DEPTH, COUT, K, K), jnp.float32)
    b2 = 0.1 * jax.random.normal(ks[5], (COUT,), jnp.float32)
    x = jax.random.normal(ks[6], (B, DEPTH), jnp.float32)

    # Fold weights ONCE (pure NumPy, off the hot path).
    params = prepare_pixel_decoder_params(
        np.asarray(fc_w), np.asarray(fc_b), np.asarray(w1), np.asarray(b1),
        np.asarray(w2), np.asarray(b2))

    out = jax.block_until_ready(pixel_decoder_forward(x, params))
    assert out.shape == (B, COUT, H3, W3), out.shape

    ref = jax.block_until_ready(_ref_forward(x, fc_w, fc_b, w1, b1, w2, b2))
    np.testing.assert_allclose(np.asarray(out), np.asarray(ref), rtol=2e-2, atol=2.0)

    print("KERNEL_OK")
</pallas_src>

<mosaic_0001>
module attributes {stable_mosaic.version = 11 : i64} {
  func.func @_decoder_kernel(%arg0: memref<2x32xf32, #tpu.memory_space<vmem>>, %arg1: memref<32x512xbf16, #tpu.memory_space<vmem>>, %arg2: memref<1x512xf32, #tpu.memory_space<vmem>>, %arg3: memref<512x1152xbf16, #tpu.memory_space<vmem>>, %arg4: memref<1x1152xf32, #tpu.memory_space<vmem>>, %arg5: memref<1152x640xbf16, #tpu.memory_space<vmem>>, %arg6: memref<1x640xf32, #tpu.memory_space<vmem>>, %arg7: memref<2x640xf32, #tpu.memory_space<vmem>>) attributes {dimension_semantics = [], scalar_prefetch = 0 : i64, scratch_operands = 0 : i64, tpu.core_type = #tpu.core_type<tc>} {
    %c0 = arith.constant 0 : index
    %c0_0 = arith.constant 0 : index
    %0 = vector.load %arg0[%c0, %c0_0] : memref<2x32xf32, #tpu.memory_space<vmem>>, vector<2x32xf32>
    %1 = arith.truncf %0 : vector<2x32xf32> to vector<2x32xbf16>
    %c0_1 = arith.constant 0 : index
    %c0_2 = arith.constant 0 : index
    %2 = vector.load %arg1[%c0_1, %c0_2] : memref<32x512xbf16, #tpu.memory_space<vmem>>, vector<32x512xbf16>
    %cst = arith.constant dense<0.000000e+00> : vector<2x512xf32>
    %3 = tpu.matmul %1, %2, %cst {dimension_numbers = #tpu.dot_dimension_numbers<[1], [0], [0], [1], [0, 0, 1, 1], [], []>} : vector<2x32xbf16>, vector<32x512xbf16>, vector<2x512xf32> -> vector<2x512xf32>
    %c0_3 = arith.constant 0 : index
    %c0_4 = arith.constant 0 : index
    %4 = vector.load %arg2[%c0_3, %c0_4] : memref<1x512xf32, #tpu.memory_space<vmem>>, vector<1x512xf32>
    %5 = vector.broadcast %4 : vector<1x512xf32> to vector<2x512xf32>
    %6 = arith.addf %3, %5 : vector<2x512xf32>
    %cst_5 = arith.constant 0.000000e+00 : f32
    %7 = vector.broadcast %cst_5 : f32 to vector<2x512xf32>
    %8 = arith.maximumf %6, %7 : vector<2x512xf32>
    %9 = arith.truncf %8 : vector<2x512xf32> to vector<2x512xbf16>
    %c0_6 = arith.constant 0 : index
    %c0_7 = arith.constant 0 : index
    %10 = vector.load %arg3[%c0_6, %c0_7] : memref<512x1152xbf16, #tpu.memory_space<vmem>>, vector<512x1152xbf16>
    %cst_8 = arith.constant dense<0.000000e+00> : vector<2x1152xf32>
    %11 = tpu.matmul %9, %10, %cst_8 {dimension_numbers = #tpu.dot_dimension_numbers<[1], [0], [0], [1], [0, 0, 1, 1], [], []>} : vector<2x512xbf16>, vector<512x1152xbf16>, vector<2x1152xf32> -> vector<2x1152xf32>
    %c0_9 = arith.constant 0 : index
    %c0_10 = arith.constant 0 : index
    %12 = vector.load %arg4[%c0_9, %c0_10] : memref<1x1152xf32, #tpu.memory_space<vmem>>, vector<1x1152xf32>
    %13 = vector.broadcast %12 : vector<1x1152xf32> to vector<2x1152xf32>
    %14 = arith.addf %11, %13 : vector<2x1152xf32>
    %cst_11 = arith.constant 0.000000e+00 : f32
    %15 = vector.broadcast %cst_11 : f32 to vector<2x1152xf32>
    %16 = arith.maximumf %14, %15 : vector<2x1152xf32>
    %17 = arith.truncf %16 : vector<2x1152xf32> to vector<2x1152xbf16>
    %c0_12 = arith.constant 0 : index
    %c0_13 = arith.constant 0 : index
    %18 = vector.load %arg5[%c0_12, %c0_13] : memref<1152x640xbf16, #tpu.memory_space<vmem>>, vector<1152x640xbf16>
    %cst_14 = arith.constant dense<0.000000e+00> : vector<2x640xf32>
    %19 = tpu.matmul %17, %18, %cst_14 {dimension_numbers = #tpu.dot_dimension_numbers<[1], [0], [0], [1], [0, 0, 1, 1], [], []>} : vector<2x1152xbf16>, vector<1152x640xbf16>, vector<2x640xf32> -> vector<2x640xf32>
    %c0_15 = arith.constant 0 : index
    %c0_16 = arith.constant 0 : index
    %20 = vector.load %arg6[%c0_15, %c0_16] : memref<1x640xf32, #tpu.memory_space<vmem>>, vector<1x640xf32>
    %21 = vector.broadcast %20 : vector<1x640xf32> to vector<2x640xf32>
    %22 = arith.addf %19, %21 : vector<2x640xf32>
    %c0_17 = arith.constant 0 : index
    %c0_18 = arith.constant 0 : index
    %23 = vector.load %arg7[%c0_17, %c0_18] : memref<2x640xf32, #tpu.memory_space<vmem>>, vector<2x640xf32>
    tpu.vector_store %arg7[%c0_17, %c0_18], %22 {strides = array<i32>} : memref<2x640xf32, #tpu.memory_space<vmem>>, vector<2x640xf32>,
    return
  }
}

</mosaic_0001>

<bundles_post_ra>
// kernel: pixel_decoder_forward.1
= control target key start
LH: loop header
LB: loop body
LE: loop exit
PB: predicated region body
PF: predicated region fallthrough
CT: control target
= control target key end

     0   :  { %12 = vsyncpa [#allocation3], 0  ;;  %s9271_s0 = inlined_call_operand.hbm [shape: f32[2,32], index: 0, kind: input, shape index: {}]   ;;  %s9272_s1 = inlined_call_operand.hbm [shape: bf16[32,512], index: 1, kind: input, shape index: {}]   ;;  %s9273_s2 = inlined_call_operand.hbm [shape: f32[1,512], index: 2, kind: input, shape index: {}]   ;;  %s9274_s3 = inlined_call_operand.hbm [shape: bf16[512,1152], index: 3, kind: input, shape index: {}]   ;;  %s9275_s4 = inlined_call_operand.hbm [shape: f32[1,1152], index: 4, kind: input, shape index: {}]   ;;  %s9276_s5 = inlined_call_operand.hbm [shape: bf16[1152,640], index: 5, kind: input, shape index: {}]   ;;  %s9277_s6 = inlined_call_operand.hbm [shape: f32[1,640], index: 6, kind: input, shape index: {}]   ;;  %s9278_s7 = inlined_call_operand.vmem [shape: f32[2,640], index: 7, kind: output, shape index: {}]  }
   0x1   :  { %13 = vsyncpa [#allocation5], 0 }
   0x2   :  { %14 = vsyncpa [#allocation8], 0  ;;  %s31_s26 = sshll.u32 %s9272_s1, 4  ;;  %s32_s26 = int_to_ptr.hbm [resolvable:$true] %s31_s26 }
   0x3   :  { %15 = vsyncpa [#allocation11], 0  ;;  %s8953_s27 = smov [#allocation4]   ;;  %s55_s8 = sshll.u32 %s9274_s3, 4  ;;  %s56_s8 = int_to_ptr.hbm [resolvable:$true] %s55_s8 }
   0x4   :  { %s33_s28 = sshll.u32 %s8953_s27, 4  ;;  %s8954_s9 = smov 256   ;;  %s34_s28 = int_to_ptr.vmem [resolvable:$true] %s33_s28 }
   0x5   :  { %s8955_s10 = smov 16   ;;  %s8956_s11 = smov [#allocation7]  }
   0x6   :  { %39 = dma.hbm_to_vmem [thread:$0]  %s32_s26, 1024, %s34_s28, [#allocation5], %s8954_s9, %s8954_s9, %s8955_s10  }
   0x7   :  { %s57_s12 = sshll.u32 %s8956_s11, 4  ;;  %s8957_s13 = smov 576   ;;  %s58_s12 = int_to_ptr.vmem [resolvable:$true] %s57_s12 }
   0x8   :  { %s8958_s14 = smov 36   ;;  %s79_s16 = sshll.u32 %s9276_s5, 4  ;;  %s80_s16 = int_to_ptr.hbm [resolvable:$true] %s79_s16 }
   0x9   :  { %63 = dma.hbm_to_vmem [thread:$0]  %s56_s8, 36864, %s58_s12, [#allocation8], %s8957_s13, %s8957_s13, %s8958_s14  }
   0xa   :  { %s8959_s17 = smov [#allocation10]   ;;  %s21_s20 = sshll.u32 %s9271_s0, 4  ;;  %s22_s20 = int_to_ptr.hbm [resolvable:$true] %s21_s20 }
   0xb   :  { %s81_s18 = sshll.u32 %s8959_s17, 4  ;;  %s8960_s21 = smov 320   ;;  %s82_s18 = int_to_ptr.vmem [resolvable:$true] %s81_s18 }
   0xc   :  { %s8961_s22 = smov 20   ;;  %s8962_s23 = smov [#allocation2]  }
   0xd   :  { %87 = dma.hbm_to_vmem [thread:$0]  %s80_s16, 46080, %s82_s18, [#allocation11], %s8960_s21, %s8960_s21, %s8961_s22  }
   0xe   :  { %s23_s24 = sshll.u32 %s8962_s23, 4  ;;  %s45_s27 = sshll.u32 %s9273_s2, 4  ;;  %s24_s24 = int_to_ptr.vmem [resolvable:$true] %s23_s24  ;;  %s46_s27 = int_to_ptr.hbm [resolvable:$true] %s45_s27 }
   0xf   :  { %26 = dma.hbm_to_vmem [thread:$0]  %s22_s20, 32, %s24_s24, [#allocation3]  }
  0x10   :  { %s69_s29 = sshll.u32 %s9275_s4, 4  ;;  %s8963_s30 = smov [#allocation6]   ;;  %s70_s29 = int_to_ptr.hbm [resolvable:$true] %s69_s29 }
  0x11   :  { %s47_s8 = sshll.u32 %s8963_s30, 4  ;;  %s8964_s0 = smov [#allocation9]   ;;  %s48_s8 = int_to_ptr.vmem [resolvable:$true] %s47_s8 }
  0x12   :  { %50 = dma.hbm_to_vmem [thread:$0]  %s46_s27, 64, %s48_s8, [#allocation5]  }
  0x13   :  { %s71_s9 = sshll.u32 %s8964_s0, 4  ;;  %s93_s12 = sshll.u32 %s9277_s6, 4  ;;  %s72_s9 = int_to_ptr.vmem [resolvable:$true] %s71_s9  ;;  %s94_s12 = int_to_ptr.hbm [resolvable:$true] %s93_s12 }
  0x14   :  { %74 = dma.hbm_to_vmem [thread:$0]  %s70_s29, 144, %s72_s9, [#allocation8]  }
  0x15   :  { %s8965_s2 = smov [#allocation12]  }
  0x16   :  { %s95_s13 = sshll.u32 %s8965_s2, 4  ;;  %s96_s13 = int_to_ptr.vmem [resolvable:$true] %s95_s13 }
  0x17   :  { %98 = dma.hbm_to_vmem [thread:$0]  %s94_s12, 80, %s96_s13, [#allocation11]  }
  0x18   :  { %8945 = dma.done.wait [#allocation3], 32  }
  0x19   :  { %8946 = vsyncadd [#allocation3], 4294967264 }
  0x1a   :  { %8947 = dma.done.wait [#allocation5], 1088  }
  0x1b   :  { %8948 = vsyncadd [#allocation5], 4294966208 }
  0x1c   :  { %8949 = dma.done.wait [#allocation8], 37008  }
  0x1d   :  { %8950 = vsyncadd [#allocation8], 4294930288 }
  0x1e   :  { %8951 = dma.done.wait [#allocation11], 46160  }
  0x1f   :  { %8952 = vsyncadd [#allocation11], 4294921136  ;;  %vm188_vm0 = vcmask 261120   ;;  %v5495_v0 = vld [vmem:[#allocation4 + $0x20] sm:$0xf]  ;;  %vm5460_vm1 = vcmask 1041408  }
  0x20   :  { %v8111_v1 = vld [vmem:[#allocation4 + $0x2c] sm:$0xf0]  ;;  %v5503_v2 = vld [vmem:[#allocation4 + $0x28] sm:$0xf]  ;;  %v8112_v4 = vld [vmem:[#allocation4 + $0x34] sm:$0xf0] }
  0x21   :  { %v5496_v3 = vor.u32 %v8111_v1, %v5495_v0  ;;  %v8110_v5 = vld [vmem:[#allocation4 + $0x2c] sm:$0xf]  ;;  %v5505_v6 = vld [vmem:[#allocation4 + $0x38] sm:$0xf0]  ;;  %v5504_v7 = vor.u32 %v8112_v4, %v5503_v2  ;;  %v5479_v9 = vld [vmem:[#allocation4] sm:$0xf] }
  0x22   :  { %v5508_v8 = vor.u32 %v8110_v5, %v5505_v6  ;;  %v8107_v10 = vld [vmem:[#allocation4 + $0xc] sm:$0xf0]  ;;  %v5487_v11 = vld [vmem:[#allocation4 + $0x8] sm:$0xf]  ;;  %v8108_v13 = vld [vmem:[#allocation4 + $0x14] sm:$0xf0] }
  0x23   :  { %198 = vmatpush.bf16.msra.mxu1 %v5496_v3  ;;  %v5480_v12 = vor.u32 %v8107_v10, %v5479_v9  ;;  %v8106_v14 = vld [vmem:[#allocation4 + $0xc] sm:$0xf]  ;;  %v5489_v15 = vld [vmem:[#allocation4 + $0x18] sm:$0xf0]  ;;  %224 = vmatpush.bf16.msra.mxu2 %v5504_v7  ;;  %v5488_v16 = vor.u32 %v8108_v13, %v5487_v11  ;;  %v8109_v19 = vld [vmem:[#allocation4 + $0x24] sm:$0xf] }
  0x24   :  { %237 = vmatpush.bf16.msra.mxu3 %v5508_v8  ;;  %v5492_v17 = vor.u32 %v8106_v14, %v5489_v15  ;;  %v128_v18 = vld [vmem:[#allocation2] sm:$0x3]  ;;  %v5497_v20 = vld [vmem:[#allocation4 + $0x30] sm:$0xf0]  ;;  %v8105_v22 = vld [vmem:[#allocation4 + $0x4] sm:$0xf] }
  0x25   :  { %v5500_v21 = vor.u32 %v8109_v19, %v5497_v20  ;;  %v5481_v23 = vld [vmem:[#allocation4 + $0x10] sm:$0xf0]  ;;  %v5767_v24 = vld [vmem:[#allocation7 + $0x1f8] sm:$0xf]  ;;  %v9027_v25 = vpack.c.bf16 %v128_v18, %v128_v18  ;;  %v8180_v26 = vld [vmem:[#allocation7 + $0x218] sm:$0xf0] }
  0x26   :  { %v5731_v27 = vld [vmem:[#allocation7 + $0x1b0] sm:$0xf]  ;;  %v8171_v28 = vld [vmem:[#allocation7 + $0x1d0] sm:$0xf0]  ;;  %v5768_v29 = vor.u32 %v8180_v26, %v5767_v24  ;;  %v6343_v30 = vld [vmem:[#allocation7 + $0x678] sm:$0xf]  ;;  %v5484_v35 = vor.u32 %v8105_v22, %v5481_v23 }
  0x27   :  { %199 = vmatpush.bf16.msra.mxu1 %v5480_v12  ;;  %v8324_v31 = vld [vmem:[#allocation7 + $0x698] sm:$0xf0]  ;;  %v6631_v32 = vld [vmem:[#allocation7 + $0x8b8] sm:$0xf]  ;;  %225 = vmatpush.bf16.msra.mxu2 %v5488_v16  ;;  %v5732_v36 = vor.u32 %v8171_v28, %v5731_v27  ;;  %v6307_v38 = vld [vmem:[#allocation7 + $0x630] sm:$0xf] }
  0x28   :  { %238 = vmatpush.bf16.msra.mxu3 %v5492_v17  ;;  %v6344_v33 = vor.u32 %v8324_v31, %v6343_v30  ;;  %v8396_v34 = vld [vmem:[#allocation7 + $0x8d8] sm:$0xf0]  ;;  %2066 = vmatpush.bf16.msra.mxu0 %v5768_v29  ;;  %v8315_v39 = vld [vmem:[#allocation7 + $0x650] sm:$0xf0]  ;;  %v6595_v40 = vld [vmem:[#allocation7 + $0x870] sm:$0xf] }
  0x29   :  { %v6632_v37 = vor.u32 %v8396_v34, %v6631_v32  ;;  %v5695_v41 = vld [vmem:[#allocation7 + $0x168] sm:$0xf]  ;;  %v8162_v42 = vld [vmem:[#allocation7 + $0x188] sm:$0xf0]  ;;  %v6308_v43 = vor.u32 %v8315_v39, %v6307_v38  ;;  %v8387_v44 = vld [vmem:[#allocation7 + $0x890] sm:$0xf0] }
  0x2a   :  { %5509 = vmatmul.msk.bf16.vlgmr.msra.gmra.mxu1 %vm188_vm0, %v9027_v25  ;;  %5511 = vmatmul.msk.bf16.vlgmr.msra.gmra.mxu2 %vm188_vm0, %v9027_v25  ;;  %v6271_v45 = vld [vmem:[#allocation7 + $0x5e8] sm:$0xf]  ;;  %v8306_v46 = vld [vmem:[#allocation7 + $0x608] sm:$0xf0]  ;;  %v6596_v47 = vor.u32 %v8387_v44, %v6595_v40  ;;  %v5696_v49 = vor.u32 %v8162_v42, %v5695_v41  ;;  %v6055_v51 = vld [vmem:[#allocation7 + $0x438] sm:$0xf] }
  0x2b   :  { %211 = vmatpush.bf16.msrb.mxu1 %v5500_v21  ;;  %2092 = vmatpush.bf16.msrb.mxu2 %v6344_v33  ;;  %v6559_v48 = vld [vmem:[#allocation7 + $0x828] sm:$0xf]  ;;  %v8378_v50 = vld [vmem:[#allocation7 + $0x848] sm:$0xf0]  ;;  %v8252_v52 = vld [vmem:[#allocation7 + $0x458] sm:$0xf0]  ;;  %v6272_v55 = vor.u32 %v8306_v46, %v6271_v45 }
  0x2c   :  { %5512 = vmatmul.msk.bf16.vlgmr.msra.gmra.mxu3 %vm188_vm0, %v9027_v25  ;;  %2067 = vmatpush.bf16.msra.mxu0 %v5732_v36  ;;  %v5659_v53 = vld [vmem:[#allocation7 + $0x120] sm:$0xf]  ;;  %v8153_v54 = vld [vmem:[#allocation7 + $0x140] sm:$0xf0]  ;;  %v6056_v56 = vor.u32 %v8252_v52, %v6055_v51  ;;  %v6019_v59 = vld [vmem:[#allocation7 + $0x3f0] sm:$0xf]  ;;  %v6560_v60 = vor.u32 %v8378_v50, %v6559_v48 }
  0x2d   :  { %2105 = vmatpush.bf16.msrb.mxu3 %v6632_v37  ;;  %v6235_v57 = vld [vmem:[#allocation7 + $0x5a0] sm:$0xf]  ;;  %v8297_v58 = vld [vmem:[#allocation7 + $0x5c0] sm:$0xf0]  ;;  %v8243_v61 = vld [vmem:[#allocation7 + $0x410] sm:$0xf0]  ;;  %v5660_v62 = vor.u32 %v8153_v54, %v5659_v53 }
  0x2e   :  { %v5623_v63 = vld [vmem:[#allocation7 + $0xd8] sm:$0xf]  ;;  %v6523_v0 = vld [vmem:[#allocation7 + $0x7e0] sm:$0xf]  ;;  %v8369_v1 = vld [vmem:[#allocation7 + $0x800] sm:$0xf0]  ;;  %v6020_v2 = vor.u32 %v8243_v61, %v6019_v59  ;;  %v6236_v4 = vor.u32 %v8297_v58, %v6235_v57 }
  0x2f   :  { %212 = vmatpush.bf16.msrb.mxu1 %v5484_v35  ;;  %2093 = vmatpush.bf16.msrb.mxu2 %v6308_v43  ;;  %v8144_v3 = vld [vmem:[#allocation7 + $0xf8] sm:$0xf0]  ;;  %v5983_v5 = vld [vmem:[#allocation7 + $0x3a8] sm:$0xf]  ;;  %v8234_v6 = vld [vmem:[#allocation7 + $0x3c8] sm:$0xf0]  ;;  %v6524_v9 = vor.u32 %v8369_v1, %v6523_v0 }
  0x30   :  { %2068 = vmatpush.bf16.msra.mxu0 %v5696_v49  ;;  %v6199_v7 = vld [vmem:[#allocation7 + $0x558] sm:$0xf]  ;;  %v8288_v8 = vld [vmem:[#allocation7 + $0x578] sm:$0xf0]  ;;  %v5984_v11 = vor.u32 %v8234_v6, %v5983_v5  ;;  %v5624_v12 = vor.u32 %v8144_v3, %v5623_v63  ;;  %v5947_v14 = vld [vmem:[#allocation7 + $0x360] sm:$0xf] }
  0x31   :  { %2106 = vmatpush.bf16.msrb.mxu3 %v6596_v47  ;;  %v6487_v10 = vld [vmem:[#allocation7 + $0x798] sm:$0xf]  ;;  %v8360_v13 = vld [vmem:[#allocation7 + $0x7b8] sm:$0xf0]  ;;  %v8225_v15 = vld [vmem:[#allocation7 + $0x380] sm:$0xf0]  ;;  %v6200_v18 = vor.u32 %v8288_v8, %v6199_v7 }
  0x32   :  { %v5587_v16 = vld [vmem:[#allocation7 + $0x90] sm:$0xf]  ;;  %v8135_v17 = vld [vmem:[#allocation7 + $0xb0] sm:$0xf0]  ;;  %v6488_v21 = vor.u32 %v8360_v13, %v6487_v10  ;;  %v5948_v23 = vor.u32 %v8225_v15, %v5947_v14  ;;  %v5911_v27 = vld [vmem:[#allocation7 + $0x318] sm:$0xf] }
  0x33   :  { %2079 = vmatpush.bf16.msra.mxu1 %v6056_v56  ;;  %2094 = vmatpush.bf16.msrb.mxu2 %v6272_v55  ;;  %v6163_v19 = vld [vmem:[#allocation7 + $0x510] sm:$0xf]  ;;  %v8279_v20 = vld [vmem:[#allocation7 + $0x530] sm:$0xf0]  ;;  %v5588_v24 = vor.u32 %v8135_v17, %v5587_v16  ;;  %v8216_v28 = vld [vmem:[#allocation7 + $0x338] sm:$0xf0] }
  0x34   :  { %2069 = vmatpush.bf16.msra.mxu0 %v5660_v62  ;;  %v6451_v22 = vld [vmem:[#allocation7 + $0x750] sm:$0xf]  ;;  %v8351_v26 = vld [vmem:[#allocation7 + $0x770] sm:$0xf0]  ;;  %v5551_v29 = vld [vmem:[#allocation7 + $0x48] sm:$0xf]  ;;  %v6164_v31 = vor.u32 %v8279_v20, %v6163_v19  ;;  %v5912_v36 = vor.u32 %v8216_v28, %v5911_v27 }
  0x35   :  { %2107 = vmatpush.bf16.msrb.mxu3 %v6560_v60  ;;  %v8126_v30 = vld [vmem:[#allocation7 + $0x68] sm:$0xf0]  ;;  %v6127_v32 = vld [vmem:[#allocation7 + $0x4c8] sm:$0xf]  ;;  %v6452_v34 = vor.u32 %v8351_v26, %v6451_v22  ;;  %v5875_v39 = vld [vmem:[#allocation7 + $0x2d0] sm:$0xf] }
  0x36   :  { %v8270_v33 = vld [vmem:[#allocation7 + $0x4e8] sm:$0xf0]  ;;  %v6415_v35 = vld [vmem:[#allocation7 + $0x708] sm:$0xf]  ;;  %v5552_v37 = vor.u32 %v8126_v30, %v5551_v29  ;;  %v8207_v40 = vld [vmem:[#allocation7 + $0x2f0] sm:$0xf0] }
  0x37   :  { %2080 = vmatpush.bf16.msra.mxu1 %v6020_v2  ;;  %2095 = vmatpush.bf16.msrb.mxu2 %v6236_v4  ;;  %v8342_v38 = vld [vmem:[#allocation7 + $0x728] sm:$0xf0]  ;;  %v5515_v41 = vld [vmem:[#allocation7] sm:$0xf]  ;;  %v8117_v42 = vld [vmem:[#allocation7 + $0x20] sm:$0xf0]  ;;  %v6128_v43 = vor.u32 %v8270_v33, %v6127_v32  ;;  %v5876_v51 = vor.u32 %v8207_v40, %v5875_v39 }
  0x38   :  { %2070 = vmatpush.bf16.msra.mxu0 %v5624_v12  ;;  %v5769_v44 = vld [vmem:[#allocation7 + $0x21c] sm:$0xf0]  ;;  %v8261_v46 = vld [vmem:[#allocation7 + $0x4a0] sm:$0xf0]  ;;  %v6416_v47 = vor.u32 %v8342_v38, %v6415_v35  ;;  %v8320_v49 = vld [vmem:[#allocation7 + $0x67c] sm:$0xf]  ;;  %v5516_v52 = vor.u32 %v8117_v42, %v5515_v41 }
  0x39   :  { %2108 = vmatpush.bf16.msrb.mxu3 %v6524_v9  ;;  %v6091_v45 = vld [vmem:[#allocation7 + $0x480] sm:$0xf]  ;;  %v8333_v53 = vld [vmem:[#allocation7 + $0x6e0] sm:$0xf0]  ;;  %v5839_v54 = vld [vmem:[#allocation7 + $0x288] sm:$0xf] }
  0x3a   :  { %5510 = vmatmul.msk.bf16.vlgmr.msrb.gmra.mxu1 %vm188_vm0, %v9027_v25  ;;  %v8176_v25 = vld [vmem:[#allocation7 + $0x1fc] sm:$0xf]  ;;  %v6379_v48 = vld [vmem:[#allocation7 + $0x6c0] sm:$0xf]  ;;  %v8198_v55 = vld [vmem:[#allocation7 + $0x2a8] sm:$0xf0]  ;;  %v6092_v57 = vor.u32 %v8261_v46, %v6091_v45 }
  0x3b   :  { %2081 = vmatpush.bf16.msra.mxu1 %v5984_v11  ;;  %2096 = vmatpush.bf16.msrb.mxu2 %v6200_v18  ;;  %v6345_v50 = vld [vmem:[#allocation7 + $0x69c] sm:$0xf0]  ;;  %v5772_v56 = vor.u32 %v8176_v25, %v5769_v44  ;;  %v8392_v58 = vld [vmem:[#allocation7 + $0x8bc] sm:$0xf]  ;;  %v8167_v60 = vld [vmem:[#allocation7 + $0x1b4] sm:$0xf]  ;;  %v6380_v63 = vor.u32 %v8333_v53, %v6379_v48  ;;  %v5840_v3 = vor.u32 %v8198_v55, %v5839_v54 }
  0x3c   :  { %2071 = vmatpush.bf16.msra.mxu0 %v5588_v24  ;;  %v6633_v59 = vld [vmem:[#allocation7 + $0x8dc] sm:$0xf0]  ;;  %v5733_v61 = vld [vmem:[#allocation7 + $0x1d4] sm:$0xf0]  ;;  %v6348_v62 = vor.u32 %v8320_v49, %v6345_v50  ;;  %v8311_v0 = vld [vmem:[#allocation7 + $0x634] sm:$0xf] }
  0x3d   :  { %2109 = vmatpush.bf16.msrb.mxu3 %v6488_v21  ;;  %v6309_v1 = vld [vmem:[#allocation7 + $0x654] sm:$0xf0]  ;;  %v8383_v2 = vld [vmem:[#allocation7 + $0x874] sm:$0xf]  ;;  %v6636_v4 = vor.u32 %v8392_v58, %v6633_v59  ;;  %v5803_v6 = vld [vmem:[#allocation7 + $0x240] sm:$0xf]  ;;  %v5736_v8 = vor.u32 %v8167_v60, %v5733_v61 }
  0x3e   :  { %v6597_v5 = vld [vmem:[#allocation7 + $0x894] sm:$0xf0]  ;;  %v8189_v7 = vld [vmem:[#allocation7 + $0x260] sm:$0xf0]  ;;  %v8248_v9 = vld [vmem:[#allocation7 + $0x43c] sm:$0xf]  ;;  %v6312_v13 = vor.u32 %v8311_v0, %v6309_v1 }
  0x3f   :  { %2082 = vmatpush.bf16.msra.mxu1 %v5948_v23  ;;  %2097 = vmatpush.bf16.msrb.mxu2 %v6164_v31  ;;  %v6057_v10 = vld [vmem:[#allocation7 + $0x45c] sm:$0xf0]  ;;  %v8158_v11 = vld [vmem:[#allocation7 + $0x16c] sm:$0xf]  ;;  %v5697_v12 = vld [vmem:[#allocation7 + $0x18c] sm:$0xf0]  ;;  %v5804_v16 = vor.u32 %v8189_v7, %v5803_v6  ;;  %v6600_v17 = vor.u32 %v8383_v2, %v6597_v5 }
  0x40   :  { %2072 = vmatpush.bf16.msra.mxu0 %v5552_v37  ;;  %v8302_v14 = vld [vmem:[#allocation7 + $0x5ec] sm:$0xf]  ;;  %v6273_v15 = vld [vmem:[#allocation7 + $0x60c] sm:$0xf0]  ;;  %v6060_v19 = vor.u32 %v8248_v9, %v6057_v10  ;;  %v5700_v20 = vor.u32 %v8158_v11, %v5697_v12  ;;  %v8239_v22 = vld [vmem:[#allocation7 + $0x3f4] sm:$0xf] }
  0x41   :  { %2110 = vmatpush.bf16.msrb.mxu3 %v6452_v34  ;;  %v8374_v18 = vld [vmem:[#allocation7 + $0x82c] sm:$0xf]  ;;  %v6561_v21 = vld [vmem:[#allocation7 + $0x84c] sm:$0xf0]  ;;  %v6021_v23 = vld [vmem:[#allocation7 + $0x414] sm:$0xf0]  ;;  %v6276_v27 = vor.u32 %v8302_v14, %v6273_v15 }
  0x42   :  { %v8149_v24 = vld [vmem:[#allocation7 + $0x124] sm:$0xf]  ;;  %v5661_v26 = vld [vmem:[#allocation7 + $0x144] sm:$0xf0]  ;;  %v6564_v30 = vor.u32 %v8374_v18, %v6561_v21  ;;  %v6024_v31 = vor.u32 %v8239_v22, %v6021_v23  ;;  %v8140_v35 = vld [vmem:[#allocation7 + $0xdc] sm:$0xf] }
  0x43   :  { %2083 = vmatpush.bf16.msra.mxu1 %v5912_v36  ;;  %2098 = vmatpush.bf16.msrb.mxu2 %v6128_v43  ;;  %v8293_v28 = vld [vmem:[#allocation7 + $0x5a4] sm:$0xf]  ;;  %v6237_v29 = vld [vmem:[#allocation7 + $0x5c4] sm:$0xf0]  ;;  %v5664_v32 = vor.u32 %v8149_v24, %v5661_v26  ;;  %v5625_v36 = vld [vmem:[#allocation7 + $0xfc] sm:$0xf0] }
  0x44   :  { %2073 = vmatpush.bf16.msra.mxu0 %v5516_v52  ;;  %v8365_v33 = vld [vmem:[#allocation7 + $0x7e4] sm:$0xf]  ;;  %v6525_v34 = vld [vmem:[#allocation7 + $0x804] sm:$0xf0]  ;;  %v6240_v37 = vor.u32 %v8293_v28, %v6237_v29  ;;  %v5628_v39 = vor.u32 %v8140_v35, %v5625_v36  ;;  %v8131_v40 = vld [vmem:[#allocation7 + $0x94] sm:$0xf] }
  0x45   :  { %2111 = vmatpush.bf16.msrb.mxu3 %v6416_v47  ;;  %v6528_v38 = vor.u32 %v8365_v33, %v6525_v34  ;;  %v5589_v41 = vld [vmem:[#allocation7 + $0xb4] sm:$0xf0]  ;;  %v8284_v25 = vld [vmem:[#allocation7 + $0x55c] sm:$0xf]  ;;  %v6201_v43 = vld [vmem:[#allocation7 + $0x57c] sm:$0xf0] }
  0x46   :  { %v5592_v42 = vor.u32 %v8131_v40, %v5589_v41  ;;  %v8356_v44 = vld [vmem:[#allocation7 + $0x79c] sm:$0xf]  ;;  %v6204_v45 = vor.u32 %v8284_v25, %v6201_v43  ;;  %v6489_v46 = vld [vmem:[#allocation7 + $0x7bc] sm:$0xf0]  ;;  %v8122_v48 = vld [vmem:[#allocation7 + $0x4c] sm:$0xf] }
  0x47   :  { %2084 = vmatpush.bf16.msra.mxu1 %v5876_v51  ;;  %2099 = vmatpush.bf16.msrb.mxu2 %v6092_v57  ;;  %v6492_v47 = vor.u32 %v8356_v44, %v6489_v46  ;;  %v5553_v49 = vld [vmem:[#allocation7 + $0x6c] sm:$0xf0]  ;;  %v8230_v50 = vld [vmem:[#allocation7 + $0x3ac] sm:$0xf]  ;;  %v8275_v54 = vld [vmem:[#allocation7 + $0x514] sm:$0xf] }
  0x48   :  { %2118 = vmatpush.bf16.msrb.mxu0 %v5772_v56  ;;  %v5556_v51 = vor.u32 %v8122_v48, %v5553_v49  ;;  %v5985_v52 = vld [vmem:[#allocation7 + $0x3cc] sm:$0xf0]  ;;  %v6165_v55 = vld [vmem:[#allocation7 + $0x534] sm:$0xf0]  ;;  %v8347_v56 = vld [vmem:[#allocation7 + $0x754] sm:$0xf] }
  0x49   :  { %2112 = vmatpush.bf16.msrb.mxu3 %v6380_v63  ;;  %v5988_v53 = vor.u32 %v8230_v50, %v5985_v52  ;;  %v6168_v57 = vor.u32 %v8275_v54, %v6165_v55  ;;  %v6453_v58 = vld [vmem:[#allocation7 + $0x774] sm:$0xf0]  ;;  %v8113_v60 = vld [vmem:[#allocation7 + $0x4] sm:$0xf]  ;;  %v5517_v61 = vld [vmem:[#allocation7 + $0x24] sm:$0xf0] }
  0x4a   :  { %v6456_v59 = vor.u32 %v8347_v56, %v6453_v58  ;;  %v5520_v63 = vor.u32 %v8113_v60, %v5517_v61  ;;  %v5949_v0 = vld [vmem:[#allocation7 + $0x384] sm:$0xf0]  ;;  %v8266_v2 = vld [vmem:[#allocation7 + $0x4cc] sm:$0xf]  ;;  %v6417_v5 = vld [vmem:[#allocation7 + $0x72c] sm:$0xf0] }
  0x4b   :  { %2144 = vmatpush.bf16.msra.mxu2 %v6348_v62  ;;  %2085 = vmatpush.bf16.msra.mxu1 %v5840_v3  ;;  %v8221_v62 = vld [vmem:[#allocation7 + $0x364] sm:$0xf]  ;;  %v6129_v3 = vld [vmem:[#allocation7 + $0x4ec] sm:$0xf0]  ;;  %v5913_v9 = vld [vmem:[#allocation7 + $0x33c] sm:$0xf0] }
  0x4c   :  { %2119 = vmatpush.bf16.msrb.mxu0 %v5736_v8  ;;  %v5952_v1 = vor.u32 %v8221_v62, %v5949_v0  ;;  %v6132_v6 = vor.u32 %v8266_v2, %v6129_v3  ;;  %v8212_v8 = vld [vmem:[#allocation7 + $0x31c] sm:$0xf]  ;;  %v8257_v11 = vld [vmem:[#allocation7 + $0x484] sm:$0xf]  ;;  %v6093_v12 = vld [vmem:[#allocation7 + $0x4a4] sm:$0xf0] }
  0x4d   :  { %2157 = vmatpush.bf16.msra.mxu3 %v6636_v4  ;;  %v8338_v4 = vld [vmem:[#allocation7 + $0x70c] sm:$0xf]  ;;  %v5916_v10 = vor.u32 %v8212_v8, %v5913_v9  ;;  %v6096_v14 = vor.u32 %v8257_v11, %v6093_v12  ;;  %v6381_v15 = vld [vmem:[#allocation7 + $0x6e4] sm:$0xf0]  ;;  %v5877_v18 = vld [vmem:[#allocation7 + $0x2f4] sm:$0xf0] }
  0x4e   :  { %v6420_v7 = vor.u32 %v8338_v4, %v6417_v5  ;;  %v5841_v21 = vld [vmem:[#allocation7 + $0x2ac] sm:$0xf0]  ;;  %v8185_v23 = vld [vmem:[#allocation7 + $0x244] sm:$0xf]  ;;  %v5805_v24 = vld [vmem:[#allocation7 + $0x264] sm:$0xf0] }
  0x4f   :  { %2145 = vmatpush.bf16.msra.mxu2 %v6312_v13  ;;  %2086 = vmatpush.bf16.msra.mxu1 %v5804_v16  ;;  %v8329_v13 = vld [vmem:[#allocation7 + $0x6c4] sm:$0xf]  ;;  %v5808_v26 = vor.u32 %v8185_v23, %v5805_v24  ;;  %v5703_v49 = vld [vmem:[#allocation7 + $0x170] sm:$0xf]  ;;  %v8163_v50 = vld [vmem:[#allocation7 + $0x190] sm:$0xf0] }
  0x50   :  { %2120 = vmatpush.bf16.msrb.mxu0 %v5700_v20  ;;  %v6384_v16 = vor.u32 %v8329_v13, %v6381_v15  ;;  %v8194_v20 = vld [vmem:[#allocation7 + $0x28c] sm:$0xf]  ;;  %v8325_v46 = vld [vmem:[#allocation7 + $0x6a0] sm:$0xf0]  ;;  %v6315_v55 = vld [vmem:[#allocation7 + $0x638] sm:$0xf]  ;;  %v5704_v58 = vor.u32 %v8163_v50, %v5703_v49 }
  0x51   :  { %2158 = vmatpush.bf16.msra.mxu3 %v6600_v17  ;;  %v8203_v17 = vld [vmem:[#allocation7 + $0x2d4] sm:$0xf]  ;;  %v5844_v22 = vor.u32 %v8194_v20, %v5841_v21  ;;  %v8397_v48 = vld [vmem:[#allocation7 + $0x8e0] sm:$0xf0]  ;;  %v6603_v60 = vld [vmem:[#allocation7 + $0x878] sm:$0xf] }
  0x52   :  { %v8388_v61 = vld [vmem:[#allocation7 + $0x898] sm:$0xf0]  ;;  %v8154_v0 = vld [vmem:[#allocation7 + $0x148] sm:$0xf0]  ;;  %v6279_v5 = vld [vmem:[#allocation7 + $0x5f0] sm:$0xf] }
  0x53   :  { %2131 = vmatpush.bf16.msrb.mxu1 %v6060_v19  ;;  %2146 = vmatpush.bf16.msra.mxu2 %v6276_v27  ;;  %v5880_v19 = vor.u32 %v8203_v17, %v5877_v18  ;;  %v138_v27 = vld [vmem:[#allocation6] sm:$0xf]  ;;  %v6604_v4 = vor.u32 %v8388_v61, %v6603_v60  ;;  %v8307_v8 = vld [vmem:[#allocation7 + $0x610] sm:$0xf0]  ;;  %v6567_v9 = vld [vmem:[#allocation7 + $0x830] sm:$0xf] }
  0x54   :  { %2121 = vmatpush.bf16.msrb.mxu0 %v5664_v32  ;;  %v140_v28 = vperm.slane %v138_v27, 0  ;;  %v8181_v32 = vld [vmem:[#allocation7 + $0x220] sm:$0xf0]  ;;  %v142_v34 = vperm.slane %v138_v27, 2  ;;  %v143_v35 = vperm.slane %v138_v27, 3  ;;  %v141_v62 = vperm.slane %v138_v27, 1 }
  0x55   :  { %2159 = vmatpush.bf16.msra.mxu3 %v6564_v30  ;;  %v5631_v12 = vld [vmem:[#allocation7 + $0xe0] sm:$0xf]  ;;  %v8145_v13 = vld [vmem:[#allocation7 + $0x100] sm:$0xf0]  ;;  %v6280_v17 = vor.u32 %v8307_v8, %v6279_v5  ;;  %v8298_v20 = vld [vmem:[#allocation7 + $0x5c8] sm:$0xf0] }
  0x56   :  { %v8253_v15 = vld [vmem:[#allocation7 + $0x460] sm:$0xf0]  ;;  %v6531_v21 = vld [vmem:[#allocation7 + $0x7e8] sm:$0xf]  ;;  %v5632_v24 = vor.u32 %v8145_v13, %v5631_v12  ;;  %v5595_v27 = vld [vmem:[#allocation7 + $0x98] sm:$0xf] }
  0x57   :  { %2132 = vmatpush.bf16.msrb.mxu1 %v6024_v31  ;;  %2147 = vmatpush.bf16.msra.mxu2 %v6240_v37  ;;  %v5775_v31 = vld [vmem:[#allocation7 + $0x200] sm:$0xf]  ;;  %v8352_v49 = vld [vmem:[#allocation7 + $0x778] sm:$0xf0]  ;;  %v8177_v60 = vld [vmem:[#allocation7 + $0x204] sm:$0xf] }
  0x58   :  { %2122 = vmatpush.bf16.msrb.mxu0 %v5628_v39  ;;  %v5776_v36 = vor.u32 %v8181_v32, %v5775_v31  ;;  %v8172_v39 = vld [vmem:[#allocation7 + $0x1d8] sm:$0xf0]  ;;  %v5777_v61 = vld [vmem:[#allocation7 + $0x224] sm:$0xf0]  ;;  %v5919_v5 = vld [vmem:[#allocation7 + $0x320] sm:$0xf] }
  0x59   :  { %2160 = vmatpush.bf16.msra.mxu3 %v6528_v38  ;;  %v5739_v38 = vld [vmem:[#allocation7 + $0x1b8] sm:$0xf]  ;;  %v8262_v12 = vld [vmem:[#allocation7 + $0x4a8] sm:$0xf0]  ;;  %v6387_v13 = vld [vmem:[#allocation7 + $0x6c8] sm:$0xf] }
  0x5a   :  { %vm5462_vm2 = vcmask 1045508   ;;  %vm5464_vm3 = vcmask 1043456  }
  0x5b   :  { %2148 = vmatpush.bf16.msra.mxu2 %v6204_v45  ;;  %2133 = vmatpush.bf16.msrb.mxu1 %v5988_v53  ;;  %v5740_v45 = vor.u32 %v8172_v39, %v5739_v38  ;;  %v8361_v38 = vld [vmem:[#allocation7 + $0x7c0] sm:$0xf0] }
  0x5c   :  { %2123 = vmatpush.bf16.msrb.mxu0 %v5592_v42  ;;  %v6351_v42 = vld [vmem:[#allocation7 + $0x680] sm:$0xf] }
  0x5d   :  { %2161 = vmatpush.bf16.msra.mxu3 %v6492_v47  ;;  %v6639_v47 = vld [vmem:[#allocation7 + $0x8c0] sm:$0xf]  ;;  %v6352_v53 = vor.u32 %v8325_v46, %v6351_v42  ;;  %v8127_v42 = vld [vmem:[#allocation7 + $0x70] sm:$0xf0]  ;;  %v6171_v46 = vld [vmem:[#allocation7 + $0x518] sm:$0xf] }
  0x5e   :  { %v6640_v54 = vor.u32 %v8397_v48, %v6639_v47  ;;  %v8280_v47 = vld [vmem:[#allocation7 + $0x538] sm:$0xf0]  ;;  %v6459_v48 = vld [vmem:[#allocation7 + $0x758] sm:$0xf] }
  0x5f   :  { %2149 = vmatpush.bf16.msra.mxu2 %v6168_v57  ;;  %2134 = vmatpush.bf16.msrb.mxu1 %v5952_v1 }
  0x60   :  { %2124 = vmatpush.bf16.msrb.mxu0 %v5556_v51 }
  0x61   :  { %2162 = vmatpush.bf16.msra.mxu3 %v6456_v59  ;;  %v8316_v59 = vld [vmem:[#allocation7 + $0x658] sm:$0xf0] }
  0x62   :  { %v6316_v3 = vor.u32 %v8316_v59, %v6315_v55  ;;  %v8226_v55 = vld [vmem:[#allocation7 + $0x388] sm:$0xf0]  ;;  %v6460_v59 = vor.u32 %v8352_v49, %v6459_v48  ;;  %v5811_v49 = vld [vmem:[#allocation7 + $0x248] sm:$0xf] }
  0x63   :  { %2150 = vmatpush.bf16.msra.mxu2 %v6132_v6  ;;  %2135 = vmatpush.bf16.msrb.mxu1 %v5916_v10  ;;  %v8379_v10 = vld [vmem:[#allocation7 + $0x850] sm:$0xf0] }
  0x64   :  { %2125 = vmatpush.bf16.msrb.mxu0 %v5520_v63  ;;  %v5667_v63 = vld [vmem:[#allocation7 + $0x128] sm:$0xf]  ;;  %v6568_v18 = vor.u32 %v8379_v10, %v6567_v9  ;;  %v5741_v10 = vld [vmem:[#allocation7 + $0x1dc] sm:$0xf0] }
  0x65   :  { %2163 = vmatpush.bf16.msra.mxu3 %v6420_v7  ;;  %v5668_v7 = vor.u32 %v8154_v0, %v5667_v63  ;;  %v8271_v63 = vld [vmem:[#allocation7 + $0x4f0] sm:$0xf0]  ;;  %v6423_v0 = vld [vmem:[#allocation7 + $0x710] sm:$0xf] }
  0x67   :  { %2151 = vmatpush.bf16.msra.mxu2 %v6096_v14  ;;  %2136 = vmatpush.bf16.msrb.mxu1 %v5880_v19  ;;  %v6063_v14 = vld [vmem:[#allocation7 + $0x440] sm:$0xf]  ;;  %v6243_v19 = vld [vmem:[#allocation7 + $0x5a8] sm:$0xf] }
  0x68   :  { %v6244_v31 = vor.u32 %v8298_v20, %v6243_v19  ;;  %v6641_v19 = vld [vmem:[#allocation7 + $0x8e4] sm:$0xf0] }
  0x69   :  { %2164 = vmatpush.bf16.msra.mxu3 %v6384_v16 }
  0x6b   :  { %2137 = vmatpush.bf16.msrb.mxu1 %v5844_v22  ;;  %v8370_v22 = vld [vmem:[#allocation7 + $0x808] sm:$0xf0] }
  0x6c   :  { %v6532_v32 = vor.u32 %v8370_v22, %v6531_v21  ;;  %v5883_v21 = vld [vmem:[#allocation7 + $0x2d8] sm:$0xf]  ;;  %v8208_v22 = vld [vmem:[#allocation7 + $0x2f8] sm:$0xf0] }
  0x6f   :  { %2138 = vmatpush.bf16.msrb.mxu1 %v5808_v26  ;;  %v6064_v26 = vor.u32 %v8253_v15, %v6063_v14  ;;  %v8334_v14 = vld [vmem:[#allocation7 + $0x6e8] sm:$0xf0]  ;;  %v8321_v15 = vld [vmem:[#allocation7 + $0x684] sm:$0xf] }
  0xa7   :  { %v201_v29 = vpop.f32.mrf.mxu1 }
  0xa8   :  { %v202_v30 = vadd.f32 %v201_v29, %v140_v28  ;;  %v8136_v28 = vld [vmem:[#allocation7 + $0xb8] sm:$0xf0]  ;;  %v6027_v29 = vld [vmem:[#allocation7 + $0x3f8] sm:$0xf] }
  0xa9   :  { %v5596_v39 = vor.u32 %v8136_v28, %v5595_v27  ;;  %v8159_v27 = vld [vmem:[#allocation7 + $0x174] sm:$0xf]  ;;  %v5705_v28 = vld [vmem:[#allocation7 + $0x194] sm:$0xf0] }
  0xaa   :  { %v244_v33 = vmax.f32 %v202_v30, 0.0  ;;  %v8244_v30 = vld [vmem:[#allocation7 + $0x418] sm:$0xf0] }
  0xac   :  { %v9037_v37 = vpack.c.bf16 %v244_v33, %v244_v33  ;;  %v6207_v33 = vld [vmem:[#allocation7 + $0x560] sm:$0xf] }
  0xad   :  { %v227_v40 = vpop.f32.mrf.mxu2 }
  0xae   :  { %2074 = vmatmul.bf16.vlgmr.msra.gmra.mxu0 %v9037_v37  ;;  %v228_v25 = vadd.f32 %v227_v40, %v142_v34  ;;  %v6028_v40 = vor.u32 %v8244_v30, %v6027_v29 }
  0xaf   :  { %v240_v41 = vpop.f32.mrf.mxu3  ;;  %2170 = vmatpush.bf16.msra.mxu0 %v5776_v36  ;;  %v203_v44 = vpop.f32.mrf.mxu1  ;;  %v6495_v36 = vld [vmem:[#allocation7 + $0x7a0] sm:$0xf] }
  0xb0   :  { %v241_v43 = vadd.f32 %v240_v41, %v143_v35  ;;  %v246_v51 = vmax.f32 %v228_v25, 0.0  ;;  %v8289_v35 = vld [vmem:[#allocation7 + $0x580] sm:$0xf0]  ;;  %v5559_v41 = vld [vmem:[#allocation7 + $0x50] sm:$0xf] }
  0xb1   :  { %v5991_v25 = vld [vmem:[#allocation7 + $0x3b0] sm:$0xf]  ;;  %v6208_v44 = vor.u32 %v8289_v35, %v6207_v33  ;;  %v5560_v50 = vor.u32 %v8127_v42, %v5559_v41  ;;  %v6317_v33 = vld [vmem:[#allocation7 + $0x65c] sm:$0xf0] }
  0xb2   :  { %v247_v52 = vmax.f32 %v241_v43, 0.0  ;;  %v9040_v56 = vpack.c.bf16 %v246_v51, %v246_v51  ;;  %v8235_v43 = vld [vmem:[#allocation7 + $0x3d0] sm:$0xf0]  ;;  %v6605_v35 = vld [vmem:[#allocation7 + $0x89c] sm:$0xf0] }
  0xb3   :  { %2171 = vmatpush.bf16.msra.mxu0 %v5740_v45  ;;  %v6496_v45 = vor.u32 %v8361_v38, %v6495_v36  ;;  %v5992_v51 = vor.u32 %v8235_v43, %v5991_v25  ;;  %v5708_v36 = vor.u32 %v8159_v27, %v5705_v28  ;;  %v5847_v38 = vld [vmem:[#allocation7 + $0x290] sm:$0xf]  ;;  %v8303_v43 = vld [vmem:[#allocation7 + $0x5f4] sm:$0xf]  ;;  %v8114_v28 = vld [vmem:[#allocation7 + $0xc] sm:$0xf] }
  0xb4   :  { %v9042_v57 = vpack.c.bf16 %v247_v52, %v247_v52  ;;  %2100 = vmatmul.bf16.vlgmr.msrb.gmra.mxu2 %v9040_v56  ;;  %v5523_v52 = vld [vmem:[#allocation7 + $0x8] sm:$0xf]  ;;  %v5669_v41 = vld [vmem:[#allocation7 + $0x14c] sm:$0xf0] }
  0xb5   :  { %2196 = vmatpush.bf16.msrb.mxu2 %v6352_v53  ;;  %v229_v1 = vpop.f32.mrf.mxu2  ;;  %v8118_v53 = vld [vmem:[#allocation7 + $0x28] sm:$0xf0] }
  0xb6   :  { %2113 = vmatmul.bf16.vlgmr.msrb.gmra.mxu3 %v9042_v57  ;;  %v8343_v1 = vld [vmem:[#allocation7 + $0x730] sm:$0xf0] }
  0xb7   :  { %2209 = vmatpush.bf16.msrb.mxu3 %v6640_v54  ;;  %v242_v2 = vpop.f32.mrf.mxu3  ;;  %2172 = vmatpush.bf16.msra.mxu0 %v5704_v58  ;;  %v214_v6 = vpop.f32.mrf.mxu1  ;;  %v5955_v54 = vld [vmem:[#allocation7 + $0x368] sm:$0xf]  ;;  %v6172_v58 = vor.u32 %v8280_v47, %v6171_v46  ;;  %v6424_v9 = vor.u32 %v8343_v1, %v6423_v0  ;;  %v8375_v46 = vld [vmem:[#allocation7 + $0x834] sm:$0xf]  ;;  %v6569_v47 = vld [vmem:[#allocation7 + $0x854] sm:$0xf0] }
  0xb8   :  { %v215_v11 = vadd.f32 %v214_v6, %v141_v62  ;;  %v6135_v62 = vld [vmem:[#allocation7 + $0x4d0] sm:$0xf]  ;;  %v5524_v2 = vor.u32 %v8118_v53, %v5523_v52  ;;  %v8217_v6 = vld [vmem:[#allocation7 + $0x340] sm:$0xf0]  ;;  %v5633_v52 = vld [vmem:[#allocation7 + $0x104] sm:$0xf0] }
  0xb9   :  { %2197 = vmatpush.bf16.msrb.mxu2 %v6316_v3  ;;  %v5956_v3 = vor.u32 %v8226_v55, %v5955_v54  ;;  %v6136_v8 = vor.u32 %v8271_v63, %v6135_v62  ;;  %v8249_v53 = vld [vmem:[#allocation7 + $0x444] sm:$0xf]  ;;  %v6065_v54 = vld [vmem:[#allocation7 + $0x464] sm:$0xf0]  ;;  %v8366_v62 = vld [vmem:[#allocation7 + $0x7ec] sm:$0xf] }
  0xba   :  { %v245_v16 = vmax.f32 %v215_v11, 0.0  ;;  %v6099_v11 = vld [vmem:[#allocation7 + $0x488] sm:$0xf]  ;;  %v6533_v63 = vld [vmem:[#allocation7 + $0x80c] sm:$0xf0]  ;;  %v6068_v1 = vor.u32 %v8249_v53, %v6065_v54 }
  0xbb   :  { %2210 = vmatpush.bf16.msrb.mxu3 %v6604_v4  ;;  %2173 = vmatpush.bf16.msra.mxu0 %v5668_v7  ;;  %v5780_v4 = vor.u32 %v8177_v60, %v5777_v61  ;;  %v8168_v7 = vld [vmem:[#allocation7 + $0x1bc] sm:$0xf]  ;;  %v6245_v61 = vld [vmem:[#allocation7 + $0x5cc] sm:$0xf0]  ;;  %v6359_v53 = vld [vmem:[#allocation7 + $0x688] sm:$0xf] }
  0xbc   :  { %v9046_v23 = vpack.c.bf16 %v245_v16, %v245_v16  ;;  %v5920_v16 = vor.u32 %v8217_v6, %v5919_v5  ;;  %v5744_v20 = vor.u32 %v8168_v7, %v5741_v10  ;;  %v6029_v5 = vld [vmem:[#allocation7 + $0x41c] sm:$0xf0]  ;;  %v6536_v7 = vor.u32 %v8366_v62, %v6533_v63  ;;  %v8357_v10 = vld [vmem:[#allocation7 + $0x7a4] sm:$0xf] }
  0xbd   :  { %2198 = vmatpush.bf16.msrb.mxu2 %v6280_v17  ;;  %v6353_v17 = vld [vmem:[#allocation7 + $0x6a4] sm:$0xf0]  ;;  %v5885_v62 = vld [vmem:[#allocation7 + $0x2fc] sm:$0xf0] }
  0xbe   :  { %2087 = vmatmul.bf16.vlgmr.msra.gmra.mxu1 %v9046_v23  ;;  %2126 = vmatmul.bf16.vlgmr.msrb.gmra.mxu0 %v9037_v37  ;;  %v6356_v29 = vor.u32 %v8321_v15, %v6353_v17  ;;  %v5561_v15 = vld [vmem:[#allocation7 + $0x74] sm:$0xf0] }
  0xbf   :  { %2211 = vmatpush.bf16.msrb.mxu3 %v6568_v18  ;;  %v216_v34 = vpop.f32.mrf.mxu1  ;;  %2174 = vmatpush.bf16.msra.mxu0 %v5632_v24  ;;  %v8393_v18 = vld [vmem:[#allocation7 + $0x8c4] sm:$0xf]  ;;  %v6100_v24 = vor.u32 %v8262_v12, %v6099_v11  ;;  %v6497_v11 = vld [vmem:[#allocation7 + $0x7c4] sm:$0xf0]  ;;  %v5993_v17 = vld [vmem:[#allocation7 + $0x3d4] sm:$0xf0] }
  0xc0   :  { %2183 = vmatpush.bf16.msra.mxu1 %v6064_v26  ;;  %v6388_v26 = vor.u32 %v8334_v14, %v6387_v13  ;;  %v6644_v30 = vor.u32 %v8393_v18, %v6641_v19  ;;  %v8384_v34 = vld [vmem:[#allocation7 + $0x87c] sm:$0xf]  ;;  %v8123_v14 = vld [vmem:[#allocation7 + $0x54] sm:$0xf]  ;;  %v6500_v19 = vor.u32 %v8357_v10, %v6497_v11  ;;  %v5849_v11 = vld [vmem:[#allocation7 + $0x2b4] sm:$0xf0] }
  0xc1   :  { %2199 = vmatpush.bf16.msrb.mxu2 %v6244_v31  ;;  %v8312_v31 = vld [vmem:[#allocation7 + $0x63c] sm:$0xf]  ;;  %v6608_v25 = vor.u32 %v8384_v34, %v6605_v35  ;;  %v5783_v34 = vld [vmem:[#allocation7 + $0x208] sm:$0xf]  ;;  %v8182_v35 = vld [vmem:[#allocation7 + $0x228] sm:$0xf0] }
  0xc2   :  { %v6320_v42 = vor.u32 %v8312_v31, %v6317_v33  ;;  %v5957_v31 = vld [vmem:[#allocation7 + $0x38c] sm:$0xf0]  ;;  %v8195_v10 = vld [vmem:[#allocation7 + $0x294] sm:$0xf] }
  0xc3   :  { %2212 = vmatpush.bf16.msrb.mxu3 %v6532_v32  ;;  %2175 = vmatpush.bf16.msra.mxu0 %v5596_v39  ;;  %v5884_v32 = vor.u32 %v8208_v22, %v5883_v21  ;;  %v8199_v39 = vld [vmem:[#allocation7 + $0x2b0] sm:$0xf0]  ;;  %v6173_v21 = vld [vmem:[#allocation7 + $0x53c] sm:$0xf0]  ;;  %v8348_v22 = vld [vmem:[#allocation7 + $0x75c] sm:$0xf] }
  0xc4   :  { %2184 = vmatpush.bf16.msra.mxu1 %v6028_v40  ;;  %2152 = vmatmul.bf16.vlgmr.msra.gmra.mxu2 %v9040_v56  ;;  %v8150_v40 = vld [vmem:[#allocation7 + $0x12c] sm:$0xf] }
  0xc5   :  { %2200 = vmatpush.bf16.msrb.mxu2 %v6208_v44  ;;  %v5848_v44 = vor.u32 %v8199_v39, %v5847_v38  ;;  %v5672_v48 = vor.u32 %v8150_v40, %v5669_v41  ;;  %v6137_v38 = vld [vmem:[#allocation7 + $0x4f4] sm:$0xf0]  ;;  %v8339_v39 = vld [vmem:[#allocation7 + $0x714] sm:$0xf] }
  0xc6   :  { %2165 = vmatmul.bf16.vlgmr.msra.gmra.mxu3 %v9042_v57  ;;  %v6425_v40 = vld [vmem:[#allocation7 + $0x734] sm:$0xf0] }
  0xc7   :  { %2213 = vmatpush.bf16.msrb.mxu3 %v6496_v45  ;;  %2176 = vmatpush.bf16.msra.mxu0 %v5560_v50  ;;  %v6281_v45 = vld [vmem:[#allocation7 + $0x614] sm:$0xf0]  ;;  %v8190_v50 = vld [vmem:[#allocation7 + $0x268] sm:$0xf0] }
  0xc8   :  { %2185 = vmatpush.bf16.msra.mxu1 %v5992_v51  ;;  %v8141_v51 = vld [vmem:[#allocation7 + $0xe4] sm:$0xf]  ;;  %v6284_v55 = vor.u32 %v8303_v43, %v6281_v45  ;;  %v5812_v60 = vor.u32 %v8190_v50, %v5811_v49  ;;  %v5747_v45 = vld [vmem:[#allocation7 + $0x1c0] sm:$0xf]  ;;  %v8258_v49 = vld [vmem:[#allocation7 + $0x48c] sm:$0xf] }
  0xc9   :  { %2201 = vmatpush.bf16.msrb.mxu2 %v6172_v58  ;;  %v6572_v58 = vor.u32 %v8375_v46, %v6569_v47  ;;  %v5636_v0 = vor.u32 %v8141_v51, %v5633_v52  ;;  %v8213_v43 = vld [vmem:[#allocation7 + $0x324] sm:$0xf]  ;;  %v6428_v47 = vor.u32 %v8339_v39, %v6425_v40  ;;  %v6101_v50 = vld [vmem:[#allocation7 + $0x4ac] sm:$0xf0]  ;;  %v8330_v51 = vld [vmem:[#allocation7 + $0x6cc] sm:$0xf] }
  0xca   :  { %v6389_v52 = vld [vmem:[#allocation7 + $0x6ec] sm:$0xf0]  ;;  %v6104_v63 = vor.u32 %v8258_v49, %v6101_v50  ;;  %v8371_v39 = vld [vmem:[#allocation7 + $0x810] sm:$0xf0]  ;;  %v6503_v49 = vld [vmem:[#allocation7 + $0x7a8] sm:$0xf] }
  0xcb   :  { %2214 = vmatpush.bf16.msrb.mxu3 %v6460_v59  ;;  %2177 = vmatpush.bf16.msra.mxu0 %v5524_v2  ;;  %v8294_v59 = vld [vmem:[#allocation7 + $0x5ac] sm:$0xf]  ;;  %v8132_v2 = vld [vmem:[#allocation7 + $0x9c] sm:$0xf] }
  0xcc   :  { %2186 = vmatpush.bf16.msra.mxu1 %v5956_v3  ;;  %v5597_v3 = vld [vmem:[#allocation7 + $0xbc] sm:$0xf0]  ;;  %v6248_v6 = vor.u32 %v8294_v59, %v6245_v61  ;;  %v8398_v59 = vld [vmem:[#allocation7 + $0x8e8] sm:$0xf0]  ;;  %v8204_v61 = vld [vmem:[#allocation7 + $0x2dc] sm:$0xf] }
  0xcd   :  { %2202 = vmatpush.bf16.msrb.mxu2 %v6136_v8  ;;  %v8285_v8 = vld [vmem:[#allocation7 + $0x564] sm:$0xf]  ;;  %v5600_v12 = vor.u32 %v8132_v2, %v5597_v3  ;;  %v5711_v3 = vld [vmem:[#allocation7 + $0x178] sm:$0xf]  ;;  %v8362_v50 = vld [vmem:[#allocation7 + $0x7c8] sm:$0xf0] }
  0xce   :  { %2139 = vmatmul.bf16.vlgmr.msrb.gmra.mxu1 %v9046_v23  ;;  %2178 = vmatmul.bf16.vlgmr.msra.gmra.mxu0 %v9037_v37 }
  0xcf   :  { %2222 = vmatpush.bf16.msrb.mxu0 %v5780_v4  ;;  %2215 = vmatpush.bf16.msrb.mxu3 %v6424_v9  ;;  %v8240_v4 = vld [vmem:[#allocation7 + $0x3fc] sm:$0xf]  ;;  %v6209_v9 = vld [vmem:[#allocation7 + $0x584] sm:$0xf0] }
  0xd0   :  { %2187 = vmatpush.bf16.msra.mxu1 %v5920_v16  ;;  %v6032_v13 = vor.u32 %v8240_v4, %v6029_v5  ;;  %v8231_v16 = vld [vmem:[#allocation7 + $0x3b4] sm:$0xf]  ;;  %v6212_v18 = vor.u32 %v8285_v8, %v6209_v9  ;;  %v8164_v4 = vld [vmem:[#allocation7 + $0x198] sm:$0xf0]  ;;  %v6323_v5 = vld [vmem:[#allocation7 + $0x640] sm:$0xf] }
  0xd1   :  { %2203 = vmatpush.bf16.msrb.mxu2 %v6100_v24  ;;  %v6461_v24 = vld [vmem:[#allocation7 + $0x77c] sm:$0xf0]  ;;  %v5996_v27 = vor.u32 %v8231_v16, %v5993_v17  ;;  %v8389_v9 = vld [vmem:[#allocation7 + $0x8a0] sm:$0xf0]  ;;  %v8155_v16 = vld [vmem:[#allocation7 + $0x150] sm:$0xf0] }
  0xd2   :  { %v6464_v33 = vor.u32 %v8348_v22, %v6461_v24  ;;  %v6611_v8 = vld [vmem:[#allocation7 + $0x880] sm:$0xf]  ;;  %v6287_v17 = vld [vmem:[#allocation7 + $0x5f8] sm:$0xf]  ;;  %v8186_v22 = vld [vmem:[#allocation7 + $0x24c] sm:$0xf] }
  0xd3   :  { %2223 = vmatpush.bf16.msrb.mxu0 %v5744_v20  ;;  %2216 = vmatpush.bf16.msrb.mxu3 %v6388_v26  ;;  %v8276_v20 = vld [vmem:[#allocation7 + $0x51c] sm:$0xf]  ;;  %v5564_v26 = vor.u32 %v8123_v14, %v5561_v15  ;;  %v6612_v14 = vor.u32 %v8389_v9, %v6611_v8  ;;  %v5675_v15 = vld [vmem:[#allocation7 + $0x130] sm:$0xf] }
  0xd4   :  { %2188 = vmatpush.bf16.msra.mxu1 %v5884_v32  ;;  %2204 = vmatmul.bf16.vlgmr.msrb.gmra.mxu2 %v9040_v56  ;;  %v6176_v32 = vor.u32 %v8276_v20, %v6173_v21  ;;  %v6575_v20 = vld [vmem:[#allocation7 + $0x838] sm:$0xf]  ;;  %v8380_v21 = vld [vmem:[#allocation7 + $0x858] sm:$0xf0]  ;;  %v5813_v24 = vld [vmem:[#allocation7 + $0x26c] sm:$0xf0] }
  0xd5   :  { %2248 = vmatpush.bf16.msra.mxu2 %v6356_v29  ;;  %v5525_v29 = vld [vmem:[#allocation7 + $0x2c] sm:$0xf0] }
  0xd6   :  { %2217 = vmatmul.bf16.vlgmr.msrb.gmra.mxu3 %v9042_v57  ;;  %v5528_v41 = vor.u32 %v8114_v28, %v5525_v29  ;;  %v8254_v28 = vld [vmem:[#allocation7 + $0x468] sm:$0xf0]  ;;  %v5785_v9 = vld [vmem:[#allocation7 + $0x22c] sm:$0xf0] }
  0xd7   :  { %2261 = vmatpush.bf16.msra.mxu3 %v6644_v30  ;;  %2224 = vmatpush.bf16.msrb.mxu0 %v5708_v36  ;;  %v8222_v30 = vld [vmem:[#allocation7 + $0x36c] sm:$0xf]  ;;  %v8267_v36 = vld [vmem:[#allocation7 + $0x4d4] sm:$0xf] }
  0xd8   :  { %2189 = vmatpush.bf16.msra.mxu1 %v5848_v44  ;;  %v5921_v44 = vld [vmem:[#allocation7 + $0x344] sm:$0xf0]  ;;  %v6140_v46 = vor.u32 %v8267_v36, %v6137_v38  ;;  %v6539_v38 = vld [vmem:[#allocation7 + $0x7f0] sm:$0xf] }
  0xd9   :  { %2249 = vmatpush.bf16.msra.mxu2 %v6320_v42  ;;  %v5960_v42 = vor.u32 %v8222_v30, %v5957_v31  ;;  %v5924_v54 = vor.u32 %v8213_v43, %v5921_v44  ;;  %v6576_v30 = vor.u32 %v8380_v21, %v6575_v20  ;;  %v5639_v31 = vld [vmem:[#allocation7 + $0xe8] sm:$0xf]  ;;  %v5603_v43 = vld [vmem:[#allocation7 + $0xa0] sm:$0xf]  ;;  %v8137_v44 = vld [vmem:[#allocation7 + $0xc0] sm:$0xf0] }
  0xda   :  { %v8169_v20 = vld [vmem:[#allocation7 + $0x1c4] sm:$0xf]  ;;  %v5749_v21 = vld [vmem:[#allocation7 + $0x1e4] sm:$0xf0] }
  0xdb   :  { %2262 = vmatpush.bf16.msra.mxu3 %v6608_v25  ;;  %2225 = vmatpush.bf16.msrb.mxu0 %v5672_v48  ;;  %v5784_v25 = vor.u32 %v8182_v35, %v5783_v34  ;;  %v8173_v48 = vld [vmem:[#allocation7 + $0x1e0] sm:$0xf0]  ;;  %v6251_v34 = vld [vmem:[#allocation7 + $0x5b0] sm:$0xf]  ;;  %v8299_v35 = vld [vmem:[#allocation7 + $0x5d0] sm:$0xf0] }
  0xdc   :  { %2190 = vmatpush.bf16.msra.mxu1 %v5812_v60  ;;  %v5748_v60 = vor.u32 %v8173_v48, %v5747_v45  ;;  %v6540_v45 = vor.u32 %v8371_v39, %v6539_v38 }
  0xdd   :  { %2250 = vmatpush.bf16.msra.mxu2 %v6284_v55  ;;  %v8326_v55 = vld [vmem:[#allocation7 + $0x6a8] sm:$0xf0] }
  0xdf   :  { %2263 = vmatpush.bf16.msra.mxu3 %v6572_v58  ;;  %2226 = vmatpush.bf16.msrb.mxu0 %v5636_v0  ;;  %v6647_v58 = vld [vmem:[#allocation7 + $0x8c8] sm:$0xf]  ;;  %v6392_v0 = vor.u32 %v8330_v51, %v6389_v52  ;;  %v5604_v51 = vor.u32 %v8137_v44, %v5603_v43  ;;  %v5999_v52 = vld [vmem:[#allocation7 + $0x3b8] sm:$0xf]  ;;  %v8313_v44 = vld [vmem:[#allocation7 + $0x644] sm:$0xf] }
  0xe0   :  { %2235 = vmatpush.bf16.msrb.mxu1 %v6068_v1  ;;  %v6360_v1 = vor.u32 %v8326_v55, %v6359_v53  ;;  %v6648_v2 = vor.u32 %v8398_v59, %v6647_v58  ;;  %v8236_v53 = vld [vmem:[#allocation7 + $0x3d8] sm:$0xf0]  ;;  %v5567_v55 = vld [vmem:[#allocation7 + $0x58] sm:$0xf]  ;;  %v6504_v59 = vor.u32 %v8362_v50, %v6503_v49 }
  0xe1   :  { %2251 = vmatpush.bf16.msra.mxu2 %v6248_v6  ;;  %2191 = vmatmul.bf16.vlgmr.msra.gmra.mxu1 %v9046_v23  ;;  %v5888_v6 = vor.u32 %v8204_v61, %v5885_v62  ;;  %v8128_v58 = vld [vmem:[#allocation7 + $0x78] sm:$0xf0]  ;;  %v8281_v61 = vld [vmem:[#allocation7 + $0x540] sm:$0xf0]  ;;  %v6000_v62 = vor.u32 %v8236_v53, %v5999_v52  ;;  %v8151_v52 = vld [vmem:[#allocation7 + $0x134] sm:$0xf] }
  0xe2   :  { %v8200_v49 = vld [vmem:[#allocation7 + $0x2b8] sm:$0xf0]  ;;  %v5677_v53 = vld [vmem:[#allocation7 + $0x154] sm:$0xf0] }
  0xe3   :  { %2264 = vmatpush.bf16.msra.mxu3 %v6536_v7  ;;  %2227 = vmatpush.bf16.msrb.mxu0 %v5600_v12  ;;  %v8317_v7 = vld [vmem:[#allocation7 + $0x660] sm:$0xf0]  ;;  %v5712_v12 = vor.u32 %v8164_v4, %v5711_v3  ;;  %v8227_v3 = vld [vmem:[#allocation7 + $0x390] sm:$0xf0] }
  0xe4   :  { %2236 = vmatpush.bf16.msrb.mxu1 %v6032_v13  ;;  %v6324_v13 = vor.u32 %v8317_v7, %v6323_v5  ;;  %v5531_v5 = vld [vmem:[#allocation7 + $0x10] sm:$0xf]  ;;  %v8178_v7 = vld [vmem:[#allocation7 + $0x20c] sm:$0xf] }
  0xe5   :  { %2252 = vmatpush.bf16.msra.mxu2 %v6212_v18  ;;  %v5852_v18 = vor.u32 %v8195_v10, %v5849_v11  ;;  %v6143_v10 = vld [vmem:[#allocation7 + $0x4d8] sm:$0xf]  ;;  %v8272_v11 = vld [vmem:[#allocation7 + $0x4f8] sm:$0xf0] }
  0xe7   :  { %2265 = vmatpush.bf16.msra.mxu3 %v6500_v19  ;;  %2228 = vmatpush.bf16.msrb.mxu0 %v5564_v26  ;;  %v8308_v19 = vld [vmem:[#allocation7 + $0x618] sm:$0xf0]  ;;  %v5676_v26 = vor.u32 %v8155_v16, %v5675_v15  ;;  %v5927_v16 = vld [vmem:[#allocation7 + $0x328] sm:$0xf] }
  0xe8   :  { %2237 = vmatpush.bf16.msrb.mxu1 %v5996_v27  ;;  %v6071_v27 = vld [vmem:[#allocation7 + $0x448] sm:$0xf]  ;;  %v6288_v29 = vor.u32 %v8308_v19, %v6287_v17  ;;  %v8218_v17 = vld [vmem:[#allocation7 + $0x348] sm:$0xf0]  ;;  %v6144_v19 = vor.u32 %v8272_v11, %v6143_v10  ;;  %v8367_v11 = vld [vmem:[#allocation7 + $0x7f4] sm:$0xf] }
  0xe9   :  { %2253 = vmatpush.bf16.msra.mxu2 %v6176_v32  ;;  %v8146_v32 = vld [vmem:[#allocation7 + $0x108] sm:$0xf0]  ;;  %v6072_v36 = vor.u32 %v8254_v28, %v6071_v27  ;;  %v6395_v27 = vld [vmem:[#allocation7 + $0x6d0] sm:$0xf]  ;;  %v8335_v28 = vld [vmem:[#allocation7 + $0x6f0] sm:$0xf0] }
  0xea   :  { %v5640_v40 = vor.u32 %v8146_v32, %v5639_v31  ;;  %v6361_v31 = vld [vmem:[#allocation7 + $0x6ac] sm:$0xf0]  ;;  %v8394_v32 = vld [vmem:[#allocation7 + $0x8cc] sm:$0xf]  ;;  %v6396_v39 = vor.u32 %v8335_v28, %v6395_v27  ;;  %v8232_v28 = vld [vmem:[#allocation7 + $0x3bc] sm:$0xf] }
  0xeb   :  { %2266 = vmatpush.bf16.msra.mxu3 %v6464_v33  ;;  %2229 = vmatpush.bf16.msrb.mxu0 %v5528_v41  ;;  %v5816_v33 = vor.u32 %v8186_v22, %v5813_v24  ;;  %v6035_v41 = vld [vmem:[#allocation7 + $0x400] sm:$0xf]  ;;  %v6107_v22 = vld [vmem:[#allocation7 + $0x490] sm:$0xf] }
  0xec   :  { %2238 = vmatpush.bf16.msrb.mxu1 %v5960_v42  ;;  %v8245_v42 = vld [vmem:[#allocation7 + $0x420] sm:$0xf0] }
  0xed   :  { %2254 = vmatpush.bf16.msra.mxu2 %v6140_v46  ;;  %v6215_v46 = vld [vmem:[#allocation7 + $0x568] sm:$0xf]  ;;  %v6036_v48 = vor.u32 %v8245_v42, %v6035_v41  ;;  %v8160_v41 = vld [vmem:[#allocation7 + $0x17c] sm:$0xf]  ;;  %v5713_v42 = vld [vmem:[#allocation7 + $0x19c] sm:$0xf0] }
  0xee   :  { %2230 = vmatmul.bf16.vlgmr.msrb.gmra.mxu0 %v9037_v37  ;;  %v5716_v50 = vor.u32 %v8160_v41, %v5713_v42  ;;  %v8223_v41 = vld [vmem:[#allocation7 + $0x374] sm:$0xf]  ;;  %v5965_v42 = vld [vmem:[#allocation7 + $0x394] sm:$0xf0] }
  0xef   :  { %2274 = vmatpush.bf16.msra.mxu0 %v5784_v25  ;;  %2267 = vmatpush.bf16.msra.mxu3 %v6428_v47  ;;  %v6252_v25 = vor.u32 %v8299_v35, %v6251_v34  ;;  %v8290_v47 = vld [vmem:[#allocation7 + $0x588] sm:$0xf0]  ;;  %v5891_v34 = vld [vmem:[#allocation7 + $0x2e0] sm:$0xf]  ;;  %v8209_v35 = vld [vmem:[#allocation7 + $0x300] sm:$0xf0] }
  0xf0   :  { %2239 = vmatpush.bf16.msrb.mxu1 %v5924_v54  ;;  %v6216_v54 = vor.u32 %v8290_v47, %v6215_v46  ;;  %v5892_v43 = vor.u32 %v8209_v35, %v5891_v34  ;;  %v8385_v46 = vld [vmem:[#allocation7 + $0x884] sm:$0xf]  ;;  %v6613_v47 = vld [vmem:[#allocation7 + $0x8a4] sm:$0xf0] }
  0xf1   :  { %2255 = vmatpush.bf16.msra.mxu2 %v6104_v63  ;;  %v6467_v63 = vld [vmem:[#allocation7 + $0x760] sm:$0xf]  ;;  %v8277_v34 = vld [vmem:[#allocation7 + $0x524] sm:$0xf]  ;;  %v6181_v35 = vld [vmem:[#allocation7 + $0x544] sm:$0xf0] }
  0xf3   :  { %2275 = vmatpush.bf16.msra.mxu0 %v5748_v60  ;;  %2268 = vmatpush.bf16.msra.mxu3 %v6392_v0  ;;  %v6179_v60 = vld [vmem:[#allocation7 + $0x520] sm:$0xf]  ;;  %v8353_v0 = vld [vmem:[#allocation7 + $0x780] sm:$0xf0] }
  0xf4   :  { %2240 = vmatpush.bf16.msrb.mxu1 %v5888_v6  ;;  %2256 = vmatmul.bf16.vlgmr.msra.gmra.mxu2 %v9040_v56  ;;  %v6180_v4 = vor.u32 %v8281_v61, %v6179_v60  ;;  %v8119_v6 = vld [vmem:[#allocation7 + $0x30] sm:$0xf0]  ;;  %v6468_v8 = vor.u32 %v8353_v0, %v6467_v63  ;;  %v8376_v60 = vld [vmem:[#allocation7 + $0x83c] sm:$0xf]  ;;  %v6577_v61 = vld [vmem:[#allocation7 + $0x85c] sm:$0xf0]  ;;  %v5680_v0 = vor.u32 %v8151_v52, %v5677_v53 }
  0xf5   :  { %2300 = vmatpush.bf16.msrb.mxu2 %v6360_v1  ;;  %v5568_v1 = vor.u32 %v8128_v58, %v5567_v55  ;;  %v5532_v15 = vor.u32 %v8119_v6, %v5531_v5  ;;  %v8304_v58 = vld [vmem:[#allocation7 + $0x5fc] sm:$0xf]  ;;  %v8191_v63 = vld [vmem:[#allocation7 + $0x270] sm:$0xf0]  ;;  %v5641_v5 = vld [vmem:[#allocation7 + $0x10c] sm:$0xf0]  ;;  %v6580_v6 = vor.u32 %v8376_v60, %v6577_v61 }
  0xf6   :  { %2269 = vmatmul.bf16.vlgmr.msra.gmra.mxu3 %v9042_v57  ;;  %v6433_v52 = vld [vmem:[#allocation7 + $0x73c] sm:$0xf0]  ;;  %v5755_v60 = vld [vmem:[#allocation7 + $0x1c8] sm:$0xf]  ;;  %v8174_v61 = vld [vmem:[#allocation7 + $0x1e8] sm:$0xf0] }
  0xf7   :  { %2313 = vmatpush.bf16.msrb.mxu3 %v6648_v2  ;;  %2276 = vmatpush.bf16.msra.mxu0 %v5712_v12  ;;  %v5963_v2 = vld [vmem:[#allocation7 + $0x370] sm:$0xf] }
  0xf8   :  { %2241 = vmatpush.bf16.msrb.mxu1 %v5852_v18  ;;  %v5964_v12 = vor.u32 %v8227_v3, %v5963_v2  ;;  %v5788_v18 = vor.u32 %v8178_v7, %v5785_v9  ;;  %v6073_v2 = vld [vmem:[#allocation7 + $0x46c] sm:$0xf0]  ;;  %v6253_v9 = vld [vmem:[#allocation7 + $0x5d4] sm:$0xf0] }
  0xf9   :  { %2301 = vmatpush.bf16.msrb.mxu2 %v6324_v13  ;;  %v6431_v13 = vld [vmem:[#allocation7 + $0x718] sm:$0xf] }
  0xfb   :  { %2314 = vmatpush.bf16.msrb.mxu3 %v6612_v14  ;;  %2277 = vmatpush.bf16.msra.mxu0 %v5676_v26  ;;  %v8344_v14 = vld [vmem:[#allocation7 + $0x738] sm:$0xf0]  ;;  %v8263_v26 = vld [vmem:[#allocation7 + $0x4b0] sm:$0xf0] }
  0xfc   :  { %2242 = vmatpush.bf16.msrb.mxu1 %v5816_v33  ;;  %v6432_v24 = vor.u32 %v8344_v14, %v6431_v13  ;;  %v6649_v33 = vld [vmem:[#allocation7 + $0x8ec] sm:$0xf0]  ;;  %v6108_v38 = vor.u32 %v8263_v26, %v6107_v22  ;;  %v8241_v14 = vld [vmem:[#allocation7 + $0x404] sm:$0xf] }
  0xfd   :  { %2302 = vmatpush.bf16.msrb.mxu2 %v6288_v29  ;;  %v5928_v29 = vor.u32 %v8218_v17, %v5927_v16  ;;  %v8133_v17 = vld [vmem:[#allocation7 + $0xa4] sm:$0xf]  ;;  %v6505_v26 = vld [vmem:[#allocation7 + $0x7cc] sm:$0xf0] }
  0xff   :  { %2315 = vmatpush.bf16.msrb.mxu3 %v6576_v30  ;;  %2278 = vmatpush.bf16.msra.mxu0 %v5640_v40  ;;  %v8322_v30 = vld [vmem:[#allocation7 + $0x68c] sm:$0xf] }
 0x100   :  { %2287 = vmatpush.bf16.msra.mxu1 %v6072_v36  ;;  %v5752_v36 = vor.u32 %v8169_v20, %v5749_v21  ;;  %v6364_v40 = vor.u32 %v8322_v30, %v6361_v31  ;;  %v8286_v20 = vld [vmem:[#allocation7 + $0x56c] sm:$0xf]  ;;  %v6217_v21 = vld [vmem:[#allocation7 + $0x58c] sm:$0xf0]  ;;  %v8124_v31 = vld [vmem:[#allocation7 + $0x5c] sm:$0xf] }
 0x101   :  { %2243 = vmatmul.bf16.vlgmr.msrb.gmra.mxu1 %v9046_v23  ;;  %2303 = vmatpush.bf16.msrb.mxu2 %v6252_v25  ;;  %v6652_v25 = vor.u32 %v8394_v32, %v6649_v33  ;;  %v6220_v30 = vor.u32 %v8286_v20, %v6217_v21  ;;  %v5569_v32 = vld [vmem:[#allocation7 + $0x7c] sm:$0xf0]  ;;  %v6619_v20 = vld [vmem:[#allocation7 + $0x888] sm:$0xf]  ;;  %v8390_v21 = vld [vmem:[#allocation7 + $0x8a8] sm:$0xf0] }
 0x103   :  { %2316 = vmatpush.bf16.msrb.mxu3 %v6540_v45  ;;  %2279 = vmatpush.bf16.msra.mxu0 %v5604_v51  ;;  %v6325_v45 = vld [vmem:[#allocation7 + $0x664] sm:$0xf0] }
 0x104   :  { %2288 = vmatpush.bf16.msra.mxu1 %v6036_v48  ;;  %v5855_v48 = vld [vmem:[#allocation7 + $0x298] sm:$0xf]  ;;  %v6328_v51 = vor.u32 %v8313_v44, %v6325_v45  ;;  %v5791_v45 = vld [vmem:[#allocation7 + $0x210] sm:$0xf] }
 0x105   :  { %2304 = vmatpush.bf16.msrb.mxu2 %v6216_v54  ;;  %v6616_v54 = vor.u32 %v8385_v46, %v6613_v47  ;;  %v5856_v55 = vor.u32 %v8200_v49, %v5855_v48  ;;  %v5533_v44 = vld [vmem:[#allocation7 + $0x34] sm:$0xf0]  ;;  %v8183_v47 = vld [vmem:[#allocation7 + $0x230] sm:$0xf0]  ;;  %v8268_v48 = vld [vmem:[#allocation7 + $0x4dc] sm:$0xf] }
 0x106   :  { %v6145_v49 = vld [vmem:[#allocation7 + $0x4fc] sm:$0xf0] }
 0x107   :  { %2317 = vmatpush.bf16.msrb.mxu3 %v6504_v59  ;;  %2280 = vmatpush.bf16.msra.mxu0 %v5568_v1  ;;  %v6289_v59 = vld [vmem:[#allocation7 + $0x61c] sm:$0xf0]  ;;  %v8250_v1 = vld [vmem:[#allocation7 + $0x44c] sm:$0xf] }
 0x108   :  { %2289 = vmatpush.bf16.msra.mxu1 %v6000_v62  ;;  %v5819_v62 = vld [vmem:[#allocation7 + $0x250] sm:$0xf]  ;;  %v6292_v3 = vor.u32 %v8304_v58, %v6289_v59  ;;  %v6076_v10 = vor.u32 %v8250_v1, %v6073_v2  ;;  %v5792_v58 = vor.u32 %v8183_v47, %v5791_v45  ;;  %v6148_v59 = vor.u32 %v8268_v48, %v6145_v49  ;;  %v8331_v1 = vld [vmem:[#allocation7 + $0x6d4] sm:$0xf]  ;;  %v6397_v2 = vld [vmem:[#allocation7 + $0x6f4] sm:$0xf0] }
 0x109   :  { %2305 = vmatpush.bf16.msrb.mxu2 %v6180_v4  ;;  %v8142_v4 = vld [vmem:[#allocation7 + $0xec] sm:$0xf]  ;;  %v5820_v7 = vor.u32 %v8191_v63, %v5819_v62  ;;  %v8259_v62 = vld [vmem:[#allocation7 + $0x494] sm:$0xf]  ;;  %v6259_v47 = vld [vmem:[#allocation7 + $0x5b8] sm:$0xf] }
 0x10a   :  { %v5644_v13 = vor.u32 %v8142_v4, %v5641_v5  ;;  %v6367_v4 = vld [vmem:[#allocation7 + $0x690] sm:$0xf]  ;;  %v8327_v5 = vld [vmem:[#allocation7 + $0x6b0] sm:$0xf0]  ;;  %v8300_v48 = vld [vmem:[#allocation7 + $0x5d8] sm:$0xf0] }
 0x10b   :  { %2318 = vmatpush.bf16.msrb.mxu3 %v6468_v8  ;;  %2281 = vmatpush.bf16.msra.mxu0 %v5532_v15  ;;  %v8295_v8 = vld [vmem:[#allocation7 + $0x5b4] sm:$0xf]  ;;  %v6037_v15 = vld [vmem:[#allocation7 + $0x424] sm:$0xf0] }
 0x10c   :  { %2290 = vmatpush.bf16.msra.mxu1 %v5964_v12  ;;  %v6541_v12 = vld [vmem:[#allocation7 + $0x814] sm:$0xf0]  ;;  %v6256_v16 = vor.u32 %v8295_v8, %v6253_v9  ;;  %v6040_v22 = vor.u32 %v8241_v14, %v6037_v15  ;;  %v8205_v8 = vld [vmem:[#allocation7 + $0x2e4] sm:$0xf]  ;;  %v5893_v9 = vld [vmem:[#allocation7 + $0x304] sm:$0xf0] }
 0x10d   :  { %2306 = vmatpush.bf16.msrb.mxu2 %v6144_v19  ;;  %v6544_v19 = vor.u32 %v8367_v11, %v6541_v12  ;;  %v6400_v12 = vor.u32 %v8331_v1, %v6397_v2  ;;  %v5719_v14 = vld [vmem:[#allocation7 + $0x180] sm:$0xf]  ;;  %v8165_v15 = vld [vmem:[#allocation7 + $0x1a0] sm:$0xf0]  ;;  %v6511_v2 = vld [vmem:[#allocation7 + $0x7b0] sm:$0xf] }
 0x10e   :  { %2282 = vmatmul.bf16.vlgmr.msra.gmra.mxu0 %v9037_v37 }
 0x10f   :  { %2326 = vmatpush.bf16.msrb.mxu0 %v5788_v18  ;;  %2319 = vmatpush.bf16.msrb.mxu3 %v6432_v24  ;;  %v5605_v18 = vld [vmem:[#allocation7 + $0xc4] sm:$0xf0]  ;;  %v8358_v24 = vld [vmem:[#allocation7 + $0x7ac] sm:$0xf] }
 0x110   :  { %2291 = vmatpush.bf16.msra.mxu1 %v5928_v29  ;;  %v5608_v27 = vor.u32 %v8133_v17, %v5605_v18  ;;  %v6001_v29 = vld [vmem:[#allocation7 + $0x3dc] sm:$0xf0]  ;;  %v6508_v33 = vor.u32 %v8358_v24, %v6505_v26  ;;  %v5896_v17 = vor.u32 %v8205_v8, %v5893_v9  ;;  %v6331_v18 = vld [vmem:[#allocation7 + $0x648] sm:$0xf]  ;;  %v5720_v26 = vor.u32 %v8165_v15, %v5719_v14  ;;  %v8129_v9 = vld [vmem:[#allocation7 + $0x80] sm:$0xf0] }
 0x111   :  { %2307 = vmatpush.bf16.msrb.mxu2 %v6108_v38  ;;  %v8349_v38 = vld [vmem:[#allocation7 + $0x764] sm:$0xf]  ;;  %v5857_v24 = vld [vmem:[#allocation7 + $0x2bc] sm:$0xf0] }
 0x112   :  { %v5575_v8 = vld [vmem:[#allocation7 + $0x60] sm:$0xf] }
 0x113   :  { %2327 = vmatpush.bf16.msrb.mxu0 %v5752_v36  ;;  %2320 = vmatpush.bf16.msrb.mxu3 %v6396_v39  ;;  %v6004_v36 = vor.u32 %v8232_v28, %v6001_v29  ;;  %v6469_v39 = vld [vmem:[#allocation7 + $0x784] sm:$0xf0]  ;;  %v5683_v28 = vld [vmem:[#allocation7 + $0x138] sm:$0xf]  ;;  %v8156_v29 = vld [vmem:[#allocation7 + $0x158] sm:$0xf0] }
 0x114   :  { %2292 = vmatpush.bf16.msra.mxu1 %v5892_v43  ;;  %2308 = vmatmul.bf16.vlgmr.msrb.gmra.mxu2 %v9040_v56  ;;  %v8115_v43 = vld [vmem:[#allocation7 + $0x14] sm:$0xf]  ;;  %v6472_v46 = vor.u32 %v8349_v38, %v6469_v39  ;;  %v5821_v39 = vld [vmem:[#allocation7 + $0x274] sm:$0xf0] }
 0x115   :  { %2352 = vmatpush.bf16.msra.mxu2 %v6364_v40  ;;  %v5572_v40 = vor.u32 %v8124_v31, %v5569_v32  ;;  %v5536_v53 = vor.u32 %v8115_v43, %v5533_v44  ;;  %v6620_v31 = vor.u32 %v8390_v21, %v6619_v20  ;;  %v8187_v38 = vld [vmem:[#allocation7 + $0x254] sm:$0xf]  ;;  %v5647_v43 = vld [vmem:[#allocation7 + $0xf0] sm:$0xf]  ;;  %v5971_v20 = vld [vmem:[#allocation7 + $0x378] sm:$0xf] }
 0x116   :  { %2321 = vmatmul.bf16.vlgmr.msrb.gmra.mxu3 %v9042_v57  ;;  %v8147_v44 = vld [vmem:[#allocation7 + $0x110] sm:$0xf0]  ;;  %v8228_v21 = vld [vmem:[#allocation7 + $0x398] sm:$0xf0] }
 0x117   :  { %2365 = vmatpush.bf16.msra.mxu3 %v6652_v25  ;;  %2328 = vmatpush.bf16.msrb.mxu0 %v5716_v50  ;;  %v6184_v25 = vor.u32 %v8277_v34, %v6181_v35  ;;  %v5968_v50 = vor.u32 %v8223_v41, %v5965_v42  ;;  %v8309_v34 = vld [vmem:[#allocation7 + $0x620] sm:$0xf0]  ;;  %v6583_v35 = vld [vmem:[#allocation7 + $0x840] sm:$0xf]  ;;  %v6079_v41 = vld [vmem:[#allocation7 + $0x450] sm:$0xf] }
 0x118   :  { %2293 = vmatpush.bf16.msra.mxu1 %v5856_v55  ;;  %v5929_v55 = vld [vmem:[#allocation7 + $0x34c] sm:$0xf0]  ;;  %v8255_v42 = vld [vmem:[#allocation7 + $0x470] sm:$0xf0] }
 0x119   :  { %2353 = vmatpush.bf16.msra.mxu2 %v6328_v51  ;;  %v8340_v51 = vld [vmem:[#allocation7 + $0x71c] sm:$0xf]  ;;  %v6080_v49 = vor.u32 %v8255_v42, %v6079_v41  ;;  %v5935_v42 = vld [vmem:[#allocation7 + $0x330] sm:$0xf] }
 0x11a   :  { %v6436_v63 = vor.u32 %v8340_v51, %v6433_v52  ;;  %v8372_v51 = vld [vmem:[#allocation7 + $0x818] sm:$0xf0]  ;;  %v5648_v52 = vor.u32 %v8147_v44, %v5647_v43  ;;  %v8170_v44 = vld [vmem:[#allocation7 + $0x1cc] sm:$0xf] }
 0x11b   :  { %2366 = vmatpush.bf16.msra.mxu3 %v6616_v54  ;;  %2329 = vmatpush.bf16.msrb.mxu0 %v5680_v0  ;;  %v8214_v54 = vld [vmem:[#allocation7 + $0x32c] sm:$0xf]  ;;  %v6109_v0 = vld [vmem:[#allocation7 + $0x4b4] sm:$0xf0] }
 0x11c   :  { %2294 = vmatpush.bf16.msra.mxu1 %v5820_v7  ;;  %v8399_v7 = vld [vmem:[#allocation7 + $0x8f0] sm:$0xf0]  ;;  %v6112_v11 = vor.u32 %v8259_v62, %v6109_v0  ;;  %v6223_v62 = vld [vmem:[#allocation7 + $0x570] sm:$0xf]  ;;  %v9070_v0 = vld [vmem:[#allocation9] sm:$0xff] }
 0x11d   :  { %2354 = vmatpush.bf16.msra.mxu2 %v6292_v3  ;;  %v5932_v3 = vor.u32 %v8214_v54, %v5929_v55  ;;  %v8246_v54 = vld [vmem:[#allocation7 + $0x428] sm:$0xf0]  ;;  %v6260_v55 = vor.u32 %v8300_v48, %v6259_v47 }
 0x11f   :  { %2367 = vmatpush.bf16.msra.mxu3 %v6580_v6  ;;  %2330 = vmatpush.bf16.msrb.mxu0 %v5644_v13  ;;  %v6655_v6 = vld [vmem:[#allocation7 + $0x8d0] sm:$0xf]  ;;  %v6368_v13 = vor.u32 %v8327_v5, %v6367_v4  ;;  %v6007_v5 = vld [vmem:[#allocation7 + $0x3c0] sm:$0xf] }
 0x120   :  { %2339 = vmatpush.bf16.msrb.mxu1 %v6076_v10  ;;  %v5756_v10 = vor.u32 %v8174_v61, %v5755_v60 }
 0x121   :  { %2295 = vmatmul.bf16.vlgmr.msra.gmra.mxu1 %v9046_v23  ;;  %2355 = vmatpush.bf16.msra.mxu2 %v6256_v16  ;;  %v6656_v16 = vor.u32 %v8399_v7, %v6655_v6  ;;  %v8237_v6 = vld [vmem:[#allocation7 + $0x3e0] sm:$0xf0] }
 0x123   :  { %2368 = vmatpush.bf16.msra.mxu3 %v6544_v19  ;;  %2331 = vmatpush.bf16.msrb.mxu0 %v5608_v27  ;;  %v8318_v19 = vld [vmem:[#allocation7 + $0x668] sm:$0xf0] }
 0x124   :  { %2340 = vmatpush.bf16.msrb.mxu1 %v6040_v22  ;;  %v8196_v22 = vld [vmem:[#allocation7 + $0x29c] sm:$0xf]  ;;  %v6332_v27 = vor.u32 %v8318_v19, %v6331_v18  ;;  %v8354_v18 = vld [vmem:[#allocation7 + $0x788] sm:$0xf0]  ;;  %v5576_v19 = vor.u32 %v8129_v9, %v5575_v8 }
 0x125   :  { %2356 = vmatpush.bf16.msra.mxu2 %v6220_v30  ;;  %v5860_v32 = vor.u32 %v8196_v22, %v5857_v24  ;;  %v5539_v24 = vld [vmem:[#allocation7 + $0x18] sm:$0xf] }
 0x127   :  { %2369 = vmatpush.bf16.msra.mxu3 %v6508_v33  ;;  %2332 = vmatpush.bf16.msrb.mxu0 %v5572_v40  ;;  %v6295_v33 = vld [vmem:[#allocation7 + $0x600] sm:$0xf]  ;;  %v5684_v40 = vor.u32 %v8156_v29, %v5683_v28 }
 0x128   :  { %2341 = vmatpush.bf16.msrb.mxu1 %v6004_v36  ;;  %v8381_v36 = vld [vmem:[#allocation7 + $0x860] sm:$0xf0] }
 0x129   :  { %2357 = vmatpush.bf16.msra.mxu2 %v6184_v25  ;;  %v6296_v25 = vor.u32 %v8309_v34, %v6295_v33  ;;  %v6584_v45 = vor.u32 %v8381_v36, %v6583_v35  ;;  %v8273_v33 = vld [vmem:[#allocation7 + $0x500] sm:$0xf0]  ;;  %v5972_v36 = vor.u32 %v8228_v21, %v5971_v20  ;;  %v8152_v20 = vld [vmem:[#allocation7 + $0x13c] sm:$0xf]  ;;  %v5685_v21 = vld [vmem:[#allocation7 + $0x15c] sm:$0xf0] }
 0x12b   :  { %2370 = vmatpush.bf16.msra.mxu3 %v6472_v46  ;;  %2333 = vmatpush.bf16.msrb.mxu0 %v5536_v53  ;;  %v9066_v30 = vpop.f32.mrf.mxu0  ;;  %v5824_v46 = vor.u32 %v8187_v38, %v5821_v39  ;;  %v6043_v53 = vld [vmem:[#allocation7 + $0x408] sm:$0xf]  ;;  %v6439_v38 = vld [vmem:[#allocation7 + $0x720] sm:$0xf]  ;;  %v8345_v39 = vld [vmem:[#allocation7 + $0x740] sm:$0xf0] }
 0x12c   :  { %2342 = vmatpush.bf16.msrb.mxu1 %v5968_v50  ;;  %v6547_v50 = vld [vmem:[#allocation7 + $0x7f8] sm:$0xf]  ;;  %v6044_v1 = vor.u32 %v8246_v54, %v6043_v53  ;;  %v6440_v48 = vor.u32 %v8345_v39, %v6439_v38  ;;  %v8251_v38 = vld [vmem:[#allocation7 + $0x454] sm:$0xf] }
 0x12d   :  { %2358 = vmatpush.bf16.msra.mxu2 %v6148_v59  ;;  %v8138_v59 = vld [vmem:[#allocation7 + $0xc8] sm:$0xf0]  ;;  %v6548_v61 = vor.u32 %v8372_v51, %v6547_v50  ;;  %v6403_v50 = vld [vmem:[#allocation7 + $0x6d8] sm:$0xf]  ;;  %v8336_v51 = vld [vmem:[#allocation7 + $0x6f8] sm:$0xf0] }
 0x12e   :  { %2334 = vmatmul.bf16.vlgmr.msrb.gmra.mxu0 %v9037_v37  ;;  %v6081_v39 = vld [vmem:[#allocation7 + $0x474] sm:$0xf0] }
 0x12f   :  { %2378 = vmatpush.bf16.msra.mxu0 %v5792_v58  ;;  %2371 = vmatpush.bf16.msra.mxu3 %v6436_v63  ;;  %v5611_v58 = vld [vmem:[#allocation7 + $0xa8] sm:$0xf]  ;;  %v8291_v63 = vld [vmem:[#allocation7 + $0x590] sm:$0xf0] }
 0x130   :  { %2343 = vmatpush.bf16.msrb.mxu1 %v5932_v3  ;;  %v8363_v3 = vld [vmem:[#allocation7 + $0x7d0] sm:$0xf0]  ;;  %v5612_v4 = vor.u32 %v8138_v59, %v5611_v58  ;;  %v6224_v7 = vor.u32 %v8291_v63, %v6223_v62  ;;  %v6369_v58 = vld [vmem:[#allocation7 + $0x6b4] sm:$0xf0]  ;;  %v5899_v62 = vld [vmem:[#allocation7 + $0x2e8] sm:$0xf] }
 0x131   :  { %2359 = vmatpush.bf16.msra.mxu2 %v6112_v11  ;;  %v6512_v11 = vor.u32 %v8363_v3, %v6511_v2  ;;  %v8395_v59 = vld [vmem:[#allocation7 + $0x8d4] sm:$0xf]  ;;  %v8210_v63 = vld [vmem:[#allocation7 + $0x308] sm:$0xf0]  ;;  %v6404_v3 = vor.u32 %v8336_v51, %v6403_v50  ;;  %v8368_v50 = vld [vmem:[#allocation7 + $0x7fc] sm:$0xf] }
 0x132   :  { %v6549_v51 = vld [vmem:[#allocation7 + $0x81c] sm:$0xf0] }
 0x133   :  { %2379 = vmatpush.bf16.msra.mxu0 %v5756_v10  ;;  %2372 = vmatpush.bf16.msra.mxu3 %v6400_v12  ;;  %v2077_v60 = vpop.f32.mrf.mxu0  ;;  %v576_v10 = vperm.slane %v9070_v0, 0  ;;  %v6187_v12 = vld [vmem:[#allocation7 + $0x528] sm:$0xf] }
 0x134   :  { %2344 = vmatpush.bf16.msrb.mxu1 %v5896_v17  ;;  %2360 = vmatmul.bf16.vlgmr.msra.gmra.mxu2 %v9040_v56  ;;  %v6475_v17 = vld [vmem:[#allocation7 + $0x768] sm:$0xf] }
 0x135   :  { %2404 = vmatpush.bf16.msrb.mxu2 %v6368_v13  ;;  %v8282_v13 = vld [vmem:[#allocation7 + $0x548] sm:$0xf0]  ;;  %v2076_v28 = vadd.f32 %v9066_v30, %v576_v10  ;;  %v6476_v29 = vor.u32 %v8354_v18, %v6475_v17  ;;  %v5900_v10 = vor.u32 %v8210_v63, %v5899_v62  ;;  %v577_v18 = vperm.slane %v9070_v0, 1 }
 0x136   :  { %2373 = vmatmul.bf16.vlgmr.msra.gmra.mxu3 %v9042_v57  ;;  %v6188_v22 = vor.u32 %v8282_v13, %v6187_v12  ;;  %v6333_v12 = vld [vmem:[#allocation7 + $0x66c] sm:$0xf0]  ;;  %v8386_v13 = vld [vmem:[#allocation7 + $0x88c] sm:$0xf]  ;;  %v6552_v63 = vor.u32 %v8368_v50, %v6549_v51 }
 0x137   :  { %2417 = vmatpush.bf16.msrb.mxu3 %v6656_v16  ;;  %2380 = vmatpush.bf16.msra.mxu0 %v5720_v26  ;;  %v2101_v14 = vpop.f32.mrf.mxu2  ;;  %v6008_v16 = vor.u32 %v8237_v6, %v6007_v5  ;;  %v8120_v26 = vld [vmem:[#allocation7 + $0x38] sm:$0xf0]  ;;  %v8161_v5 = vld [vmem:[#allocation7 + $0x184] sm:$0xf]  ;;  %v5721_v6 = vld [vmem:[#allocation7 + $0x1a4] sm:$0xf0] }
 0x138   :  { %2345 = vmatpush.bf16.msrb.mxu1 %v5860_v32  ;;  %v6151_v32 = vld [vmem:[#allocation7 + $0x4e0] sm:$0xf]  ;;  %v5540_v41 = vor.u32 %v8120_v26, %v5539_v24  ;;  %v5724_v17 = vor.u32 %v8161_v5, %v5721_v6  ;;  %v8359_v5 = vld [vmem:[#allocation7 + $0x7b4] sm:$0xf]  ;;  %v6513_v6 = vld [vmem:[#allocation7 + $0x7d4] sm:$0xf0] }
 0x139   :  { %2405 = vmatpush.bf16.msrb.mxu2 %v6332_v27  ;;  %v2114_v15 = vpop.f32.mrf.mxu3  ;;  %v8179_v27 = vld [vmem:[#allocation7 + $0x214] sm:$0xf]  ;;  %v6152_v30 = vor.u32 %v8273_v33, %v6151_v32  ;;  %v6585_v32 = vld [vmem:[#allocation7 + $0x864] sm:$0xf0]  ;;  %v5827_v33 = vld [vmem:[#allocation7 + $0x258] sm:$0xf] }
 0x13b   :  { %2418 = vmatpush.bf16.msrb.mxu3 %v6620_v31  ;;  %2381 = vmatpush.bf16.msra.mxu0 %v5684_v40  ;;  %v5793_v31 = vld [vmem:[#allocation7 + $0x234] sm:$0xf0]  ;;  %v2088_v34 = vpop.f32.mrf.mxu1  ;;  %v9075_v35 = vpop.f32.mrf.mxu0 }
 0x13c   :  { %2346 = vmatpush.bf16.msrb.mxu1 %v5824_v46  ;;  %v2089_v40 = vadd.f32 %v2088_v34, %v2076_v28  ;;  %v5796_v43 = vor.u32 %v8179_v27, %v5793_v31  ;;  %v6115_v46 = vld [vmem:[#allocation7 + $0x498] sm:$0xf]  ;;  %v8305_v28 = vld [vmem:[#allocation7 + $0x604] sm:$0xf]  ;;  %v8192_v34 = vld [vmem:[#allocation7 + $0x278] sm:$0xf0] }
 0x13d   :  { %2406 = vmatpush.bf16.msrb.mxu2 %v6296_v25  ;;  %v8219_v25 = vld [vmem:[#allocation7 + $0x350] sm:$0xf0]  ;;  %v8377_v31 = vld [vmem:[#allocation7 + $0x844] sm:$0xf] }
 0x13e   :  { %v2102_v47 = vadd.f32 %v2101_v14, %v2089_v40  ;;  %v5936_v54 = vor.u32 %v8219_v25, %v5935_v42  ;;  %v6621_v14 = vld [vmem:[#allocation7 + $0x8ac] sm:$0xf0]  ;;  %v2128_v40 = vadd.f32 %v9075_v35, %v577_v18  ;;  %v8143_v42 = vld [vmem:[#allocation7 + $0xf4] sm:$0xf]  ;;  %v5649_v25 = vld [vmem:[#allocation7 + $0x114] sm:$0xf0] }
 0x13f   :  { %2419 = vmatpush.bf16.msrb.mxu3 %v6584_v45  ;;  %2382 = vmatpush.bf16.msra.mxu0 %v5648_v52  ;;  %v5757_v45 = vld [vmem:[#allocation7 + $0x1ec] sm:$0xf0]  ;;  %v2103_v52 = vpop.f32.mrf.mxu2  ;;  %v6624_v26 = vor.u32 %v8386_v13, %v6621_v14  ;;  %v8242_v35 = vld [vmem:[#allocation7 + $0x40c] sm:$0xf] }
 0x140   :  { %2391 = vmatpush.bf16.msra.mxu1 %v6080_v49  ;;  %v8264_v49 = vld [vmem:[#allocation7 + $0x4b8] sm:$0xf0]  ;;  %v9077_v60 = vadd.f32 %v2114_v15, %v2102_v47  ;;  %v5863_v15 = vld [vmem:[#allocation7 + $0x2a0] sm:$0xf]  ;;  %v5652_v52 = vor.u32 %v8143_v42, %v5649_v25  ;;  %v6441_v42 = vld [vmem:[#allocation7 + $0x744] sm:$0xf0] }
 0x141   :  { %2347 = vmatmul.bf16.vlgmr.msrb.gmra.mxu1 %v9046_v23  ;;  %2407 = vmatpush.bf16.msrb.mxu2 %v6260_v55  ;;  %v2116_v53 = vpop.f32.mrf.mxu3  ;;  %v8323_v55 = vld [vmem:[#allocation7 + $0x694] sm:$0xf]  ;;  %v6116_v2 = vor.u32 %v8264_v49, %v6115_v46  ;;  %v8296_v46 = vld [vmem:[#allocation7 + $0x5bc] sm:$0xf]  ;;  %v6261_v47 = vld [vmem:[#allocation7 + $0x5dc] sm:$0xf0]  ;;  %v6084_v49 = vor.u32 %v8251_v38, %v6081_v39 }
 0x142   :  { %v6045_v53 = vld [vmem:[#allocation7 + $0x42c] sm:$0xf0]  ;;  %v6153_v38 = vld [vmem:[#allocation7 + $0x504] sm:$0xf0] }
 0x143   :  { %2420 = vmatpush.bf16.msrb.mxu3 %v6548_v61  ;;  %2383 = vmatpush.bf16.msra.mxu0 %v5612_v4  ;;  %v6657_v61 = vld [vmem:[#allocation7 + $0x8f4] sm:$0xf0]  ;;  %v6372_v4 = vor.u32 %v8323_v55, %v6369_v58  ;;  %v2129_v8 = vpop.f32.mrf.mxu0  ;;  %v6264_v55 = vor.u32 %v8296_v46, %v6261_v47  ;;  %v8134_v58 = vld [vmem:[#allocation7 + $0xac] sm:$0xf]  ;;  %v5763_v47 = vld [vmem:[#allocation7 + $0x1d0] sm:$0xf] }
 0x144   :  { %2392 = vmatpush.bf16.msra.mxu1 %v6044_v1  ;;  %v5760_v1 = vor.u32 %v8170_v44, %v5757_v45  ;;  %v6660_v9 = vor.u32 %v8395_v59, %v6657_v61  ;;  %v6588_v44 = vor.u32 %v8377_v31, %v6585_v32  ;;  %v5828_v45 = vor.u32 %v8192_v34, %v5827_v33  ;;  %v5613_v59 = vld [vmem:[#allocation7 + $0xcc] sm:$0xf0]  ;;  %v8233_v8 = vld [vmem:[#allocation7 + $0x3c4] sm:$0xf]  ;;  %v5799_v31 = vld [vmem:[#allocation7 + $0x218] sm:$0xf] }
 0x145   :  { %2408 = vmatpush.bf16.msrb.mxu2 %v6224_v7  ;;  %v2090_v7 = vpop.f32.mrf.mxu1  ;;  %v8184_v34 = vld [vmem:[#allocation7 + $0x238] sm:$0xf0] }
 0x146   :  { %v5616_v7 = vor.u32 %v8134_v58, %v5613_v59  ;;  %v6375_v58 = vld [vmem:[#allocation7 + $0x698] sm:$0xf]  ;;  %v8328_v59 = vld [vmem:[#allocation7 + $0x6b8] sm:$0xf0] }
 0x147   :  { %2421 = vmatpush.bf16.msrb.mxu3 %v6512_v11  ;;  %2384 = vmatpush.bf16.msra.mxu0 %v5576_v19  ;;  %v8314_v11 = vld [vmem:[#allocation7 + $0x64c] sm:$0xf] }
 0x148   :  { %2393 = vmatpush.bf16.msra.mxu1 %v6008_v16  ;;  %v8201_v16 = vld [vmem:[#allocation7 + $0x2c0] sm:$0xf0]  ;;  %v6336_v19 = vor.u32 %v8314_v11, %v6333_v12  ;;  %v5577_v12 = vld [vmem:[#allocation7 + $0x84] sm:$0xf0] }
 0x149   :  { %2409 = vmatpush.bf16.msrb.mxu2 %v6188_v22  ;;  %v2153_v22 = vpop.f32.mrf.mxu2  ;;  %v2166_v24 = vpop.f32.mrf.mxu3  ;;  %v5864_v27 = vor.u32 %v8201_v16, %v5863_v15  ;;  %v8125_v11 = vld [vmem:[#allocation7 + $0x64] sm:$0xf]  ;;  %v6516_v15 = vor.u32 %v8359_v5, %v6513_v6  ;;  %v8278_v16 = vld [vmem:[#allocation7 + $0x52c] sm:$0xf] }
 0x14b   :  { %2422 = vmatpush.bf16.msrb.mxu3 %v6476_v29  ;;  %2385 = vmatpush.bf16.msra.mxu0 %v5540_v41  ;;  %v6297_v29 = vld [vmem:[#allocation7 + $0x624] sm:$0xf0] }
 0x14c   :  { %2394 = vmatpush.bf16.msra.mxu1 %v5972_v36  ;;  %v5688_v36 = vor.u32 %v8152_v20, %v5685_v21  ;;  %v6300_v41 = vor.u32 %v8305_v28, %v6297_v29  ;;  %v6477_v20 = vld [vmem:[#allocation7 + $0x78c] sm:$0xf0]  ;;  %v578_v21 = vperm.slane %v9070_v0, 2  ;;  %v8116_v28 = vld [vmem:[#allocation7 + $0x1c] sm:$0xf] }
 0x14d   :  { %2410 = vmatpush.bf16.msrb.mxu2 %v6152_v30  ;;  %v9084_v30 = vpop.f32.mrf.mxu0  ;;  %v5541_v29 = vld [vmem:[#allocation7 + $0x3c] sm:$0xf0] }
 0x14e   :  { %2386 = vmatmul.bf16.vlgmr.msra.gmra.mxu0 %v9037_v37  ;;  %v5544_v25 = vor.u32 %v8116_v28, %v5541_v29  ;;  %v2180_v50 = vadd.f32 %v9084_v30, %v578_v21 }
 0x14f   :  { %2430 = vmatpush.bf16.msrb.mxu0 %v5796_v43  ;;  %2423 = vmatpush.bf16.msrb.mxu3 %v6440_v48  ;;  %v2140_v43 = vpop.f32.mrf.mxu1 }
 0x150   :  { %2395 = vmatpush.bf16.msra.mxu1 %v5936_v54  ;;  %v2141_v48 = vadd.f32 %v2140_v43, %v2128_v40  ;;  %v8215_v43 = vld [vmem:[#allocation7 + $0x334] sm:$0xf] }
 0x151   :  { %2411 = vmatpush.bf16.msrb.mxu2 %v6116_v2  ;;  %v2155_v61 = vpop.f32.mrf.mxu2  ;;  %v2168_v62 = vpop.f32.mrf.mxu3  ;;  %v6225_v2 = vld [vmem:[#allocation7 + $0x594] sm:$0xf0] }
 0x152   :  { %v2154_v54 = vadd.f32 %v2153_v22, %v2141_v48  ;;  %v5580_v22 = vor.u32 %v8125_v11, %v5577_v12  ;;  %v8175_v48 = vld [vmem:[#allocation7 + $0x1f0] sm:$0xf0]  ;;  %v6663_v61 = vld [vmem:[#allocation7 + $0x8d8] sm:$0xf] }
 0x153   :  { %2431 = vmatpush.bf16.msrb.mxu0 %v5760_v1  ;;  %2424 = vmatpush.bf16.msrb.mxu3 %v6404_v3  ;;  %v8287_v1 = vld [vmem:[#allocation7 + $0x574] sm:$0xf] }
 0x154   :  { %2396 = vmatpush.bf16.msra.mxu1 %v5900_v10  ;;  %2412 = vmatmul.bf16.vlgmr.msrb.gmra.mxu2 %v9040_v56  ;;  %v9086_v3 = vadd.f32 %v2166_v24, %v2154_v54  ;;  %v6228_v10 = vor.u32 %v8287_v1, %v6225_v2  ;;  %v8224_v24 = vld [vmem:[#allocation7 + $0x37c] sm:$0xf]  ;;  %v8206_v1 = vld [vmem:[#allocation7 + $0x2ec] sm:$0xf]  ;;  %v5901_v2 = vld [vmem:[#allocation7 + $0x30c] sm:$0xf0] }
 0x155   :  { %2456 = vmatpush.bf16.msra.mxu2 %v6372_v4  ;;  %v6048_v4 = vor.u32 %v8242_v35, %v6045_v53  ;;  %v2181_v14 = vpop.f32.mrf.mxu0  ;;  %v8332_v35 = vld [vmem:[#allocation7 + $0x6dc] sm:$0xf]  ;;  %v6405_v53 = vld [vmem:[#allocation7 + $0x6fc] sm:$0xf0] }
 0x156   :  { %2425 = vmatmul.bf16.vlgmr.msrb.gmra.mxu3 %v9042_v57  ;;  %v6339_v14 = vld [vmem:[#allocation7 + $0x650] sm:$0xf] }
 0x157   :  { %2469 = vmatpush.bf16.msra.mxu3 %v6660_v9  ;;  %2432 = vmatpush.bf16.msrb.mxu0 %v5724_v17  ;;  %v6009_v9 = vld [vmem:[#allocation7 + $0x3e4] sm:$0xf0]  ;;  %v2142_v13 = vpop.f32.mrf.mxu1  ;;  %v6189_v17 = vld [vmem:[#allocation7 + $0x54c] sm:$0xf0] }
 0x158   :  { %2397 = vmatpush.bf16.msra.mxu1 %v5864_v27  ;;  %v6012_v18 = vor.u32 %v8233_v8, %v6009_v9  ;;  %v6192_v27 = vor.u32 %v8278_v16, %v6189_v17  ;;  %v6376_v8 = vor.u32 %v8328_v59, %v6375_v58  ;;  %v5727_v9 = vld [vmem:[#allocation7 + $0x188] sm:$0xf]  ;;  %v5904_v13 = vor.u32 %v8206_v1, %v5901_v2  ;;  %v6627_v16 = vld [vmem:[#allocation7 + $0x890] sm:$0xf]  ;;  %v8139_v58 = vld [vmem:[#allocation7 + $0xd0] sm:$0xf0] }
 0x159   :  { %2457 = vmatpush.bf16.msra.mxu2 %v6336_v19  ;;  %v8350_v19 = vld [vmem:[#allocation7 + $0x76c] sm:$0xf]  ;;  %v2205_v32 = vpop.f32.mrf.mxu2  ;;  %v2218_v39 = vpop.f32.mrf.mxu3  ;;  %v6519_v1 = vld [vmem:[#allocation7 + $0x7b8] sm:$0xf]  ;;  %v8364_v2 = vld [vmem:[#allocation7 + $0x7d8] sm:$0xf0] }
 0x15a   :  { %v6480_v33 = vor.u32 %v8350_v19, %v6477_v20  ;;  %v8197_v19 = vld [vmem:[#allocation7 + $0x2a4] sm:$0xf]  ;;  %v5865_v20 = vld [vmem:[#allocation7 + $0x2c4] sm:$0xf0] }
 0x15b   :  { %2470 = vmatpush.bf16.msra.mxu3 %v6624_v26  ;;  %2433 = vmatpush.bf16.msrb.mxu0 %v5688_v36  ;;  %v5973_v26 = vld [vmem:[#allocation7 + $0x39c] sm:$0xf0]  ;;  %v8269_v36 = vld [vmem:[#allocation7 + $0x4e4] sm:$0xf]  ;;  %v5868_v29 = vor.u32 %v8197_v19, %v5865_v20 }
 0x15c   :  { %2398 = vmatpush.bf16.msra.mxu1 %v5828_v45  ;;  %v5976_v40 = vor.u32 %v8224_v24, %v5973_v26  ;;  %v5800_v45 = vor.u32 %v8184_v34, %v5799_v31  ;;  %v6156_v46 = vor.u32 %v8269_v36, %v6153_v38  ;;  %v5691_v24 = vld [vmem:[#allocation7 + $0x140] sm:$0xf]  ;;  %v8157_v26 = vld [vmem:[#allocation7 + $0x160] sm:$0xf0]  ;;  %v6303_v31 = vld [vmem:[#allocation7 + $0x608] sm:$0xf] }
 0x15d   :  { %2458 = vmatpush.bf16.msra.mxu2 %v6300_v41  ;;  %v8341_v41 = vld [vmem:[#allocation7 + $0x724] sm:$0xf]  ;;  %v8382_v34 = vld [vmem:[#allocation7 + $0x868] sm:$0xf0]  ;;  %v8188_v36 = vld [vmem:[#allocation7 + $0x25c] sm:$0xf] }
 0x15e   :  { %v6444_v51 = vor.u32 %v8341_v41, %v6441_v42  ;;  %v5829_v38 = vld [vmem:[#allocation7 + $0x27c] sm:$0xf0]  ;;  %v8256_v41 = vld [vmem:[#allocation7 + $0x478] sm:$0xf0]  ;;  %v8229_v19 = vld [vmem:[#allocation7 + $0x3a0] sm:$0xf0] }
 0x15f   :  { %2471 = vmatpush.bf16.msra.mxu3 %v6588_v44  ;;  %2434 = vmatpush.bf16.msrb.mxu0 %v5652_v52  ;;  %v5937_v44 = vld [vmem:[#allocation7 + $0x354] sm:$0xf0]  ;;  %v6117_v52 = vld [vmem:[#allocation7 + $0x4bc] sm:$0xf0]  ;;  %v2192_v54 = vpop.f32.mrf.mxu1 }
 0x160   :  { %2443 = vmatpush.bf16.msrb.mxu1 %v6084_v49  ;;  %v8260_v49 = vld [vmem:[#allocation7 + $0x49c] sm:$0xf]  ;;  %v2193_v62 = vadd.f32 %v2192_v54, %v2180_v50  ;;  %v6555_v50 = vld [vmem:[#allocation7 + $0x800] sm:$0xf] }
 0x161   :  { %2399 = vmatmul.bf16.vlgmr.msra.gmra.mxu1 %v9046_v23  ;;  %2459 = vmatpush.bf16.msra.mxu2 %v6264_v55  ;;  %v5940_v55 = vor.u32 %v8215_v43, %v5937_v44  ;;  %v6120_v30 = vor.u32 %v8260_v49, %v6117_v52  ;;  %v2207_v6 = vpop.f32.mrf.mxu2  ;;  %v2220_v11 = vpop.f32.mrf.mxu3  ;;  %v8148_v43 = vld [vmem:[#allocation7 + $0x118] sm:$0xf0] }
 0x162   :  { %v2206_v5 = vadd.f32 %v2205_v32, %v2193_v62  ;;  %v8310_v32 = vld [vmem:[#allocation7 + $0x628] sm:$0xf0]  ;;  %v8292_v62 = vld [vmem:[#allocation7 + $0x598] sm:$0xf0]  ;;  %v6195_v11 = vld [vmem:[#allocation7 + $0x530] sm:$0xf] }
 0x163   :  { %2472 = vmatpush.bf16.msra.mxu3 %v6552_v63  ;;  %2435 = vmatpush.bf16.msrb.mxu0 %v5616_v7  ;;  %v8400_v63 = vld [vmem:[#allocation7 + $0x8f8] sm:$0xf0]  ;;  %v6408_v7 = vor.u32 %v8332_v35, %v6405_v53  ;;  %v6304_v42 = vor.u32 %v8310_v32, %v6303_v31  ;;  %v6051_v35 = vld [vmem:[#allocation7 + $0x410] sm:$0xf]  ;;  %v8247_v53 = vld [vmem:[#allocation7 + $0x430] sm:$0xf0] }
 0x164   :  { %2444 = vmatpush.bf16.msrb.mxu1 %v6048_v4  ;;  %v5764_v4 = vor.u32 %v8175_v48, %v5763_v47  ;;  %v6664_v12 = vor.u32 %v8400_v63, %v6663_v61  ;;  %v9092_v17 = vadd.f32 %v2218_v39, %v2206_v5  ;;  %v5692_v39 = vor.u32 %v8157_v26, %v5691_v24  ;;  %v6267_v47 = vld [vmem:[#allocation7 + $0x5c0] sm:$0xf]  ;;  %v8301_v48 = vld [vmem:[#allocation7 + $0x5e0] sm:$0xf0]  ;;  %v6231_v61 = vld [vmem:[#allocation7 + $0x578] sm:$0xf] }
 0x165   :  { %2460 = vmatpush.bf16.msra.mxu2 %v6228_v10  ;;  %v8166_v10 = vld [vmem:[#allocation7 + $0x1a8] sm:$0xf0]  ;;  %v6268_v54 = vor.u32 %v8301_v48, %v6267_v47  ;;  %v6052_v63 = vor.u32 %v8247_v53, %v6051_v35  ;;  %v6232_v6 = vor.u32 %v8292_v62, %v6231_v61  ;;  %v6807_v24 = vld [vmem:[#allocation10 + $0x118] sm:$0xf]  ;;  %v6159_v31 = vld [vmem:[#allocation7 + $0x4e8] sm:$0xf] }
 0x166   :  { %v5728_v21 = vor.u32 %v8166_v10, %v5727_v9  ;;  %v8238_v5 = vld [vmem:[#allocation7 + $0x3e8] sm:$0xf0]  ;;  %v6520_v10 = vor.u32 %v8364_v2, %v6519_v1  ;;  %v8265_v48 = vld [vmem:[#allocation7 + $0x4c0] sm:$0xf0]  ;;  %v8518_v35 = vld [vmem:[#allocation10 + $0x3a8] sm:$0xf0] }
 0x167   :  { %2473 = vmatpush.bf16.msra.mxu3 %v6516_v15  ;;  %2436 = vmatpush.bf16.msrb.mxu0 %v5580_v22  ;;  %v8319_v15 = vld [vmem:[#allocation7 + $0x670] sm:$0xf0]  ;;  %v8274_v32 = vld [vmem:[#allocation7 + $0x508] sm:$0xf0]  ;;  %v7287_v53 = vld [vmem:[#allocation10 + $0x4d8] sm:$0xf] }
 0x168   :  { %2445 = vmatpush.bf16.msrb.mxu1 %v6012_v18  ;;  %v8391_v18 = vld [vmem:[#allocation7 + $0x8b0] sm:$0xf0]  ;;  %v6340_v22 = vor.u32 %v8319_v15, %v6339_v14  ;;  %v6483_v14 = vld [vmem:[#allocation7 + $0x770] sm:$0xf] }
 0x169   :  { %2461 = vmatpush.bf16.msra.mxu2 %v6192_v27  ;;  %v2194_v27 = vpop.f32.mrf.mxu1  ;;  %v6628_v28 = vor.u32 %v8391_v18, %v6627_v16  ;;  %v8355_v15 = vld [vmem:[#allocation7 + $0x790] sm:$0xf0]  ;;  %v5979_v18 = vld [vmem:[#allocation7 + $0x380] sm:$0xf] }
 0x16b   :  { %2474 = vmatpush.bf16.msra.mxu3 %v6480_v33  ;;  %2437 = vmatpush.bf16.msrb.mxu0 %v5544_v25  ;;  %v6591_v33 = vld [vmem:[#allocation7 + $0x848] sm:$0xf]  ;;  %v5655_v25 = vld [vmem:[#allocation7 + $0xf8] sm:$0xf]  ;;  %v9096_v44 = vpop.f32.mrf.mxu0 }
 0x16c   :  { %2446 = vmatpush.bf16.msrb.mxu1 %v5976_v40  ;;  %v6087_v40 = vld [vmem:[#allocation7 + $0x458] sm:$0xf]  ;;  %v5656_v52 = vor.u32 %v8148_v43, %v5655_v25  ;;  %v8433_v43 = vld [vmem:[#allocation10 + $0x100] sm:$0xf0] }
 0x16d   :  { %2462 = vmatpush.bf16.msra.mxu2 %v6156_v46  ;;  %v5832_v46 = vor.u32 %v8188_v36, %v5829_v38  ;;  %v6088_v49 = vor.u32 %v8256_v41, %v6087_v40  ;;  %v8346_v36 = vld [vmem:[#allocation7 + $0x748] sm:$0xf0]  ;;  %v8220_v40 = vld [vmem:[#allocation7 + $0x358] sm:$0xf0] }
 0x16e   :  { %2438 = vmatmul.bf16.vlgmr.msrb.gmra.mxu0 %v9037_v37  ;;  %v6787_v25 = vld [vmem:[#allocation10 + $0xf0] sm:$0xf] }
 0x16f   :  { %2482 = vmatpush.bf16.msra.mxu0 %v5800_v45  ;;  %2475 = vmatpush.bf16.msra.mxu3 %v6444_v51  ;;  %v6592_v45 = vor.u32 %v8382_v34, %v6591_v33  ;;  %v8373_v51 = vld [vmem:[#allocation7 + $0x820] sm:$0xf0]  ;;  %v5980_v33 = vor.u32 %v8229_v19, %v5979_v18  ;;  %v6447_v34 = vld [vmem:[#allocation7 + $0x728] sm:$0xf]  ;;  %v8423_v18 = vld [vmem:[#allocation10 + $0xb0] sm:$0xf0] }
 0x170   :  { %2447 = vmatpush.bf16.msrb.mxu1 %v5940_v55  ;;  %v5619_v55 = vld [vmem:[#allocation7 + $0xb0] sm:$0xf]  ;;  %v6556_v59 = vor.u32 %v8373_v51, %v6555_v50  ;;  %v6448_v47 = vor.u32 %v8346_v36, %v6447_v34  ;;  %v8337_v50 = vld [vmem:[#allocation7 + $0x700] sm:$0xf0] }
 0x171   :  { %2463 = vmatpush.bf16.msra.mxu2 %v6120_v30  ;;  %v6015_v30 = vld [vmem:[#allocation7 + $0x3c8] sm:$0xf]  ;;  %v6727_v36 = vld [vmem:[#allocation10 + $0x78] sm:$0xf] }
 0x173   :  { %2483 = vmatpush.bf16.msra.mxu0 %v5764_v4  ;;  %2476 = vmatpush.bf16.msra.mxu3 %v6408_v7  ;;  %v5620_v4 = vor.u32 %v8139_v58, %v5619_v55  ;;  %v5583_v7 = vld [vmem:[#allocation7 + $0x68] sm:$0xf]  ;;  %v2233_v9 = vpop.f32.mrf.mxu0  ;;  %v5907_v55 = vld [vmem:[#allocation7 + $0x2f0] sm:$0xf]  ;;  %v8211_v58 = vld [vmem:[#allocation7 + $0x310] sm:$0xf0] }
 0x174   :  { %2448 = vmatpush.bf16.msrb.mxu1 %v5904_v13  ;;  %2464 = vmatmul.bf16.vlgmr.msra.gmra.mxu2 %v9040_v56  ;;  %v6016_v13 = vor.u32 %v8238_v5, %v6015_v30  ;;  %v8428_v30 = vld [vmem:[#allocation10 + $0xd8] sm:$0xf0]  ;;  %v7267_v9 = vld [vmem:[#allocation10 + $0x4b0] sm:$0xf] }
 0x175   :  { %2508 = vmatpush.bf16.msrb.mxu2 %v6376_v8  ;;  %v8130_v8 = vld [vmem:[#allocation7 + $0x88] sm:$0xf0] }
 0x176   :  { %2477 = vmatmul.bf16.vlgmr.msra.gmra.mxu3 %v9042_v57  ;;  %v5584_v16 = vor.u32 %v8130_v8, %v5583_v7  ;;  %v7107_v7 = vld [vmem:[#allocation10 + $0x370] sm:$0xf]  ;;  %v8513_v8 = vld [vmem:[#allocation10 + $0x380] sm:$0xf0] }
 0x177   :  { %2521 = vmatpush.bf16.msrb.mxu3 %v6664_v12  ;;  %2484 = vmatpush.bf16.msra.mxu0 %v5728_v21  ;;  %v8283_v12 = vld [vmem:[#allocation7 + $0x550] sm:$0xf0]  ;;  %v5547_v21 = vld [vmem:[#allocation7 + $0x20] sm:$0xf]  ;;  %v9099_v26 = vpop.f32.mrf.mxu2 }
 0x178   :  { %2449 = vmatpush.bf16.msrb.mxu1 %v5868_v29  ;;  %v6196_v20 = vor.u32 %v8283_v12, %v6195_v11  ;;  %v8438_v29 = vld [vmem:[#allocation10 + $0x128] sm:$0xf0]  ;;  %v5871_v11 = vld [vmem:[#allocation7 + $0x2a8] sm:$0xf]  ;;  %v8202_v12 = vld [vmem:[#allocation7 + $0x2c8] sm:$0xf0] }
 0x179   :  { %2509 = vmatpush.bf16.msrb.mxu2 %v6340_v22  ;;  %v8121_v22 = vld [vmem:[#allocation7 + $0x40] sm:$0xf0]  ;;  %v9101_v27 = vpop.f32.mrf.mxu3  ;;  %v6808_v41 = vor.u32 %v8438_v29, %v6807_v24  ;;  %v5872_v19 = vor.u32 %v8202_v12, %v5871_v11  ;;  %v6907_v12 = vld [vmem:[#allocation10 + $0x1e0] sm:$0xf] }
 0x17a   :  { %v5548_v38 = vor.u32 %v8121_v22, %v5547_v21  ;;  %v8508_v21 = vld [vmem:[#allocation10 + $0x358] sm:$0xf0]  ;;  %v7247_v22 = vld [vmem:[#allocation10 + $0x488] sm:$0xf] }
 0x17b   :  { %2522 = vmatpush.bf16.msrb.mxu3 %v6628_v28  ;;  %2485 = vmatpush.bf16.msra.mxu0 %v5692_v39  ;;  %v6484_v28 = vor.u32 %v8355_v15, %v6483_v14  ;;  %v5943_v39 = vld [vmem:[#allocation7 + $0x338] sm:$0xf]  ;;  %v7108_v15 = vor.u32 %v8513_v8, %v7107_v7  ;;  %v8548_v24 = vld [vmem:[#allocation10 + $0x498] sm:$0xf0]  ;;  %v8493_v7 = vld [vmem:[#allocation10 + $0x2e0] sm:$0xf0] }
 0x17c   :  { %2450 = vmatpush.bf16.msrb.mxu1 %v5832_v46  ;;  %v5944_v51 = vor.u32 %v8220_v40, %v5943_v39  ;;  %v8193_v29 = vld [vmem:[#allocation7 + $0x280] sm:$0xf0]  ;;  %v7248_v39 = vor.u32 %v8548_v24, %v7247_v22 }
 0x17d   :  { %2510 = vmatpush.bf16.msrb.mxu2 %v6304_v42  ;;  %v6160_v42 = vor.u32 %v8274_v32, %v6159_v31  ;;  %v6967_v32 = vld [vmem:[#allocation10 + $0x258] sm:$0xf] }
 0x17e   :  { %v9103_v46 = vpop.f32.mrf.mxu1 }
 0x17f   :  { %2523 = vmatpush.bf16.msrb.mxu3 %v6592_v45  ;;  %2486 = vmatpush.bf16.msra.mxu0 %v5656_v52  ;;  %v6123_v45 = vld [vmem:[#allocation7 + $0x4a0] sm:$0xf]  ;;  %v2259_v62 = vpop.f32.mrf.mxu2 }
 0x180   :  { %2495 = vmatpush.bf16.msra.mxu1 %v6088_v49  ;;  %v6411_v49 = vld [vmem:[#allocation7 + $0x6e0] sm:$0xf]  ;;  %v6124_v61 = vor.u32 %v8265_v48, %v6123_v45  ;;  %v6947_v48 = vld [vmem:[#allocation10 + $0x230] sm:$0xf]  ;;  %v6927_v62 = vld [vmem:[#allocation10 + $0x208] sm:$0xf] }
 0x181   :  { %2451 = vmatmul.bf16.vlgmr.msrb.gmra.mxu1 %v9046_v23  ;;  %2511 = vmatpush.bf16.msrb.mxu2 %v6268_v54  ;;  %v7127_v52 = vld [vmem:[#allocation10 + $0x398] sm:$0xf]  ;;  %v8558_v54 = vld [vmem:[#allocation10 + $0x4e8] sm:$0xf0]  ;;  %v6412_v1 = vor.u32 %v8337_v50, %v6411_v49  ;;  %v8543_v45 = vld [vmem:[#allocation10 + $0x470] sm:$0xf0] }
 0x182   :  { %v7128_v2 = vor.u32 %v8518_v35, %v7127_v52  ;;  %v7288_v5 = vor.u32 %v8558_v54, %v7287_v53  ;;  %v8473_v49 = vld [vmem:[#allocation10 + $0x240] sm:$0xf0]  ;;  %v7047_v53 = vld [vmem:[#allocation10 + $0x2f8] sm:$0xf]  ;;  %v8498_v54 = vld [vmem:[#allocation10 + $0x308] sm:$0xf0] }
 0x183   :  { %2524 = vmatpush.bf16.msrb.mxu3 %v6556_v59  ;;  %2487 = vmatpush.bf16.msra.mxu0 %v5620_v4  ;;  %v6788_v59 = vor.u32 %v8433_v43, %v6787_v25  ;;  %v6767_v4 = vld [vmem:[#allocation10 + $0xc8] sm:$0xf]  ;;  %v7227_v43 = vld [vmem:[#allocation10 + $0x460] sm:$0xf]  ;;  %v8413_v52 = vld [vmem:[#allocation10 + $0x60] sm:$0xf0] }
 0x184   :  { %2496 = vmatpush.bf16.msra.mxu1 %v6052_v63  ;;  %v2272_v63 = vpop.f32.mrf.mxu3  ;;  %v7228_v35 = vor.u32 %v8543_v45, %v7227_v43  ;;  %v8483_v43 = vld [vmem:[#allocation10 + $0x290] sm:$0xf0]  ;;  %v7147_v45 = vld [vmem:[#allocation10 + $0x3c0] sm:$0xf] }
 0x185   :  { %2512 = vmatpush.bf16.msrb.mxu2 %v6232_v6  ;;  %v5908_v6 = vor.u32 %v8211_v58, %v5907_v55  ;;  %v6948_v55 = vor.u32 %v8473_v49, %v6947_v48  ;;  %v7207_v58 = vld [vmem:[#allocation10 + $0x438] sm:$0xf]  ;;  %v8468_v63 = vld [vmem:[#allocation10 + $0x218] sm:$0xf0]  ;;  %v8678_v49 = vld [vmem:[#allocation10 + $0x8a8] sm:$0xf0] }
 0x186   :  { %v2246_v14 = vpop.f32.mrf.mxu1  ;;  %v7767_v48 = vld [vmem:[#allocation10 + $0x898] sm:$0xf] }
 0x187   :  { %2525 = vmatpush.bf16.msrb.mxu3 %v6520_v10  ;;  %2488 = vmatpush.bf16.msra.mxu0 %v5584_v16  ;;  %v8553_v10 = vld [vmem:[#allocation10 + $0x4c0] sm:$0xf0]  ;;  %v6747_v16 = vld [vmem:[#allocation10 + $0xa0] sm:$0xf] }
 0x188   :  { %2497 = vmatpush.bf16.msra.mxu1 %v6016_v13  ;;  %v6768_v13 = vor.u32 %v8428_v30, %v6767_v4  ;;  %v6748_v31 = vor.u32 %v8423_v18, %v6747_v16  ;;  %v8408_v4 = vld [vmem:[#allocation10 + $0x38] sm:$0xf0]  ;;  %v6667_v14 = vld [vmem:[#allocation10] sm:$0xf]  ;;  %v7447_v16 = vld [vmem:[#allocation10 + $0x618] sm:$0xf] }
 0x189   :  { %2513 = vmatpush.bf16.msrb.mxu2 %v6196_v20  ;;  %v7087_v20 = vld [vmem:[#allocation10 + $0x348] sm:$0xf] }
 0x18a   :  { %v7088_v34 = vor.u32 %v8508_v21, %v7087_v20  ;;  %v7007_v20 = vld [vmem:[#allocation10 + $0x2a8] sm:$0xf]  ;;  %v8488_v21 = vld [vmem:[#allocation10 + $0x2b8] sm:$0xf0] }
 0x18b   :  { %2526 = vmatpush.bf16.msrb.mxu3 %v6484_v28  ;;  %2489 = vmatpush.bf16.msra.mxu0 %v5548_v38  ;;  %v5835_v28 = vld [vmem:[#allocation7 + $0x260] sm:$0xf]  ;;  %v8418_v38 = vld [vmem:[#allocation10 + $0x88] sm:$0xf0] }
 0x18c   :  { %2498 = vmatpush.bf16.msra.mxu1 %v5980_v33  ;;  %v8478_v33 = vld [vmem:[#allocation10 + $0x268] sm:$0xf0]  ;;  %v5836_v40 = vor.u32 %v8193_v29, %v5835_v28  ;;  %v7167_v28 = vld [vmem:[#allocation10 + $0x3e8] sm:$0xf]  ;;  %v8528_v29 = vld [vmem:[#allocation10 + $0x3f8] sm:$0xf0] }
 0x18d   :  { %2514 = vmatpush.bf16.msrb.mxu2 %v6160_v42  ;;  %v8503_v42 = vld [vmem:[#allocation10 + $0x330] sm:$0xf0]  ;;  %v6968_v25 = vor.u32 %v8478_v33, %v6967_v32  ;;  %v6887_v32 = vld [vmem:[#allocation10 + $0x1b8] sm:$0xf]  ;;  %v8458_v33 = vld [vmem:[#allocation10 + $0x1c8] sm:$0xf0] }
 0x18e   :  { %2490 = vmatmul.bf16.vlgmr.msra.gmra.mxu0 %v9037_v37  ;;  %v7268_v37 = vor.u32 %v8553_v10, %v7267_v9  ;;  %v6928_v9 = vor.u32 %v8468_v63, %v6927_v62  ;;  %v8533_v10 = vld [vmem:[#allocation10 + $0x420] sm:$0xf0]  ;;  %v6847_v63 = vld [vmem:[#allocation10 + $0x168] sm:$0xf] }
 0x18f   :  { %4868 = vmatpush.bf16.msrb.mxu0 %v6808_v41  ;;  %2527 = vmatpush.bf16.msrb.mxu3 %v6448_v47  ;;  %v7067_v41 = vld [vmem:[#allocation10 + $0x320] sm:$0xf]  ;;  %v6728_v47 = vor.u32 %v8418_v38, %v6727_v36  ;;  %v7008_v36 = vor.u32 %v8488_v21, %v7007_v20  ;;  %v7427_v38 = vld [vmem:[#allocation10 + $0x5f0] sm:$0xf]  ;;  %v7607_v21 = vld [vmem:[#allocation10 + $0x758] sm:$0xf] }
 0x190   :  { %2499 = vmatpush.bf16.msra.mxu1 %v5944_v51  ;;  %v7068_v50 = vor.u32 %v8503_v42, %v7067_v41  ;;  %v6707_v51 = vld [vmem:[#allocation10 + $0x50] sm:$0xf]  ;;  %v7168_v42 = vor.u32 %v8528_v29, %v7167_v28  ;;  %v7367_v29 = vld [vmem:[#allocation10 + $0x578] sm:$0xf] }
 0x191   :  { %2515 = vmatpush.bf16.msrb.mxu2 %v6124_v61 }
 0x193   :  { %4869 = vmatpush.bf16.msrb.mxu0 %v6788_v59  ;;  %2528 = vmatpush.bf16.msrb.mxu3 %v6412_v1  ;;  %v8538_v59 = vld [vmem:[#allocation10 + $0x448] sm:$0xf0]  ;;  %v7048_v1 = vor.u32 %v8498_v54, %v7047_v53 }
 0x194   :  { %2500 = vmatpush.bf16.msra.mxu1 %v5908_v6  ;;  %2516 = vmatmul.bf16.vlgmr.msrb.gmra.mxu2 %v9040_v56  ;;  %v9108_v56 = vpop.f32.mrf.mxu0  ;;  %v7027_v6 = vld [vmem:[#allocation10 + $0x2d0] sm:$0xf] }
 0x195   :  { %4894 = vmatpush.bf16.msra.mxu2 %v7128_v2  ;;  %v6687_v2 = vld [vmem:[#allocation10 + $0x28] sm:$0xf] }
 0x196   :  { %2529 = vmatmul.bf16.vlgmr.msrb.gmra.mxu3 %v9042_v57  ;;  %v579_v57 = vperm.slane %v9070_v0, 3  ;;  %v6708_v0 = vor.u32 %v8413_v52, %v6707_v51  ;;  %v6688_v11 = vor.u32 %v8408_v4, %v6687_v2  ;;  %v8673_v2 = vld [vmem:[#allocation10 + $0x880] sm:$0xf0]  ;;  %v8448_v4 = vld [vmem:[#allocation10 + $0x178] sm:$0xf0] }
 0x197   :  { %4907 = vmatpush.bf16.msra.mxu3 %v7288_v5  ;;  %4870 = vmatpush.bf16.msrb.mxu0 %v6768_v13  ;;  %v7208_v5 = vor.u32 %v8538_v59, %v7207_v58  ;;  %v8463_v13 = vld [vmem:[#allocation10 + $0x1f0] sm:$0xf0]  ;;  %v9115_v18 = vpop.f32.mrf.mxu2  ;;  %v7407_v58 = vld [vmem:[#allocation10 + $0x5c8] sm:$0xf]  ;;  %v8588_v59 = vld [vmem:[#allocation10 + $0x5d8] sm:$0xf0] }
 0x198   :  { %2501 = vmatpush.bf16.msra.mxu1 %v5872_v19  ;;  %v2232_v61 = vadd.f32 %v9096_v44, %v579_v57  ;;  %v7187_v44 = vld [vmem:[#allocation10 + $0x410] sm:$0xf]  ;;  %v8598_v19 = vld [vmem:[#allocation10 + $0x628] sm:$0xf0]  ;;  %v6908_v24 = vor.u32 %v8463_v13, %v6907_v12  ;;  %v6888_v57 = vor.u32 %v8458_v33, %v6887_v32 }
 0x199   :  { %4895 = vmatpush.bf16.msra.mxu2 %v7108_v15  ;;  %v8403_v15 = vld [vmem:[#allocation10 + $0x10] sm:$0xf0]  ;;  %v9117_v22 = vpop.f32.mrf.mxu3 }
 0x19a   :  { %v2245_v30 = vadd.f32 %v9103_v46, %v2232_v61  ;;  %v7768_v61 = vor.u32 %v8678_v49, %v7767_v48  ;;  %v7347_v49 = vld [vmem:[#allocation10 + $0x550] sm:$0xf] }
 0x19b   :  { %4908 = vmatpush.bf16.msra.mxu3 %v7268_v37  ;;  %4871 = vmatpush.bf16.msrb.mxu0 %v6748_v31  ;;  %v7188_v37 = vor.u32 %v8533_v10, %v7187_v44  ;;  %v6668_v31 = vor.u32 %v8403_v15, %v6667_v14  ;;  %v7387_v10 = vld [vmem:[#allocation10 + $0x5a0] sm:$0xf]  ;;  %v7727_v15 = vld [vmem:[#allocation10 + $0x848] sm:$0xf] }
 0x19c   :  { %2502 = vmatpush.bf16.msra.mxu1 %v5836_v40  ;;  %v2285_v8 = vpop.f32.mrf.mxu0  ;;  %v2258_v46 = vadd.f32 %v9099_v26, %v2245_v30  ;;  %v7448_v26 = vor.u32 %v8598_v19, %v7447_v16  ;;  %v7927_v30 = vld [vmem:[#allocation10 + $0x9d8] sm:$0xf]  ;;  %v6827_v14 = vld [vmem:[#allocation10 + $0x140] sm:$0xf]  ;;  %v8668_v16 = vld [vmem:[#allocation10 + $0x858] sm:$0xf0] }
 0x19d   :  { %4896 = vmatpush.bf16.msra.mxu2 %v7088_v34  ;;  %v2534_v34 = vmax.f32 %v9077_v60, 0.0  ;;  %v6867_v60 = vld [vmem:[#allocation10 + $0x190] sm:$0xf]  ;;  %v9129_v8 = vld [vmem:[#allocation9] sm:$0xff]  ;;  %v8713_v19 = vld [vmem:[#allocation10 + $0x9c0] sm:$0xf0]  ;;  %v7728_v32 = vor.u32 %v8668_v16, %v7727_v15 }
 0x19e   :  { %v2271_v40 = vadd.f32 %v9101_v27, %v2258_v46  ;;  %v9121_v41 = vpop.f32.mrf.mxu1  ;;  %v8443_v46 = vld [vmem:[#allocation10 + $0x150] sm:$0xf0]  ;;  %v7647_v15 = vld [vmem:[#allocation10 + $0x7a8] sm:$0xf]  ;;  %v8648_v16 = vld [vmem:[#allocation10 + $0x7b8] sm:$0xf0] }
 0x19f   :  { %4909 = vmatpush.bf16.msra.mxu3 %v7248_v39  ;;  %4872 = vmatpush.bf16.msrb.mxu0 %v6728_v47  ;;  %v8593_v39 = vld [vmem:[#allocation10 + $0x600] sm:$0xf0]  ;;  %v8523_v47 = vld [vmem:[#allocation10 + $0x3d0] sm:$0xf0]  ;;  %v9123_v51 = vpack.c.bf16 %v2534_v34, %v2534_v34  ;;  %v2311_v54 = vpop.f32.mrf.mxu2  ;;  %v6828_v33 = vor.u32 %v8443_v46, %v6827_v14  ;;  %v7707_v34 = vld [vmem:[#allocation10 + $0x820] sm:$0xf] }
 0x1a0   :  { %4881 = vmatpush.bf16.msrb.mxu1 %v6968_v25  ;;  %v6987_v25 = vld [vmem:[#allocation10 + $0x280] sm:$0xf]  ;;  %v7428_v27 = vor.u32 %v8593_v39, %v7427_v38  ;;  %v2537_v53 = vmax.f32 %v2271_v40, 0.0 }
 0x1a1   :  { %2503 = vmatmul.bf16.vlgmr.msra.gmra.mxu1 %v9046_v23  ;;  %4897 = vmatpush.bf16.msra.mxu2 %v7068_v50  ;;  %v7028_v23 = vor.u32 %v8493_v7, %v7027_v6  ;;  %v8453_v50 = vld [vmem:[#allocation10 + $0x1a0] sm:$0xf0]  ;;  %v6988_v52 = vor.u32 %v8483_v43, %v6987_v25  ;;  %v8708_v25 = vld [vmem:[#allocation10 + $0x998] sm:$0xf0] }
 0x1a2   :  { %v6868_v62 = vor.u32 %v8453_v50, %v6867_v60  ;;  %v9132_v13 = vpack.c.bf16 %v2537_v53, %v2537_v53  ;;  %v8573_v60 = vld [vmem:[#allocation10 + $0x560] sm:$0xf0]  ;;  %v8703_v53 = vld [vmem:[#allocation10 + $0x970] sm:$0xf0] }
 0x1a3   :  { %4910 = vmatpush.bf16.msra.mxu3 %v7228_v35  ;;  %4873 = vmatpush.bf16.msrb.mxu0 %v6708_v0  ;;  %v2536_v35 = vmax.f32 %v9092_v17, 0.0  ;;  %v2324_v0 = vpop.f32.mrf.mxu3  ;;  %v7408_v17 = vor.u32 %v8588_v59, %v7407_v58  ;;  %v7348_v54 = vor.u32 %v8573_v60, %v7347_v49  ;;  %v8628_v58 = vld [vmem:[#allocation10 + $0x718] sm:$0xf0] }
 0x1a4   :  { %4882 = vmatpush.bf16.msrb.mxu1 %v6948_v55  ;;  %v7148_v55 = vor.u32 %v8523_v47, %v7147_v45  ;;  %v7587_v45 = vld [vmem:[#allocation10 + $0x730] sm:$0xf]  ;;  %v8568_v0 = vld [vmem:[#allocation10 + $0x538] sm:$0xf0] }
 0x1a5   :  { %4898 = vmatpush.bf16.msra.mxu2 %v7048_v1  ;;  %v7747_v1 = vld [vmem:[#allocation10 + $0x870] sm:$0xf]  ;;  %v9127_v7 = vpack.c.bf16 %v2536_v35, %v2536_v35  ;;  %v7867_v35 = vld [vmem:[#allocation10 + $0x960] sm:$0xf] }
 0x1a6   :  { %v2298_v44 = vpop.f32.mrf.mxu1  ;;  %v7748_v12 = vor.u32 %v8673_v2, %v7747_v1  ;;  %v7868_v59 = vor.u32 %v8703_v53, %v7867_v35  ;;  %v8653_v1 = vld [vmem:[#allocation10 + $0x7e0] sm:$0xf0]  ;;  %v6949_v53 = vld [vmem:[#allocation10 + $0x244] sm:$0xf0] }
 0x1a7   :  { %4911 = vmatpush.bf16.msra.mxu3 %v7208_v5  ;;  %4874 = vmatpush.bf16.msrb.mxu0 %v6688_v11  ;;  %v8718_v5 = vld [vmem:[#allocation10 + $0x9e8] sm:$0xf0]  ;;  %v8583_v11 = vld [vmem:[#allocation10 + $0x5b0] sm:$0xf0] }
 0x1a8   :  { %4883 = vmatpush.bf16.msrb.mxu1 %v6928_v9  ;;  %v7928_v6 = vor.u32 %v8718_v5, %v7927_v30  ;;  %v580_v9 = vperm.slane %v9129_v8, 4  ;;  %v7388_v20 = vor.u32 %v8583_v11, %v7387_v10  ;;  %v7847_v30 = vld [vmem:[#allocation10 + $0x938] sm:$0xf]  ;;  %v8698_v5 = vld [vmem:[#allocation10 + $0x948] sm:$0xf0]  ;;  %v581_v10 = vperm.slane %v9129_v8, 5 }
 0x1a9   :  { %4899 = vmatpush.bf16.msra.mxu2 %v7028_v23  ;;  %v6848_v23 = vor.u32 %v8448_v4, %v6847_v63  ;;  %v7667_v63 = vld [vmem:[#allocation10 + $0x7d0] sm:$0xf]  ;;  %v7848_v44 = vor.u32 %v8698_v5, %v7847_v30  ;;  %v7307_v11 = vld [vmem:[#allocation10 + $0x500] sm:$0xf] }
 0x1aa   :  { %v2284_v38 = vadd.f32 %v9108_v56, %v580_v9  ;;  %v8623_v9 = vld [vmem:[#allocation10 + $0x6f0] sm:$0xf0] }
 0x1ab   :  { %4912 = vmatpush.bf16.msra.mxu3 %v7188_v37  ;;  %4875 = vmatpush.bf16.msrb.mxu0 %v6668_v31  ;;  %v7907_v37 = vld [vmem:[#allocation10 + $0x9b0] sm:$0xf]  ;;  %v8578_v31 = vld [vmem:[#allocation10 + $0x588] sm:$0xf0]  ;;  %v9138_v39 = vpop.f32.mrf.mxu0 }
 0x1ac   :  { %4884 = vmatpush.bf16.msrb.mxu1 %v6908_v24  ;;  %v8638_v24 = vld [vmem:[#allocation10 + $0x768] sm:$0xf0]  ;;  %v7908_v28 = vor.u32 %v8713_v19, %v7907_v37  ;;  %v7368_v43 = vor.u32 %v8578_v31, %v7367_v29  ;;  %v2297_v48 = vadd.f32 %v9121_v41, %v2284_v38  ;;  %v7827_v19 = vld [vmem:[#allocation10 + $0x910] sm:$0xf]  ;;  %v2336_v31 = vadd.f32 %v9138_v39, %v581_v10  ;;  %v8753_v10 = vld [vmem:[#allocation10 + $0xb00] sm:$0xf0] }
 0x1ad   :  { %4900 = vmatpush.bf16.msra.mxu2 %v7008_v36  ;;  %v2535_v36 = vmax.f32 %v9086_v3, 0.0  ;;  %v7608_v40 = vor.u32 %v8638_v24, %v7607_v21  ;;  %v7687_v3 = vld [vmem:[#allocation10 + $0x7f8] sm:$0xf] }
 0x1ae   :  { %4876 = vmatmul.bf16.vlgmr.msrb.gmra.mxu0 %v9123_v51  ;;  %v2310_v41 = vadd.f32 %v9115_v18, %v2297_v48  ;;  %v7527_v24 = vld [vmem:[#allocation10 + $0x6b8] sm:$0xf] }
 0x1af   :  { %4920 = vmatpush.bf16.msra.mxu0 %v7448_v26  ;;  %4913 = vmatpush.bf16.msra.mxu3 %v7168_v42  ;;  %v8663_v26 = vld [vmem:[#allocation10 + $0x830] sm:$0xf0]  ;;  %v7887_v42 = vld [vmem:[#allocation10 + $0x988] sm:$0xf]  ;;  %v9141_v56 = vpack.c.bf16 %v2535_v36, %v2535_v36  ;;  %v8476_v36 = vld [vmem:[#allocation10 + $0x25c] sm:$0xf] }
 0x1b0   :  { %4885 = vmatpush.bf16.msrb.mxu1 %v6888_v57  ;;  %v8633_v57 = vld [vmem:[#allocation10 + $0x740] sm:$0xf0]  ;;  %v7888_v47 = vor.u32 %v8708_v25, %v7887_v42  ;;  %v7708_v50 = vor.u32 %v8663_v26, %v7707_v34  ;;  %v2323_v18 = vadd.f32 %v9117_v22, %v2310_v41  ;;  %v7627_v34 = vld [vmem:[#allocation10 + $0x780] sm:$0xf]  ;;  %v8643_v26 = vld [vmem:[#allocation10 + $0x790] sm:$0xf0] }
 0x1b1   :  { %4901 = vmatpush.bf16.msra.mxu2 %v6988_v52  ;;  %v7588_v52 = vor.u32 %v8633_v57, %v7587_v45  ;;  %v6969_v42 = vld [vmem:[#allocation10 + $0x26c] sm:$0xf0]  ;;  %v7807_v25 = vld [vmem:[#allocation10 + $0x8e8] sm:$0xf]  ;;  %v8613_v57 = vld [vmem:[#allocation10 + $0x6a0] sm:$0xf0]  ;;  %v7628_v39 = vor.u32 %v8643_v26, %v7627_v34 }
 0x1b2   :  { %v2538_v29 = vmax.f32 %v2323_v18, 0.0  ;;  %v7507_v45 = vld [vmem:[#allocation10 + $0x690] sm:$0xf]  ;;  %v6972_v60 = vor.u32 %v8476_v36, %v6969_v42  ;;  %v8087_v41 = vld [vmem:[#allocation10 + $0xb18] sm:$0xf] }
 0x1b3   :  { %4921 = vmatpush.bf16.msra.mxu0 %v7428_v27  ;;  %4914 = vmatpush.bf16.msra.mxu3 %v7148_v55  ;;  %v8658_v27 = vld [vmem:[#allocation10 + $0x808] sm:$0xf0]  ;;  %v7567_v55 = vld [vmem:[#allocation10 + $0x708] sm:$0xf]  ;;  %v2337_v2 = vpop.f32.mrf.mxu0  ;;  %v7508_v35 = vor.u32 %v8613_v57, %v7507_v45  ;;  %v8067_v18 = vld [vmem:[#allocation10 + $0xaf0] sm:$0xf] }
 0x1b4   :  { %4886 = vmatpush.bf16.msrb.mxu1 %v6868_v62  ;;  %4902 = vmatmul.bf16.vlgmr.msra.gmra.mxu2 %v9127_v7  ;;  %v7688_v62 = vor.u32 %v8658_v27, %v7687_v3  ;;  %v7568_v4 = vor.u32 %v8628_v58, %v7567_v55  ;;  %v9148_v48 = vpack.c.bf16 %v2538_v29, %v2538_v29  ;;  %v8471_v3 = vld [vmem:[#allocation10 + $0x234] sm:$0xf]  ;;  %v8608_v58 = vld [vmem:[#allocation10 + $0x678] sm:$0xf0]  ;;  %v7089_v26 = vld [vmem:[#allocation10 + $0x35c] sm:$0xf0] }
 0x1b5   :  { %4946 = vmatpush.bf16.msrb.mxu2 %v7768_v61  ;;  %v7327_v61 = vld [vmem:[#allocation10 + $0x528] sm:$0xf]  ;;  %v8683_v55 = vld [vmem:[#allocation10 + $0x8d0] sm:$0xf0]  ;;  %v6952_v2 = vor.u32 %v8471_v3, %v6949_v53  ;;  %v8748_v29 = vld [vmem:[#allocation10 + $0xad8] sm:$0xf0] }
 0x1b6   :  { %4915 = vmatmul.bf16.vlgmr.msra.gmra.mxu3 %v9132_v13  ;;  %v6889_v42 = vld [vmem:[#allocation10 + $0x1cc] sm:$0xf0]  ;;  %v8027_v45 = vld [vmem:[#allocation10 + $0xaa0] sm:$0xf]  ;;  %v8743_v57 = vld [vmem:[#allocation10 + $0xab0] sm:$0xf0] }
 0x1b7   :  { %4959 = vmatpush.bf16.msrb.mxu3 %v7928_v6  ;;  %4922 = vmatpush.bf16.msra.mxu0 %v7408_v17  ;;  %v7328_v17 = vor.u32 %v8568_v0, %v7327_v61  ;;  %v7547_v6 = vld [vmem:[#allocation10 + $0x6e0] sm:$0xf]  ;;  %v2361_v14 = vpop.f32.mrf.mxu2  ;;  %v8758_v61 = vld [vmem:[#allocation10 + $0xb28] sm:$0xf0] }
 0x1b8   :  { %4887 = vmatpush.bf16.msrb.mxu1 %v6848_v23  ;;  %v7668_v23 = vor.u32 %v8653_v1, %v7667_v63  ;;  %v7548_v37 = vor.u32 %v8623_v9, %v7547_v6  ;;  %v8088_v0 = vor.u32 %v8758_v61, %v8087_v41  ;;  %v7129_v63 = vld [vmem:[#allocation10 + $0x3ac] sm:$0xf0]  ;;  %v8603_v6 = vld [vmem:[#allocation10 + $0x650] sm:$0xf0]  ;;  %v8466_v9 = vld [vmem:[#allocation10 + $0x20c] sm:$0xf] }
 0x1b9   :  { %4947 = vmatpush.bf16.msrb.mxu2 %v7748_v12  ;;  %v8563_v12 = vld [vmem:[#allocation10 + $0x510] sm:$0xf0]  ;;  %v2374_v46 = vpop.f32.mrf.mxu3  ;;  %v8421_v41 = vld [vmem:[#allocation10 + $0xa4] sm:$0xf]  ;;  %v6749_v61 = vld [vmem:[#allocation10 + $0xb4] sm:$0xf0] }
 0x1ba   :  { %v7308_v21 = vor.u32 %v8563_v12, %v7307_v11  ;;  %v8511_v11 = vld [vmem:[#allocation10 + $0x374] sm:$0xf]  ;;  %v8436_v12 = vld [vmem:[#allocation10 + $0x11c] sm:$0xf] }
 0x1bb   :  { %4960 = vmatpush.bf16.msrb.mxu3 %v7908_v28  ;;  %4923 = vmatpush.bf16.msra.mxu0 %v7388_v20  ;;  %v8693_v20 = vld [vmem:[#allocation10 + $0x920] sm:$0xf0]  ;;  %v8618_v28 = vld [vmem:[#allocation10 + $0x6c8] sm:$0xf0] }
 0x1bc   :  { %4888 = vmatpush.bf16.msrb.mxu1 %v6828_v33  ;;  %v7828_v22 = vor.u32 %v8693_v20, %v7827_v19  ;;  %v8461_v20 = vld [vmem:[#allocation10 + $0x1e4] sm:$0xf] }
 0x1bd   :  { %4948 = vmatpush.bf16.msrb.mxu2 %v7728_v32  ;;  %v7648_v32 = vor.u32 %v8648_v16, %v7647_v15  ;;  %v7109_v15 = vld [vmem:[#allocation10 + $0x384] sm:$0xf0] }
 0x1be   :  { %v2348_v33 = vpop.f32.mrf.mxu1 }
 0x1bf   :  { %4961 = vmatpush.bf16.msrb.mxu3 %v7888_v47  ;;  %4924 = vmatpush.bf16.msra.mxu0 %v7368_v43  ;;  %v2349_v38 = vadd.f32 %v2348_v33, %v2336_v31  ;;  %v8688_v43 = vld [vmem:[#allocation10 + $0x8f8] sm:$0xf0]  ;;  %v2363_v49 = vpop.f32.mrf.mxu2  ;;  %v8506_v31 = vld [vmem:[#allocation10 + $0x34c] sm:$0xf]  ;;  %v6789_v33 = vld [vmem:[#allocation10 + $0x104] sm:$0xf0] }
 0x1c0   :  { %4933 = vmatpush.bf16.msra.mxu1 %v7608_v40  ;;  %v7528_v40 = vor.u32 %v8618_v28, %v7527_v24  ;;  %v7808_v47 = vor.u32 %v8688_v43, %v7807_v25  ;;  %v6769_v49 = vld [vmem:[#allocation10 + $0xdc] sm:$0xf0] }
 0x1c1   :  { %4889 = vmatmul.bf16.vlgmr.msrb.gmra.mxu1 %v9141_v56  ;;  %4949 = vmatpush.bf16.msrb.mxu2 %v7708_v50  ;;  %v7487_v50 = vld [vmem:[#allocation10 + $0x668] sm:$0xf]  ;;  %v2362_v27 = vadd.f32 %v2361_v14, %v2349_v38  ;;  %v8068_v14 = vor.u32 %v8753_v10, %v8067_v18  ;;  %v7092_v38 = vor.u32 %v8506_v31, %v7089_v26  ;;  %v8491_v18 = vld [vmem:[#allocation10 + $0x2d4] sm:$0xf]  ;;  %v8416_v10 = vld [vmem:[#allocation10 + $0x7c] sm:$0xf] }
 0x1c2   :  { %v8411_v31 = vld [vmem:[#allocation10 + $0x54] sm:$0xf] }
 0x1c3   :  { %4962 = vmatpush.bf16.msrb.mxu3 %v7868_v59  ;;  %4925 = vmatpush.bf16.msra.mxu0 %v7348_v54  ;;  %v7787_v54 = vld [vmem:[#allocation10 + $0x8c0] sm:$0xf]  ;;  %v2375_v5 = vadd.f32 %v2374_v46, %v2362_v27 }
 0x1c4   :  { %4934 = vmatpush.bf16.msra.mxu1 %v7588_v52  ;;  %v2376_v52 = vpop.f32.mrf.mxu3  ;;  %v7788_v59 = vor.u32 %v8683_v55, %v7787_v54  ;;  %v8007_v55 = vld [vmem:[#allocation10 + $0xa78] sm:$0xf] }
 0x1c5   :  { %4950 = vmatpush.bf16.msrb.mxu2 %v7688_v62  ;;  %v8516_v62 = vld [vmem:[#allocation10 + $0x39c] sm:$0xf]  ;;  %v2539_v19 = vmax.f32 %v2375_v5, 0.0  ;;  %v8451_v52 = vld [vmem:[#allocation10 + $0x194] sm:$0xf] }
 0x1c6   :  { %v2350_v1 = vpop.f32.mrf.mxu1  ;;  %v7132_v30 = vor.u32 %v8516_v62, %v7129_v63  ;;  %v7049_v62 = vld [vmem:[#allocation10 + $0x30c] sm:$0xf0]  ;;  %v582_v63 = vperm.slane %v9129_v8, 6  ;;  %v6849_v5 = vld [vmem:[#allocation10 + $0x17c] sm:$0xf0] }
 0x1c7   :  { %4963 = vmatpush.bf16.msrb.mxu3 %v7848_v44  ;;  %4926 = vmatpush.bf16.msra.mxu0 %v7328_v17  ;;  %v7488_v17 = vor.u32 %v8608_v58, %v7487_v50  ;;  %v6929_v44 = vld [vmem:[#allocation10 + $0x21c] sm:$0xf0]  ;;  %v9153_v25 = vpack.c.bf16 %v2539_v19, %v2539_v19  ;;  %v7069_v50 = vld [vmem:[#allocation10 + $0x334] sm:$0xf0]  ;;  %v8738_v58 = vld [vmem:[#allocation10 + $0xa88] sm:$0xf0] }
 0x1c8   :  { %4935 = vmatpush.bf16.msra.mxu1 %v7568_v4  ;;  %v7467_v4 = vld [vmem:[#allocation10 + $0x640] sm:$0xf]  ;;  %v6932_v16 = vor.u32 %v8466_v9, %v6929_v44  ;;  %v7987_v9 = vld [vmem:[#allocation10 + $0xa50] sm:$0xf]  ;;  %v8733_v44 = vld [vmem:[#allocation10 + $0xa60] sm:$0xf0] }
 0x1c9   :  { %4951 = vmatpush.bf16.msrb.mxu2 %v7668_v23  ;;  %v6809_v23 = vld [vmem:[#allocation10 + $0x12c] sm:$0xf0]  ;;  %v7468_v46 = vor.u32 %v8603_v6, %v7467_v4  ;;  %v6752_v6 = vor.u32 %v8421_v41, %v6749_v61  ;;  %v8441_v19 = vld [vmem:[#allocation10 + $0x144] sm:$0xf] }
 0x1ca   :  { %v6812_v28 = vor.u32 %v8436_v12, %v6809_v23  ;;  %v7988_v12 = vor.u32 %v8733_v44, %v7987_v9  ;;  %v7029_v23 = vld [vmem:[#allocation10 + $0x2e4] sm:$0xf0]  ;;  %v8626_v44 = vld [vmem:[#allocation10 + $0x70c] sm:$0xf] }
 0x1cb   :  { %4964 = vmatpush.bf16.msrb.mxu3 %v7828_v22  ;;  %4927 = vmatpush.bf16.msra.mxu0 %v7308_v21  ;;  %v6909_v21 = vld [vmem:[#allocation10 + $0x1f4] sm:$0xf0]  ;;  %v9151_v24 = vpop.f32.mrf.mxu0  ;;  %v8047_v22 = vld [vmem:[#allocation10 + $0xac8] sm:$0xf] }
 0x1cc   :  { %4936 = vmatpush.bf16.msra.mxu1 %v7548_v37  ;;  %v7112_v37 = vor.u32 %v8511_v11, %v7109_v15  ;;  %v8048_v34 = vor.u32 %v8748_v29, %v8047_v22  ;;  %v6912_v36 = vor.u32 %v8461_v20, %v6909_v21  ;;  %v6729_v11 = vld [vmem:[#allocation10 + $0x8c] sm:$0xf0]  ;;  %v8728_v22 = vld [vmem:[#allocation10 + $0xa38] sm:$0xf0]  ;;  %v8486_v29 = vld [vmem:[#allocation10 + $0x2ac] sm:$0xf] }
 0x1cd   :  { %4952 = vmatpush.bf16.msrb.mxu2 %v7648_v32  ;;  %v8431_v32 = vld [vmem:[#allocation10 + $0xf4] sm:$0xf]  ;;  %v6732_v21 = vor.u32 %v8416_v10, %v6729_v11 }
 0x1ce   :  { %4928 = vmatmul.bf16.vlgmr.msra.gmra.mxu0 %v9148_v48  ;;  %v6792_v43 = vor.u32 %v8431_v32, %v6789_v33  ;;  %v6709_v32 = vld [vmem:[#allocation10 + $0x64] sm:$0xf0] }
 0x1cf   :  { %4965 = vmatpush.bf16.msrb.mxu3 %v7808_v47  ;;  %4972 = vmatpush.bf16.msrb.mxu0 %v8088_v0  ;;  %v8501_v47 = vld [vmem:[#allocation10 + $0x324] sm:$0xf]  ;;  %v8008_v0 = vor.u32 %v8738_v58, %v8007_v55 }
 0x1d0   :  { %4937 = vmatpush.bf16.msra.mxu1 %v7528_v40  ;;  %v8456_v40 = vld [vmem:[#allocation10 + $0x1bc] sm:$0xf]  ;;  %v7072_v27 = vor.u32 %v8501_v47, %v7069_v50  ;;  %v7947_v47 = vld [vmem:[#allocation10 + $0xa00] sm:$0xf] }
 0x1d1   :  { %4953 = vmatpush.bf16.msrb.mxu2 %v7628_v39  ;;  %v8426_v39 = vld [vmem:[#allocation10 + $0xcc] sm:$0xf]  ;;  %v6892_v3 = vor.u32 %v8456_v40, %v6889_v42  ;;  %v8636_v40 = vld [vmem:[#allocation10 + $0x75c] sm:$0xf]  ;;  %v7609_v42 = vld [vmem:[#allocation10 + $0x76c] sm:$0xf0] }
 0x1d2   :  { %v6772_v54 = vor.u32 %v8426_v39, %v6769_v49  ;;  %v8723_v39 = vld [vmem:[#allocation10 + $0xa10] sm:$0xf0]  ;;  %v8481_v49 = vld [vmem:[#allocation10 + $0x284] sm:$0xf]  ;;  %v6689_v50 = vld [vmem:[#allocation10 + $0x3c] sm:$0xf0]  ;;  %v7612_v58 = vor.u32 %v8636_v40, %v7609_v42 }
 0x1d3   :  { %4966 = vmatpush.bf16.msrb.mxu3 %v7788_v59  ;;  %4973 = vmatpush.bf16.msrb.mxu0 %v8068_v14  ;;  %v2389_v53 = vpop.f32.mrf.mxu0  ;;  %v8496_v59 = vld [vmem:[#allocation10 + $0x2fc] sm:$0xf]  ;;  %v2388_v14 = vadd.f32 %v9151_v24, %v582_v63  ;;  %v8401_v63 = vld [vmem:[#allocation10 + $0x4] sm:$0xf]  ;;  %v7389_v42 = vld [vmem:[#allocation10 + $0x5b4] sm:$0xf0] }
 0x1d4   :  { %4938 = vmatpush.bf16.msra.mxu1 %v7508_v35  ;;  %v6869_v35 = vld [vmem:[#allocation10 + $0x1a4] sm:$0xf0]  ;;  %v8556_v53 = vld [vmem:[#allocation10 + $0x4dc] sm:$0xf]  ;;  %v8581_v40 = vld [vmem:[#allocation10 + $0x5a4] sm:$0xf] }
 0x1d5   :  { %4998 = vmatpush.bf16.msra.mxu2 %v6972_v60  ;;  %v8028_v60 = vor.u32 %v8743_v57, %v8027_v45  ;;  %v6872_v1 = vor.u32 %v8451_v52, %v6869_v35  ;;  %v6712_v57 = vor.u32 %v8411_v31, %v6709_v32 }
 0x1d7   :  { %5011 = vmatpush.bf16.msra.mxu3 %v7132_v30  ;;  %4974 = vmatpush.bf16.msrb.mxu0 %v8048_v34  ;;  %v2413_v4 = vpop.f32.mrf.mxu2  ;;  %v8446_v30 = vld [vmem:[#allocation10 + $0x16c] sm:$0xf]  ;;  %v7009_v34 = vld [vmem:[#allocation10 + $0x2bc] sm:$0xf0] }
 0x1d8   :  { %4939 = vmatpush.bf16.msra.mxu1 %v7488_v17  ;;  %v6852_v15 = vor.u32 %v8446_v30, %v6849_v5  ;;  %v8596_v30 = vld [vmem:[#allocation10 + $0x61c] sm:$0xf]  ;;  %v7449_v5 = vld [vmem:[#allocation10 + $0x62c] sm:$0xf0] }
 0x1d9   :  { %4999 = vmatpush.bf16.msra.mxu2 %v6952_v2  ;;  %v7052_v2 = vor.u32 %v8496_v59, %v7049_v62  ;;  %v2426_v17 = vpop.f32.mrf.mxu3  ;;  %v7589_v62 = vld [vmem:[#allocation10 + $0x744] sm:$0xf0]  ;;  %v7452_v11 = vor.u32 %v8596_v30, %v7449_v5 }
 0x1db   :  { %5012 = vmatpush.bf16.msra.mxu3 %v7112_v37  ;;  %4975 = vmatpush.bf16.msrb.mxu0 %v8028_v60  ;;  %v8406_v60 = vld [vmem:[#allocation10 + $0x2c] sm:$0xf] }
 0x1dc   :  { %4940 = vmatpush.bf16.msra.mxu1 %v7468_v46  ;;  %v6829_v46 = vld [vmem:[#allocation10 + $0x154] sm:$0xf0]  ;;  %v6692_v61 = vor.u32 %v8406_v60, %v6689_v50  ;;  %v7392_v50 = vor.u32 %v8581_v40, %v7389_v42  ;;  %v8756_v40 = vld [vmem:[#allocation10 + $0xb1c] sm:$0xf]  ;;  %v8089_v42 = vld [vmem:[#allocation10 + $0xb2c] sm:$0xf0] }
 0x1dd   :  { %5000 = vmatpush.bf16.msra.mxu2 %v6932_v16  ;;  %v7032_v16 = vor.u32 %v8491_v18, %v7029_v23  ;;  %v6832_v24 = vor.u32 %v8441_v19, %v6829_v46  ;;  %v7569_v18 = vld [vmem:[#allocation10 + $0x71c] sm:$0xf0]  ;;  %v8621_v19 = vld [vmem:[#allocation10 + $0x6e4] sm:$0xf]  ;;  %v7549_v46 = vld [vmem:[#allocation10 + $0x6f4] sm:$0xf0] }
 0x1de   :  { %v2400_v37 = vpop.f32.mrf.mxu1  ;;  %v7249_v23 = vld [vmem:[#allocation10 + $0x49c] sm:$0xf0]  ;;  %v7552_v32 = vor.u32 %v8621_v19, %v7549_v46 }
 0x1df   :  { %5013 = vmatpush.bf16.msra.mxu3 %v7092_v38  ;;  %4941 = vmatmul.bf16.vlgmr.msra.gmra.mxu1 %v9153_v25  ;;  %v2401_v20 = vadd.f32 %v2400_v37, %v2388_v14  ;;  %v2415_v38 = vpop.f32.mrf.mxu2  ;;  %v8591_v14 = vld [vmem:[#allocation10 + $0x5f4] sm:$0xf]  ;;  %v7572_v37 = vor.u32 %v8626_v44, %v7569_v18  ;;  %v8676_v44 = vld [vmem:[#allocation10 + $0x89c] sm:$0xf]  ;;  %v7769_v18 = vld [vmem:[#allocation10 + $0x8ac] sm:$0xf0] }
 0x1e0   :  { %4985 = vmatpush.bf16.msrb.mxu1 %v6812_v28  ;;  %4976 = vmatpush.bf16.msrb.mxu0 %v8008_v0  ;;  %v7967_v28 = vld [vmem:[#allocation10 + $0xa28] sm:$0xf]  ;;  %v8631_v0 = vld [vmem:[#allocation10 + $0x734] sm:$0xf]  ;;  %v7209_v38 = vld [vmem:[#allocation10 + $0x44c] sm:$0xf0] }
 0x1e1   :  { %5001 = vmatpush.bf16.msra.mxu2 %v6912_v36  ;;  %v7968_v33 = vor.u32 %v8728_v22, %v7967_v28  ;;  %v2414_v26 = vadd.f32 %v2413_v4, %v2401_v20  ;;  %v7012_v36 = vor.u32 %v8486_v29, %v7009_v34  ;;  %v2428_v45 = vpop.f32.mrf.mxu3  ;;  %v7269_v4 = vld [vmem:[#allocation10 + $0x4c4] sm:$0xf0]  ;;  %v7229_v28 = vld [vmem:[#allocation10 + $0x474] sm:$0xf0]  ;;  %v8586_v22 = vld [vmem:[#allocation10 + $0x5cc] sm:$0xf] }
 0x1e2   :  { %v7409_v29 = vld [vmem:[#allocation10 + $0x5dc] sm:$0xf0]  ;;  %v7529_v34 = vld [vmem:[#allocation10 + $0x6cc] sm:$0xf0]  ;;  %v583_v45 = vperm.slane %v9129_v8, 7 }
 0x1e3   :  { %5014 = vmatpush.bf16.msra.mxu3 %v7072_v27  ;;  %v6989_v27 = vld [vmem:[#allocation10 + $0x294] sm:$0xf0]  ;;  %v7329_v19 = vld [vmem:[#allocation10 + $0x53c] sm:$0xf0] }
 0x1e4   :  { %4986 = vmatpush.bf16.msrb.mxu1 %v6792_v43  ;;  %4977 = vmatpush.bf16.msrb.mxu0 %v7988_v12  ;;  %v2427_v43 = vadd.f32 %v2426_v17, %v2414_v26  ;;  %v6992_v35 = vor.u32 %v8481_v49, %v6989_v27  ;;  %v8546_v12 = vld [vmem:[#allocation10 + $0x48c] sm:$0xf]  ;;  %v7509_v49 = vld [vmem:[#allocation10 + $0x6a4] sm:$0xf0] }
 0x1e5   :  { %5002 = vmatpush.bf16.msra.mxu2 %v6892_v3  ;;  %v7948_v3 = vor.u32 %v8723_v39, %v7947_v47  ;;  %v8611_v39 = vld [vmem:[#allocation10 + $0x694] sm:$0xf]  ;;  %v7189_v27 = vld [vmem:[#allocation10 + $0x424] sm:$0xf0] }
 0x1e6   :  { %v2540_v52 = vmax.f32 %v2427_v43, 0.0  ;;  %v2402_v55 = vpop.f32.mrf.mxu1 }
 0x1e7   :  { %5015 = vmatpush.bf16.msra.mxu3 %v7052_v2  ;;  %v8551_v2 = vld [vmem:[#allocation10 + $0x4b4] sm:$0xf]  ;;  %v7512_v55 = vor.u32 %v8611_v39, %v7509_v49  ;;  %v7729_v39 = vld [vmem:[#allocation10 + $0x85c] sm:$0xf0]  ;;  %v6775_v49 = vld [vmem:[#allocation10 + $0xd0] sm:$0xf] }
 0x1e8   :  { %4987 = vmatpush.bf16.msrb.mxu1 %v6772_v54  ;;  %4978 = vmatpush.bf16.msrb.mxu0 %v7968_v33  ;;  %v7289_v54 = vld [vmem:[#allocation10 + $0x4ec] sm:$0xf0]  ;;  %v9158_v41 = vpack.c.bf16 %v2540_v52, %v2540_v52  ;;  %v7272_v17 = vor.u32 %v8551_v2, %v7269_v4  ;;  %v8616_v33 = vld [vmem:[#allocation10 + $0x6bc] sm:$0xf]  ;;  %v7349_v2 = vld [vmem:[#allocation10 + $0x564] sm:$0xf0] }
 0x1e9   :  { %5003 = vmatpush.bf16.msra.mxu2 %v6872_v1  ;;  %v7292_v59 = vor.u32 %v8556_v53, %v7289_v54  ;;  %v6669_v1 = vld [vmem:[#allocation10 + $0x14] sm:$0xf0]  ;;  %v8576_v52 = vld [vmem:[#allocation10 + $0x57c] sm:$0xf] }
 0x1ea   :  { %4954 = vmatmul.bf16.vlgmr.msrb.gmra.mxu2 %v9158_v41  ;;  %v6672_v9 = vor.u32 %v8401_v63, %v6669_v1  ;;  %v7169_v63 = vld [vmem:[#allocation10 + $0x3fc] sm:$0xf0]  ;;  %v8571_v1 = vld [vmem:[#allocation10 + $0x554] sm:$0xf] }
 0x1eb   :  { %5016 = vmatpush.bf16.msra.mxu3 %v7032_v16  ;;  %v2439_v10 = vpop.f32.mrf.mxu0  ;;  %v7252_v16 = vor.u32 %v8546_v12, %v7249_v23  ;;  %v7352_v23 = vor.u32 %v8571_v1, %v7349_v2  ;;  %v8656_v1 = vld [vmem:[#allocation10 + $0x7fc] sm:$0xf]  ;;  %v7689_v2 = vld [vmem:[#allocation10 + $0x80c] sm:$0xf0] }
 0x1ec   :  { %4988 = vmatpush.bf16.msrb.mxu1 %v6752_v6  ;;  %4979 = vmatpush.bf16.msrb.mxu0 %v7948_v3  ;;  %v7592_v6 = vor.u32 %v8631_v0, %v7589_v62  ;;  %v8531_v3 = vld [vmem:[#allocation10 + $0x414] sm:$0xf]  ;;  %v2440_v54 = vadd.f32 %v2439_v10, %v583_v45  ;;  %v8526_v62 = vld [vmem:[#allocation10 + $0x3ec] sm:$0xf]  ;;  %v6815_v10 = vld [vmem:[#allocation10 + $0x120] sm:$0xf] }
 0x1ed   :  { %5004 = vmatpush.bf16.msra.mxu2 %v6852_v15  ;;  %v7429_v15 = vld [vmem:[#allocation10 + $0x604] sm:$0xf0]  ;;  %v7192_v53 = vor.u32 %v8531_v3, %v7189_v27  ;;  %v7172_v4 = vor.u32 %v8526_v62, %v7169_v63  ;;  %v8092_v3 = vor.u32 %v8756_v40, %v8089_v42  ;;  %v8751_v27 = vld [vmem:[#allocation10 + $0xaf4] sm:$0xf] }
 0x1ee   :  { %v7432_v20 = vor.u32 %v8591_v14, %v7429_v15  ;;  %v8439_v14 = vld [vmem:[#allocation10 + $0x130] sm:$0xf0]  ;;  %v8521_v15 = vld [vmem:[#allocation10 + $0x3c4] sm:$0xf] }
 0x1ef   :  { %5017 = vmatpush.bf16.msra.mxu3 %v7012_v36  ;;  %v8536_v36 = vld [vmem:[#allocation10 + $0x43c] sm:$0xf] }
 0x1f0   :  { %4989 = vmatpush.bf16.msrb.mxu1 %v6732_v21  ;;  %5024 = vmatpush.bf16.msra.mxu0 %v7292_v59  ;;  %v8541_v21 = vld [vmem:[#allocation10 + $0x464] sm:$0xf]  ;;  %v7212_v43 = vor.u32 %v8536_v36, %v7209_v38  ;;  %v7489_v59 = vld [vmem:[#allocation10 + $0x67c] sm:$0xf0]  ;;  %v7309_v38 = vld [vmem:[#allocation10 + $0x514] sm:$0xf0] }
 0x1f1   :  { %5005 = vmatpush.bf16.msra.mxu2 %v6832_v24  ;;  %v7232_v31 = vor.u32 %v8541_v21, %v7229_v28  ;;  %v7412_v24 = vor.u32 %v8586_v22, %v7409_v29  ;;  %v7772_v22 = vor.u32 %v8676_v44, %v7769_v18  ;;  %v6816_v29 = vor.u32 %v8439_v14, %v6815_v10  ;;  %v8561_v36 = vld [vmem:[#allocation10 + $0x504] sm:$0xf]  ;;  %v8774_v44 = vld [vmem:[#allocation9 + $0x8] ss:$0 sm:$0xff]  ;;  %v6715_v14 = vld [vmem:[#allocation10 + $0x58] sm:$0xf] }
 0x1f2   :  { %v7692_v18 = vor.u32 %v8656_v1, %v7689_v2 }
 0x1f3   :  { %5018 = vmatpush.bf16.msra.mxu3 %v6992_v35  ;;  %v2441_v26 = vpop.f32.mrf.mxu0  ;;  %v7369_v35 = vld [vmem:[#allocation10 + $0x58c] sm:$0xf0] }
 0x1f4   :  { %4990 = vmatpush.bf16.msrb.mxu1 %v6712_v57  ;;  %5025 = vmatpush.bf16.msra.mxu0 %v7272_v17  ;;  %v7532_v57 = vor.u32 %v8616_v33, %v7529_v34  ;;  %v7372_v0 = vor.u32 %v8576_v52, %v7369_v35  ;;  %v8601_v17 = vld [vmem:[#allocation10 + $0x644] sm:$0xf]  ;;  %v7749_v34 = vld [vmem:[#allocation10 + $0x884] sm:$0xf0]  ;;  %v6795_v26 = vld [vmem:[#allocation10 + $0xf8] sm:$0xf] }
 0x1f5   :  { %5050 = vmatpush.bf16.msrb.mxu2 %v7612_v58  ;;  %v8606_v58 = vld [vmem:[#allocation10 + $0x66c] sm:$0xf]  ;;  %v8069_v52 = vld [vmem:[#allocation10 + $0xb04] sm:$0xf0] }
 0x1f6   :  { %v7492_v5 = vor.u32 %v8606_v58, %v7489_v59  ;;  %v8424_v58 = vld [vmem:[#allocation10 + $0xb8] sm:$0xf0]  ;;  %v8072_v59 = vor.u32 %v8751_v27, %v8069_v52  ;;  %v6975_v52 = vld [vmem:[#allocation10 + $0x260] sm:$0xf] }
 0x1f7   :  { %v2465_v47 = vpop.f32.mrf.mxu2  ;;  %v8716_v27 = vld [vmem:[#allocation10 + $0x9dc] sm:$0xf] }
 0x1f8   :  { %4991 = vmatpush.bf16.msrb.mxu1 %v6692_v61  ;;  %5026 = vmatpush.bf16.msra.mxu0 %v7252_v16  ;;  %v7149_v16 = vld [vmem:[#allocation10 + $0x3d4] sm:$0xf0] }
 0x1f9   :  { %5051 = vmatpush.bf16.msrb.mxu2 %v7592_v6  ;;  %v2478_v60 = vpop.f32.mrf.mxu3  ;;  %v7469_v6 = vld [vmem:[#allocation10 + $0x654] sm:$0xf0]  ;;  %v7152_v46 = vor.u32 %v8521_v15, %v7149_v16  ;;  %v8414_v15 = vld [vmem:[#allocation10 + $0x68] sm:$0xf0] }
 0x1fa   :  { %5006 = vmatmul.bf16.vlgmr.msra.gmra.mxu2 %v9141_v56  ;;  %v7472_v21 = vor.u32 %v8601_v17, %v7469_v6  ;;  %v8741_v6 = vld [vmem:[#allocation10 + $0xaa4] sm:$0xf] }
 0x1fc   :  { %4992 = vmatpush.bf16.msrb.mxu1 %v6672_v9  ;;  %5027 = vmatpush.bf16.msra.mxu0 %v7232_v31  ;;  %v8671_v31 = vld [vmem:[#allocation10 + $0x874] sm:$0xf] }
 0x1fd   :  { %5052 = vmatpush.bf16.msrb.mxu2 %v7572_v37  ;;  %v8566_v37 = vld [vmem:[#allocation10 + $0x52c] sm:$0xf] }
 0x1fe   :  { %v2452_v8 = vpop.f32.mrf.mxu1  ;;  %v7332_v33 = vor.u32 %v8566_v37, %v7329_v19  ;;  %v8736_v19 = vld [vmem:[#allocation10 + $0xa7c] sm:$0xf] }
 0x1ff   :  { %4993 = vmatmul.bf16.vlgmr.msrb.gmra.mxu1 %v9123_v51  ;;  %v2453_v61 = vadd.f32 %v2452_v8, %v2440_v54  ;;  %v2467_v9 = vpop.f32.mrf.mxu2  ;;  %v8661_v54 = vld [vmem:[#allocation10 + $0x824] sm:$0xf]  ;;  %v6755_v8 = vld [vmem:[#allocation10 + $0xa8] sm:$0xf] }
 0x200   :  { %5037 = vmatpush.bf16.msra.mxu1 %v7452_v11  ;;  %5028 = vmatpush.bf16.msra.mxu0 %v7212_v43  ;;  %v7752_v43 = vor.u32 %v8671_v31, %v7749_v34  ;;  %v6756_v63 = vor.u32 %v8424_v58, %v6755_v8  ;;  %v8029_v9 = vld [vmem:[#allocation10 + $0xab4] sm:$0xf0]  ;;  %v7649_v31 = vld [vmem:[#allocation10 + $0x7bc] sm:$0xf0]  ;;  %v8409_v34 = vld [vmem:[#allocation10 + $0x40] sm:$0xf0] }
 0x201   :  { %5053 = vmatpush.bf16.msrb.mxu2 %v7552_v32  ;;  %v2466_v30 = vadd.f32 %v2465_v47, %v2453_v61  ;;  %v2480_v12 = vpop.f32.mrf.mxu3  ;;  %v7312_v47 = vor.u32 %v8561_v36, %v7309_v38  ;;  %v8746_v61 = vld [vmem:[#allocation10 + $0xacc] sm:$0xf]  ;;  %v8032_v37 = vor.u32 %v8741_v6, %v8029_v9  ;;  %v8731_v36 = vld [vmem:[#allocation10 + $0xa54] sm:$0xf]  ;;  %v7989_v38 = vld [vmem:[#allocation10 + $0xa64] sm:$0xf0] }
 0x202   :  { %v7909_v9 = vld [vmem:[#allocation10 + $0x9c4] sm:$0xf0] }
 0x203   :  { %v2479_v11 = vadd.f32 %v2478_v60, %v2466_v30  ;;  %v8429_v60 = vld [vmem:[#allocation10 + $0xe0] sm:$0xf0]  ;;  %v8419_v30 = vld [vmem:[#allocation10 + $0x90] sm:$0xf0] }
 0x204   :  { %5038 = vmatpush.bf16.msra.mxu1 %v7432_v20  ;;  %5029 = vmatpush.bf16.msra.mxu0 %v7192_v53  ;;  %v6776_v53 = vor.u32 %v8429_v60, %v6775_v49  ;;  %v8404_v49 = vld [vmem:[#allocation10 + $0x18] sm:$0xf0] }
 0x205   :  { %5054 = vmatpush.bf16.msrb.mxu2 %v7532_v57  ;;  %v2541_v20 = vmax.f32 %v2479_v11, 0.0  ;;  %v8666_v57 = vld [vmem:[#allocation10 + $0x84c] sm:$0xf]  ;;  %v8651_v11 = vld [vmem:[#allocation10 + $0x7d4] sm:$0xf] }
 0x206   :  { %v2454_v28 = vpop.f32.mrf.mxu1  ;;  %v7732_v35 = vor.u32 %v8666_v57, %v7729_v39  ;;  %v6675_v39 = vld [vmem:[#allocation10 + $0x8] sm:$0xf] }
 0x207   :  { %v9164_v32 = vpack.c.bf16 %v2541_v20, %v2541_v20  ;;  %v6716_v28 = vor.u32 %v8414_v15, %v6715_v14  ;;  %v8559_v14 = vld [vmem:[#allocation10 + $0x4f0] sm:$0xf0] }
 0x208   :  { %5039 = vmatpush.bf16.msra.mxu1 %v7412_v24  ;;  %5030 = vmatpush.bf16.msra.mxu0 %v7172_v4  ;;  %v8434_v24 = vld [vmem:[#allocation10 + $0x108] sm:$0xf0]  ;;  %v6735_v4 = vld [vmem:[#allocation10 + $0x80] sm:$0xf] }
 0x209   :  { %5055 = vmatpush.bf16.msrb.mxu2 %v7512_v55  ;;  %4967 = vmatmul.bf16.vlgmr.msrb.gmra.mxu3 %v9164_v32  ;;  %v6796_v45 = vor.u32 %v8434_v24, %v6795_v26  ;;  %v7709_v55 = vld [vmem:[#allocation10 + $0x834] sm:$0xf0]  ;;  %v6736_v10 = vor.u32 %v8419_v30, %v6735_v4  ;;  %v8711_v30 = vld [vmem:[#allocation10 + $0x9b4] sm:$0xf] }
 0x20a   :  { %5063 = vmatpush.bf16.msrb.mxu3 %v7772_v22  ;;  %v7712_v62 = vor.u32 %v8661_v54, %v7709_v55  ;;  %v8646_v22 = vld [vmem:[#allocation10 + $0x7ac] sm:$0xf]  ;;  %v7455_v54 = vld [vmem:[#allocation10 + $0x620] sm:$0xf]  ;;  %v8599_v55 = vld [vmem:[#allocation10 + $0x630] sm:$0xf0]  ;;  %v7912_v15 = vor.u32 %v8711_v30, %v7909_v9 }
 0x20b   :  { %v7652_v42 = vor.u32 %v8646_v22, %v7649_v31  ;;  %v7456_v4 = vor.u32 %v8599_v55, %v7455_v54  ;;  %v7415_v22 = vld [vmem:[#allocation10 + $0x5d0] sm:$0xf] }
 0x20c   :  { %5040 = vmatpush.bf16.msra.mxu1 %v7392_v50  ;;  %5031 = vmatpush.bf16.msra.mxu0 %v7152_v46  ;;  %v2491_v50 = vpop.f32.mrf.mxu0  ;;  %v8009_v46 = vld [vmem:[#allocation10 + $0xa8c] sm:$0xf0] }
 0x20d   :  { %5056 = vmatpush.bf16.msrb.mxu2 %v7492_v5  ;;  %v2492_v20 = vadd.f32 %v8774_v44, %v2491_v50  ;;  %v8012_v24 = vor.u32 %v8736_v19, %v8009_v46  ;;  %v7435_v44 = vld [vmem:[#allocation10 + $0x5f8] sm:$0xf]  ;;  %v6935_v19 = vld [vmem:[#allocation10 + $0x210] sm:$0xf]  ;;  %v8469_v46 = vld [vmem:[#allocation10 + $0x220] sm:$0xf0] }
 0x20e   :  { %5064 = vmatpush.bf16.msrb.mxu3 %v7752_v43  ;;  %v7849_v55 = vld [vmem:[#allocation10 + $0x94c] sm:$0xf0] }
 0x210   :  { %5041 = vmatpush.bf16.msra.mxu1 %v7372_v0  ;;  %v8049_v0 = vld [vmem:[#allocation10 + $0xadc] sm:$0xf0] }
 0x211   :  { %5057 = vmatpush.bf16.msrb.mxu2 %v7472_v21  ;;  %v8052_v17 = vor.u32 %v8746_v61, %v8049_v0  ;;  %v8726_v61 = vld [vmem:[#allocation10 + $0xa2c] sm:$0xf]  ;;  %v7969_v0 = vld [vmem:[#allocation10 + $0xa3c] sm:$0xf0] }
 0x212   :  { %5065 = vmatpush.bf16.msrb.mxu3 %v7732_v35  ;;  %v8479_v35 = vld [vmem:[#allocation10 + $0x270] sm:$0xf0]  ;;  %v7972_v6 = vor.u32 %v8726_v61, %v7969_v0 }
 0x214   :  { %5042 = vmatpush.bf16.msra.mxu1 %v7352_v23  ;;  %5058 = vmatmul.bf16.vlgmr.msrb.gmra.mxu2 %v9153_v25  ;;  %v2493_v5 = vpop.f32.mrf.mxu0  ;;  %v7669_v23 = vld [vmem:[#allocation10 + $0x7e4] sm:$0xf0] }
 0x215   :  { %5102 = vmatpush.bf16.msra.mxu2 %v6816_v29  ;;  %v7672_v21 = vor.u32 %v8651_v11, %v7669_v23  ;;  %v6955_v5 = vld [vmem:[#allocation10 + $0x238] sm:$0xf]  ;;  %v7295_v23 = vld [vmem:[#allocation10 + $0x4e0] sm:$0xf] }
 0x216   :  { %5066 = vmatpush.bf16.msrb.mxu3 %v7712_v62  ;;  %v7949_v11 = vld [vmem:[#allocation10 + $0xa14] sm:$0xf0]  ;;  %v7296_v31 = vor.u32 %v8559_v14, %v7295_v23  ;;  %v7215_v14 = vld [vmem:[#allocation10 + $0x440] sm:$0xf] }
 0x217   :  { %v2517_v12 = vpop.f32.mrf.mxu2 }
 0x218   :  { %5043 = vmatpush.bf16.msra.mxu1 %v7332_v33  ;;  %v6695_v33 = vld [vmem:[#allocation10 + $0x30] sm:$0xf] }
 0x219   :  { %5103 = vmatpush.bf16.msra.mxu2 %v6796_v45  ;;  %v2530_v16 = vpop.f32.mrf.mxu3  ;;  %5019 = vmatmul.bf16.vlgmr.msra.gmra.mxu3 %v9127_v7  ;;  %v6696_v43 = vor.u32 %v8409_v34, %v6695_v33  ;;  %v8641_v45 = vld [vmem:[#allocation10 + $0x784] sm:$0xf]  ;;  %v6936_v33 = vor.u32 %v8469_v46, %v6935_v19  ;;  %v7275_v34 = vld [vmem:[#allocation10 + $0x4b8] sm:$0xf]  ;;  %v8686_v46 = vld [vmem:[#allocation10 + $0x8ec] sm:$0xf] }
 0x21a   :  { %5067 = vmatpush.bf16.msrb.mxu3 %v7692_v18  ;;  %v8594_v18 = vld [vmem:[#allocation10 + $0x608] sm:$0xf0] }
 0x21c   :  { %5044 = vmatpush.bf16.msra.mxu1 %v7312_v47  ;;  %v7629_v47 = vld [vmem:[#allocation10 + $0x794] sm:$0xf0] }
 0x21d   :  { %5104 = vmatpush.bf16.msra.mxu2 %v6776_v53  ;;  %v7929_v53 = vld [vmem:[#allocation10 + $0x9ec] sm:$0xf0]  ;;  %v7632_v58 = vor.u32 %v8641_v45, %v7629_v47  ;;  %v7395_v45 = vld [vmem:[#allocation10 + $0x5a8] sm:$0xf] }
 0x21e   :  { %v2504_v29 = vpop.f32.mrf.mxu1  ;;  %5068 = vmatpush.bf16.msrb.mxu3 %v7672_v21  ;;  %v7932_v2 = vor.u32 %v8716_v27, %v7929_v53  ;;  %v8459_v53 = vld [vmem:[#allocation10 + $0x1d0] sm:$0xf0] }
 0x21f   :  { %5045 = vmatmul.bf16.vlgmr.msra.gmra.mxu1 %v9148_v48  ;;  %v2505_v26 = vadd.f32 %v2504_v29, %v2492_v20  ;;  %v2519_v57 = vpop.f32.mrf.mxu2  ;;  %v8589_v29 = vld [vmem:[#allocation10 + $0x5e0] sm:$0xf0] }
 0x220   :  { %5089 = vmatpush.bf16.msrb.mxu1 %v8092_v3  ;;  %v7992_v3 = vor.u32 %v8731_v36, %v7989_v38  ;;  %v7416_v36 = vor.u32 %v8589_v29, %v7415_v22  ;;  %v8701_v38 = vld [vmem:[#allocation10 + $0x964] sm:$0xf]  ;;  %v8584_v57 = vld [vmem:[#allocation10 + $0x5b8] sm:$0xf0]  ;;  %v7809_v29 = vld [vmem:[#allocation10 + $0x8fc] sm:$0xf0] }
 0x221   :  { %5105 = vmatpush.bf16.msra.mxu2 %v6756_v63  ;;  %v2518_v40 = vadd.f32 %v2517_v12, %v2505_v26  ;;  %v2532_v50 = vpop.f32.mrf.mxu3  ;;  %v6976_v63 = vor.u32 %v8479_v35, %v6975_v52  ;;  %v8554_v26 = vld [vmem:[#allocation10 + $0x4c8] sm:$0xf0]  ;;  %v7396_v27 = vor.u32 %v8584_v57, %v7395_v45  ;;  %v8696_v52 = vld [vmem:[#allocation10 + $0x93c] sm:$0xf]  ;;  %v6895_v35 = vld [vmem:[#allocation10 + $0x1c0] sm:$0xf] }
 0x222   :  { %5069 = vmatpush.bf16.msrb.mxu3 %v7652_v42  ;;  %v8464_v42 = vld [vmem:[#allocation10 + $0x1f8] sm:$0xf0]  ;;  %v7276_v47 = vor.u32 %v8554_v26, %v7275_v34  ;;  %v8549_v50 = vld [vmem:[#allocation10 + $0x4a0] sm:$0xf0]  ;;  %v6896_v0 = vor.u32 %v8459_v53, %v6895_v35  ;;  %v7789_v45 = vld [vmem:[#allocation10 + $0x8d4] sm:$0xf0] }
 0x223   :  { %v2531_v60 = vadd.f32 %v2530_v16, %v2518_v40  ;;  %v7436_v16 = vor.u32 %v8594_v18, %v7435_v44  ;;  %v6915_v40 = vld [vmem:[#allocation10 + $0x1e8] sm:$0xf]  ;;  %v7355_v18 = vld [vmem:[#allocation10 + $0x558] sm:$0xf]  ;;  %v8519_v35 = vld [vmem:[#allocation10 + $0x3b0] sm:$0xf0] }
 0x224   :  { %5090 = vmatpush.bf16.msrb.mxu1 %v8072_v59  ;;  %v6676_v59 = vor.u32 %v8404_v49, %v6675_v39  ;;  %v9177_v39 = vld [vmem:[#allocation12] sm:$0x1f]  ;;  %v6916_v49 = vor.u32 %v8464_v42, %v6915_v40  ;;  %v7829_v44 = vld [vmem:[#allocation10 + $0x924] sm:$0xf0]  ;;  %v7812_v42 = vor.u32 %v8686_v46, %v7809_v29 }
 0x225   :  { %5106 = vmatpush.bf16.msra.mxu2 %v6736_v10  ;;  %v2542_v8 = vmax.f32 %v2531_v60, 0.0  ;;  %v8721_v10 = vld [vmem:[#allocation10 + $0xa04] sm:$0xf]  ;;  %v7255_v60 = vld [vmem:[#allocation10 + $0x490] sm:$0xf]  ;;  %v2986_v61 = vperm.slane %v9177_v39, 0 }
 0x226   :  { %v2506_v62 = vpop.f32.mrf.mxu1  ;;  %5070 = vmatpush.bf16.msrb.mxu3 %v7632_v58  ;;  %v7952_v21 = vor.u32 %v8721_v10, %v7949_v11  ;;  %v8579_v58 = vld [vmem:[#allocation10 + $0x590] sm:$0xf0]  ;;  %v8574_v10 = vld [vmem:[#allocation10 + $0x568] sm:$0xf0]  ;;  %v6835_v57 = vld [vmem:[#allocation10 + $0x148] sm:$0xf] }
 0x227   :  { %v9170_v1 = vpack.c.bf16 %v2542_v8, %v2542_v8  ;;  %v7375_v8 = vld [vmem:[#allocation10 + $0x580] sm:$0xf]  ;;  %v7235_v62 = vld [vmem:[#allocation10 + $0x468] sm:$0xf]  ;;  %v7356_v19 = vor.u32 %v8574_v10, %v7355_v18  ;;  %v8075_v18 = vld [vmem:[#allocation10 + $0xaf8] sm:$0xf] }
 0x228   :  { %5091 = vmatpush.bf16.msrb.mxu1 %v8052_v17  ;;  %v8474_v17 = vld [vmem:[#allocation10 + $0x248] sm:$0xf0]  ;;  %v7376_v30 = vor.u32 %v8579_v58, %v7375_v8  ;;  %v7615_v53 = vld [vmem:[#allocation10 + $0x760] sm:$0xf]  ;;  %v8759_v58 = vld [vmem:[#allocation10 + $0xb30] sm:$0xf0] }
 0x229   :  { %5107 = vmatpush.bf16.msra.mxu2 %v6716_v28  ;;  %4980 = vmatmul.bf16.vlgmr.msrb.gmra.mxu0 %v9170_v1  ;;  %v6956_v12 = vor.u32 %v8474_v17, %v6955_v5  ;;  %v7889_v28 = vld [vmem:[#allocation10 + $0x99c] sm:$0xf0]  ;;  %v8691_v5 = vld [vmem:[#allocation10 + $0x914] sm:$0xf]  ;;  %v6875_v17 = vld [vmem:[#allocation10 + $0x198] sm:$0xf] }
 0x22a   :  { %5115 = vmatpush.bf16.msra.mxu3 %v6976_v63  ;;  %5076 = vmatpush.bf16.msrb.mxu0 %v7932_v2  ;;  %v8544_v63 = vld [vmem:[#allocation10 + $0x478] sm:$0xf0]  ;;  %v8095_v8 = vld [vmem:[#allocation10 + $0xb20] sm:$0xf]  ;;  %v8754_v10 = vld [vmem:[#allocation10 + $0xb08] sm:$0xf0] }
 0x22b   :  { %v9173_v20 = vpop.f32.mrf.mxu0  ;;  %5071 = vmatmul.bf16.vlgmr.msrb.gmra.mxu3 %v9158_v41  ;;  %v7236_v11 = vor.u32 %v8544_v63, %v7235_v62  ;;  %v7175_v62 = vld [vmem:[#allocation10 + $0x3f0] sm:$0xf]  ;;  %v8529_v63 = vld [vmem:[#allocation10 + $0x400] sm:$0xf0]  ;;  %v8076_v46 = vor.u32 %v8754_v10, %v8075_v18  ;;  %v8734_v18 = vld [vmem:[#allocation10 + $0xa68] sm:$0xf0] }
 0x22c   :  { %5092 = vmatpush.bf16.msrb.mxu1 %v8032_v37  ;;  %v8706_v37 = vld [vmem:[#allocation10 + $0x98c] sm:$0xf] }
 0x22d   :  { %5108 = vmatpush.bf16.msra.mxu2 %v6696_v43  ;;  %v7869_v43 = vld [vmem:[#allocation10 + $0x974] sm:$0xf0] }
 0x22e   :  { %5116 = vmatpush.bf16.msra.mxu3 %v6956_v12  ;;  %5077 = vmatpush.bf16.msrb.mxu0 %v7912_v15  ;;  %v4878_v12 = vadd.f32 %v9173_v20, %v2986_v61  ;;  %v8539_v15 = vld [vmem:[#allocation10 + $0x450] sm:$0xf0] }
 0x22f   :  { %v7216_v20 = vor.u32 %v8539_v15, %v7215_v14  ;;  %v7935_v15 = vld [vmem:[#allocation10 + $0x9e0] sm:$0xf] }
 0x230   :  { %5093 = vmatpush.bf16.msrb.mxu1 %v8012_v24  ;;  %v7892_v24 = vor.u32 %v8706_v37, %v7889_v28  ;;  %v7832_v37 = vor.u32 %v8691_v5, %v7829_v44  ;;  %v8449_v28 = vld [vmem:[#allocation10 + $0x180] sm:$0xf0]  ;;  %v8096_v5 = vor.u32 %v8759_v58, %v8095_v8  ;;  %v7176_v44 = vor.u32 %v8529_v63, %v7175_v62  ;;  %v7535_v8 = vld [vmem:[#allocation10 + $0x6c0] sm:$0xf]  ;;  %v8619_v58 = vld [vmem:[#allocation10 + $0x6d0] sm:$0xf0] }
 0x231   :  { %5109 = vmatpush.bf16.msra.mxu2 %v6676_v59  ;;  %v7256_v59 = vor.u32 %v8549_v50, %v7255_v60  ;;  %v7315_v60 = vld [vmem:[#allocation10 + $0x508] sm:$0xf]  ;;  %v8564_v50 = vld [vmem:[#allocation10 + $0x518] sm:$0xf0]  ;;  %v7536_v63 = vor.u32 %v8619_v58, %v7535_v8  ;;  %v7815_v8 = vld [vmem:[#allocation10 + $0x8f0] sm:$0xf] }
 0x232   :  { %5117 = vmatpush.bf16.msra.mxu3 %v6936_v33  ;;  %5078 = vmatpush.bf16.msrb.mxu0 %v7892_v24  ;;  %v8569_v33 = vld [vmem:[#allocation10 + $0x540] sm:$0xf0]  ;;  %v7195_v24 = vld [vmem:[#allocation10 + $0x418] sm:$0xf] }
 0x233   :  { %v4879_v54 = vpop.f32.mrf.mxu0  ;;  %v8689_v58 = vld [vmem:[#allocation10 + $0x900] sm:$0xf0] }
 0x234   :  { %5094 = vmatpush.bf16.msrb.mxu1 %v7992_v3  ;;  %5110 = vmatmul.bf16.vlgmr.msra.gmra.mxu2 %v9123_v51  ;;  %v7872_v3 = vor.u32 %v8701_v38, %v7869_v43  ;;  %v8681_v38 = vld [vmem:[#allocation10 + $0x8c4] sm:$0xf]  ;;  %v8639_v54 = vld [vmem:[#allocation10 + $0x770] sm:$0xf0] }
 0x235   :  { %5154 = vmatpush.bf16.msrb.mxu2 %v7456_v4  ;;  %v7852_v4 = vor.u32 %v8696_v52, %v7849_v55  ;;  %v7792_v61 = vor.u32 %v8681_v38, %v7789_v45  ;;  %v8714_v38 = vld [vmem:[#allocation10 + $0x9c8] sm:$0xf0]  ;;  %v7555_v45 = vld [vmem:[#allocation10 + $0x6e8] sm:$0xf] }
 0x236   :  { %5118 = vmatpush.bf16.msra.mxu3 %v6916_v49  ;;  %5079 = vmatpush.bf16.msrb.mxu0 %v7872_v3  ;;  %v7135_v3 = vld [vmem:[#allocation10 + $0x3a0] sm:$0xf] }
 0x237   :  { %v4903_v2 = vpop.f32.mrf.mxu2 }
 0x238   :  { %5095 = vmatpush.bf16.msrb.mxu1 %v7972_v6  ;;  %v8454_v6 = vld [vmem:[#allocation10 + $0x1a8] sm:$0xf0] }
 0x239   :  { %5155 = vmatpush.bf16.msrb.mxu2 %v7436_v16  ;;  %v4916_v9 = vpop.f32.mrf.mxu3  ;;  %5032 = vmatmul.bf16.vlgmr.msra.gmra.mxu0 %v9132_v13  ;;  %v6876_v23 = vor.u32 %v8454_v6, %v6875_v17  ;;  %v8514_v17 = vld [vmem:[#allocation10 + $0x388] sm:$0xf0]  ;;  %v7595_v6 = vld [vmem:[#allocation10 + $0x738] sm:$0xf] }
 0x23a   :  { %5119 = vmatpush.bf16.msra.mxu3 %v6896_v0  ;;  %5080 = vmatpush.bf16.msrb.mxu0 %v7852_v4  ;;  %v7316_v0 = vor.u32 %v8564_v50, %v7315_v60  ;;  %v7616_v4 = vor.u32 %v8639_v54, %v7615_v53 }
 0x23c   :  { %5096 = vmatpush.bf16.msrb.mxu1 %v7952_v21  ;;  %v6855_v21 = vld [vmem:[#allocation10 + $0x170] sm:$0xf] }
 0x23d   :  { %5156 = vmatpush.bf16.msrb.mxu2 %v7416_v36  ;;  %v6856_v26 = vor.u32 %v8449_v28, %v6855_v21  ;;  %v8534_v36 = vld [vmem:[#allocation10 + $0x428] sm:$0xf0]  ;;  %v8509_v21 = vld [vmem:[#allocation10 + $0x360] sm:$0xf0]  ;;  %v7575_v28 = vld [vmem:[#allocation10 + $0x710] sm:$0xf] }
 0x23e   :  { %v4890_v16 = vpop.f32.mrf.mxu1  ;;  %5120 = vmatpush.bf16.msra.mxu3 %v6876_v23  ;;  %5081 = vmatpush.bf16.msrb.mxu0 %v7832_v37  ;;  %v7196_v52 = vor.u32 %v8534_v36, %v7195_v24  ;;  %v7095_v37 = vld [vmem:[#allocation10 + $0x350] sm:$0xf]  ;;  %v7915_v36 = vld [vmem:[#allocation10 + $0x9b8] sm:$0xf] }
 0x23f   :  { %5097 = vmatmul.bf16.vlgmr.msrb.gmra.mxu1 %v9170_v1  ;;  %v4891_v22 = vadd.f32 %v4890_v16, %v4878_v12  ;;  %v4905_v40 = vpop.f32.mrf.mxu2  ;;  %v8524_v12 = vld [vmem:[#allocation10 + $0x3d8] sm:$0xf0]  ;;  %v8719_v16 = vld [vmem:[#allocation10 + $0x9f0] sm:$0xf0]  ;;  %v7916_v60 = vor.u32 %v8714_v38, %v7915_v36  ;;  %v6995_v36 = vld [vmem:[#allocation10 + $0x288] sm:$0xf] }
 0x240   :  { %5141 = vmatpush.bf16.msra.mxu1 %v7296_v31  ;;  %v7335_v31 = vld [vmem:[#allocation10 + $0x530] sm:$0xf]  ;;  %v7075_v40 = vld [vmem:[#allocation10 + $0x328] sm:$0xf]  ;;  %v8484_v38 = vld [vmem:[#allocation10 + $0x298] sm:$0xf0] }
 0x241   :  { %5157 = vmatpush.bf16.msrb.mxu2 %v7396_v27  ;;  %v4904_v34 = vadd.f32 %v4903_v2, %v4891_v22  ;;  %v7336_v43 = vor.u32 %v8569_v33, %v7335_v31  ;;  %v4918_v49 = vpop.f32.mrf.mxu3  ;;  %v7136_v2 = vor.u32 %v8519_v35, %v7135_v3  ;;  %v8629_v22 = vld [vmem:[#allocation10 + $0x720] sm:$0xf0]  ;;  %v8055_v33 = vld [vmem:[#allocation10 + $0xad0] sm:$0xf]  ;;  %v7055_v35 = vld [vmem:[#allocation10 + $0x300] sm:$0xf] }
 0x242   :  { %5121 = vmatpush.bf16.msra.mxu3 %v6856_v26  ;;  %5082 = vmatpush.bf16.msrb.mxu0 %v7812_v42  ;;  %v7096_v26 = vor.u32 %v8509_v21, %v7095_v37  ;;  %v7576_v24 = vor.u32 %v8629_v22, %v7575_v28  ;;  %v8744_v49 = vld [vmem:[#allocation10 + $0xab8] sm:$0xf0]  ;;  %v7495_v21 = vld [vmem:[#allocation10 + $0x670] sm:$0xf]  ;;  %v8609_v28 = vld [vmem:[#allocation10 + $0x680] sm:$0xf0] }
 0x243   :  { %v4917_v27 = vadd.f32 %v4916_v9, %v4904_v34  ;;  %v8634_v9 = vld [vmem:[#allocation10 + $0x748] sm:$0xf0]  ;;  %v7936_v34 = vor.u32 %v8719_v16, %v7935_v15  ;;  %v8699_v15 = vld [vmem:[#allocation10 + $0x950] sm:$0xf0]  ;;  %v7015_v16 = vld [vmem:[#allocation10 + $0x2b0] sm:$0xf] }
 0x244   :  { %5142 = vmatpush.bf16.msra.mxu1 %v7276_v47  ;;  %v8444_v47 = vld [vmem:[#allocation10 + $0x158] sm:$0xf0]  ;;  %v7596_v14 = vor.u32 %v8634_v9, %v7595_v6  ;;  %v7515_v6 = vld [vmem:[#allocation10 + $0x698] sm:$0xf]  ;;  %v8614_v9 = vld [vmem:[#allocation10 + $0x6a8] sm:$0xf0] }
 0x245   :  { %5158 = vmatpush.bf16.msrb.mxu2 %v7376_v30  ;;  %v6836_v55 = vor.u32 %v8444_v47, %v6835_v57  ;;  %v7115_v30 = vld [vmem:[#allocation10 + $0x378] sm:$0xf]  ;;  %v8624_v57 = vld [vmem:[#allocation10 + $0x6f8] sm:$0xf0]  ;;  %v8035_v47 = vld [vmem:[#allocation10 + $0xaa8] sm:$0xf] }
 0x246   :  { %5083 = vmatpush.bf16.msrb.mxu0 %v7792_v61  ;;  %v7116_v23 = vor.u32 %v8514_v17, %v7115_v30  ;;  %v7556_v3 = vor.u32 %v8624_v57, %v7555_v45  ;;  %v8036_v54 = vor.u32 %v8744_v49, %v8035_v47  ;;  %v8739_v61 = vld [vmem:[#allocation10 + $0xa90] sm:$0xf0]  ;;  %v7035_v30 = vld [vmem:[#allocation10 + $0x2d8] sm:$0xf]  ;;  %v8494_v17 = vld [vmem:[#allocation10 + $0x2e8] sm:$0xf0] }
 0x247   :  { %5122 = vmatpush.bf16.msra.mxu3 %v6836_v55  ;;  %v8499_v55 = vld [vmem:[#allocation10 + $0x310] sm:$0xf0]  ;;  %v7975_v22 = vld [vmem:[#allocation10 + $0xa30] sm:$0xf]  ;;  %v8724_v45 = vld [vmem:[#allocation10 + $0xa18] sm:$0xf0] }
 0x248   :  { %5143 = vmatpush.bf16.msra.mxu1 %v7256_v59  ;;  %v4892_v59 = vpop.f32.mrf.mxu1  ;;  %v7056_v62 = vor.u32 %v8499_v55, %v7055_v35  ;;  %v7775_v57 = vld [vmem:[#allocation10 + $0x8a0] sm:$0xf]  ;;  %v8679_v47 = vld [vmem:[#allocation10 + $0x8b0] sm:$0xf0]  ;;  %v8437_v49 = vld [vmem:[#allocation10 + $0x124] sm:$0xf]  ;;  %v6996_v35 = vor.u32 %v8484_v38, %v6995_v36 }
 0x249   :  { %5159 = vmatpush.bf16.msrb.mxu2 %v7356_v19  ;;  %5084 = vmatmul.bf16.vlgmr.msrb.gmra.mxu0 %v9164_v32  ;;  %v8015_v59 = vld [vmem:[#allocation10 + $0xa80] sm:$0xf]  ;;  %v7776_v55 = vor.u32 %v8679_v47, %v7775_v57  ;;  %v8542_v38 = vld [vmem:[#allocation10 + $0x46c] sm:$0xf] }
 0x24a   :  { %5128 = vmatpush.bf16.msra.mxu0 %v7136_v2  ;;  %5123 = vmatmul.bf16.vlgmr.msra.gmra.mxu3 %v9141_v56  ;;  %v7875_v2 = vld [vmem:[#allocation10 + $0x968] sm:$0xf]  ;;  %v6757_v36 = vld [vmem:[#allocation10 + $0xbc] sm:$0xf0] }
 0x24b   :  { %5167 = vmatpush.bf16.msrb.mxu3 %v7616_v4  ;;  %v4929_v19 = vpop.f32.mrf.mxu0  ;;  %v8704_v4 = vld [vmem:[#allocation10 + $0x978] sm:$0xf0] }
 0x24c   :  { %5144 = vmatpush.bf16.msra.mxu1 %v7236_v11  ;;  %v7155_v11 = vld [vmem:[#allocation10 + $0x3c8] sm:$0xf]  ;;  %v9184_v29 = vadd.f32 %v4929_v19, %v4917_v27  ;;  %v7895_v27 = vld [vmem:[#allocation10 + $0x990] sm:$0xf]  ;;  %v7876_v10 = vor.u32 %v8704_v4, %v7875_v2  ;;  %v8552_v4 = vld [vmem:[#allocation10 + $0x4bc] sm:$0xf] }
 0x24d   :  { %5160 = vmatpush.bf16.msrb.mxu2 %v7336_v43  ;;  %v7156_v31 = vor.u32 %v8524_v12, %v7155_v11  ;;  %v8504_v43 = vld [vmem:[#allocation10 + $0x338] sm:$0xf0]  ;;  %v7036_v12 = vor.u32 %v8494_v17, %v7035_v30  ;;  %v6797_v2 = vld [vmem:[#allocation10 + $0x10c] sm:$0xf0]  ;;  %v7795_v17 = vld [vmem:[#allocation10 + $0x8c8] sm:$0xf] }
 0x24e   :  { %5129 = vmatpush.bf16.msra.mxu0 %v7116_v23  ;;  %v7076_v50 = vor.u32 %v8504_v43, %v7075_v40  ;;  %v7516_v23 = vor.u32 %v8614_v9, %v7515_v6  ;;  %v7475_v40 = vld [vmem:[#allocation10 + $0x648] sm:$0xf]  ;;  %v7277_v30 = vld [vmem:[#allocation10 + $0x4cc] sm:$0xf0]  ;;  %v8684_v9 = vld [vmem:[#allocation10 + $0x8d8] sm:$0xf0] }
 0x24f   :  { %5168 = vmatpush.bf16.msrb.mxu3 %v7596_v14  ;;  %v7855_v14 = vld [vmem:[#allocation10 + $0x940] sm:$0xf]  ;;  %v7955_v43 = vld [vmem:[#allocation10 + $0xa08] sm:$0xf] }
 0x250   :  { %5145 = vmatpush.bf16.msra.mxu1 %v7216_v20  ;;  %v8749_v20 = vld [vmem:[#allocation10 + $0xae0] sm:$0xf0] }
 0x251   :  { %5161 = vmatpush.bf16.msrb.mxu2 %v7316_v0  ;;  %v8056_v42 = vor.u32 %v8749_v20, %v8055_v33  ;;  %v7856_v33 = vor.u32 %v8699_v15, %v7855_v14  ;;  %v7835_v20 = vld [vmem:[#allocation10 + $0x918] sm:$0xf]  ;;  %v8427_v14 = vld [vmem:[#allocation10 + $0xd4] sm:$0xf]  ;;  %v6777_v15 = vld [vmem:[#allocation10 + $0xe4] sm:$0xf0] }
 0x252   :  { %5130 = vmatpush.bf16.msra.mxu0 %v7096_v26 }
 0x253   :  { %5169 = vmatpush.bf16.msrb.mxu3 %v7576_v24  ;;  %v4931_v53 = vpop.f32.mrf.mxu0  ;;  %v7496_v24 = vor.u32 %v8609_v28, %v7495_v21 }
 0x254   :  { %5146 = vmatpush.bf16.msra.mxu1 %v7196_v52  ;;  %5162 = vmatmul.bf16.vlgmr.msrb.gmra.mxu2 %v9148_v48  ;;  %v8709_v52 = vld [vmem:[#allocation10 + $0x9a0] sm:$0xf0] }
 0x255   :  { %5206 = vmatpush.bf16.msra.mxu2 %v8096_v5  ;;  %v7896_v0 = vor.u32 %v8709_v52, %v7895_v27  ;;  %v8016_v5 = vor.u32 %v8739_v61, %v8015_v59  ;;  %v7297_v27 = vld [vmem:[#allocation10 + $0x4f4] sm:$0xf0] }
 0x256   :  { %5131 = vmatpush.bf16.msra.mxu0 %v7076_v50  ;;  %v6817_v50 = vld [vmem:[#allocation10 + $0x134] sm:$0xf0] }
 0x257   :  { %5170 = vmatpush.bf16.msrb.mxu3 %v7556_v3  ;;  %v8557_v3 = vld [vmem:[#allocation10 + $0x4e4] sm:$0xf]  ;;  %v6820_v59 = vor.u32 %v8437_v49, %v6817_v50  ;;  %v7695_v49 = vld [vmem:[#allocation10 + $0x800] sm:$0xf] }
 0x258   :  { %5147 = vmatpush.bf16.msra.mxu1 %v7176_v44  ;;  %v7995_v44 = vld [vmem:[#allocation10 + $0xa58] sm:$0xf]  ;;  %v7300_v61 = vor.u32 %v8557_v3, %v7297_v27  ;;  %v8417_v50 = vld [vmem:[#allocation10 + $0x84] sm:$0xf] }
 0x259   :  { %5207 = vmatpush.bf16.msra.mxu2 %v8076_v46  ;;  %v7996_v19 = vor.u32 %v8734_v18, %v7995_v44  ;;  %v8489_v46 = vld [vmem:[#allocation10 + $0x2c0] sm:$0xf0]  ;;  %v7137_v18 = vld [vmem:[#allocation10 + $0x3b4] sm:$0xf0] }
 0x25a   :  { %5132 = vmatpush.bf16.msra.mxu0 %v7056_v62  ;;  %v7016_v26 = vor.u32 %v8489_v46, %v7015_v16  ;;  %v8674_v62 = vld [vmem:[#allocation10 + $0x888] sm:$0xf0]  ;;  %v8517_v44 = vld [vmem:[#allocation10 + $0x3a4] sm:$0xf]  ;;  %v8547_v16 = vld [vmem:[#allocation10 + $0x494] sm:$0xf]  ;;  %v7796_v46 = vor.u32 %v8684_v9, %v7795_v17 }
 0x25b   :  { %5171 = vmatpush.bf16.msrb.mxu3 %v7536_v63  ;;  %v8432_v63 = vld [vmem:[#allocation10 + $0xfc] sm:$0xf]  ;;  %v7140_v21 = vor.u32 %v8517_v44, %v7137_v18  ;;  %v6737_v3 = vld [vmem:[#allocation10 + $0x94] sm:$0xf0]  ;;  %v8537_v27 = vld [vmem:[#allocation10 + $0x444] sm:$0xf] }
 0x25c   :  { %5148 = vmatpush.bf16.msra.mxu1 %v7156_v31  ;;  %v4942_v11 = vpop.f32.mrf.mxu1  ;;  %v8729_v31 = vld [vmem:[#allocation10 + $0xa40] sm:$0xf0]  ;;  %v7057_v44 = vld [vmem:[#allocation10 + $0x314] sm:$0xf0] }
 0x25d   :  { %5208 = vmatpush.bf16.msra.mxu2 %v8056_v42  ;;  %v9190_v37 = vadd.f32 %v4942_v11, %v9184_v29  ;;  %v7976_v29 = vor.u32 %v8729_v31, %v7975_v22  ;;  %v8604_v42 = vld [vmem:[#allocation10 + $0x658] sm:$0xf0]  ;;  %v7280_v11 = vor.u32 %v8552_v4, %v7277_v30  ;;  %v7117_v31 = vld [vmem:[#allocation10 + $0x38c] sm:$0xf0]  ;;  %v8497_v9 = vld [vmem:[#allocation10 + $0x304] sm:$0xf] }
 0x25e   :  { %5133 = vmatpush.bf16.msra.mxu0 %v7036_v12  ;;  %v7476_v53 = vor.u32 %v8604_v42, %v7475_v40  ;;  %v7735_v12 = vld [vmem:[#allocation10 + $0x850] sm:$0xf]  ;;  %v8512_v22 = vld [vmem:[#allocation10 + $0x37c] sm:$0xf]  ;;  %v7237_v40 = vld [vmem:[#allocation10 + $0x47c] sm:$0xf0] }
 0x25f   :  { %5149 = vmatmul.bf16.vlgmr.msra.gmra.mxu1 %v9132_v13  ;;  %5172 = vmatpush.bf16.msrb.mxu3 %v7516_v23  ;;  %v8669_v23 = vld [vmem:[#allocation10 + $0x860] sm:$0xf0]  ;;  %v7240_v47 = vor.u32 %v8542_v38, %v7237_v40  ;;  %v8532_v4 = vld [vmem:[#allocation10 + $0x41c] sm:$0xf]  ;;  %v7197_v30 = vld [vmem:[#allocation10 + $0x42c] sm:$0xf0] }
 0x260   :  { %5193 = vmatpush.bf16.msrb.mxu1 %v7936_v34  ;;  %v8694_v34 = vld [vmem:[#allocation10 + $0x928] sm:$0xf0]  ;;  %v7736_v28 = vor.u32 %v8669_v23, %v7735_v12  ;;  %v8649_v12 = vld [vmem:[#allocation10 + $0x7c0] sm:$0xf0]  ;;  %v8407_v23 = vld [vmem:[#allocation10 + $0x34] sm:$0xf] }
 0x261   :  { %5209 = vmatpush.bf16.msra.mxu2 %v8036_v54  ;;  %v7956_v54 = vor.u32 %v8724_v45, %v7955_v43  ;;  %v8507_v43 = vld [vmem:[#allocation10 + $0x354] sm:$0xf]  ;;  %v7097_v45 = vld [vmem:[#allocation10 + $0x364] sm:$0xf0]  ;;  %v8477_v38 = vld [vmem:[#allocation10 + $0x264] sm:$0xf] }
 0x262   :  { %5134 = vmatpush.bf16.msra.mxu0 %v7016_v26  ;;  %v8664_v26 = vld [vmem:[#allocation10 + $0x838] sm:$0xf0]  ;;  %v6977_v40 = vld [vmem:[#allocation10 + $0x274] sm:$0xf0] }
 0x263   :  { %5173 = vmatpush.bf16.msrb.mxu3 %v7496_v24  ;;  %v8422_v24 = vld [vmem:[#allocation10 + $0xac] sm:$0xf] }
 0x264   :  { %5194 = vmatpush.bf16.msrb.mxu1 %v7916_v60  ;;  %v7836_v60 = vor.u32 %v8694_v34, %v7835_v20  ;;  %v4944_v52 = vpop.f32.mrf.mxu1  ;;  %v7715_v34 = vld [vmem:[#allocation10 + $0x828] sm:$0xf]  ;;  %v6760_v57 = vor.u32 %v8422_v24, %v6757_v36  ;;  %v8522_v24 = vld [vmem:[#allocation10 + $0x3cc] sm:$0xf]  ;;  %v7157_v36 = vld [vmem:[#allocation10 + $0x3dc] sm:$0xf0] }
 0x265   :  { %5210 = vmatpush.bf16.msra.mxu2 %v8016_v5  ;;  %v7816_v5 = vor.u32 %v8689_v58, %v7815_v8  ;;  %v7716_v42 = vor.u32 %v8664_v26, %v7715_v34  ;;  %v7217_v52 = vld [vmem:[#allocation10 + $0x454] sm:$0xf0]  ;;  %v6740_v58 = vor.u32 %v8417_v50, %v6737_v3  ;;  %v8402_v34 = vld [vmem:[#allocation10 + $0xc] sm:$0xf]  ;;  %v6677_v26 = vld [vmem:[#allocation10 + $0x1c] sm:$0xf0]  ;;  %v7160_v3 = vor.u32 %v8522_v24, %v7157_v36 }
 0x266   :  { %5135 = vmatpush.bf16.msra.mxu0 %v6996_v35  ;;  %v7100_v35 = vor.u32 %v8507_v43, %v7097_v45  ;;  %v2987_v43 = vperm.slane %v9177_v39, 1  ;;  %v6680_v50 = vor.u32 %v8402_v34, %v6677_v26  ;;  %v7437_v39 = vld [vmem:[#allocation10 + $0x60c] sm:$0xf0]  ;;  %v7397_v34 = vld [vmem:[#allocation10 + $0x5bc] sm:$0xf0] }
 0x267   :  { %5174 = vmatpush.bf16.msrb.mxu3 %v7476_v53  ;;  %v8702_v26 = vld [vmem:[#allocation10 + $0x96c] sm:$0xf]  ;;  %v7877_v24 = vld [vmem:[#allocation10 + $0x97c] sm:$0xf0] }
 0x268   :  { %5195 = vmatpush.bf16.msrb.mxu1 %v7896_v0  ;;  %v7755_v0 = vld [vmem:[#allocation10 + $0x878] sm:$0xf] }
 0x269   :  { %5211 = vmatpush.bf16.msra.mxu2 %v7996_v19  ;;  %v7756_v6 = vor.u32 %v8674_v62, %v7755_v0  ;;  %5136 = vmatmul.bf16.vlgmr.msra.gmra.mxu0 %v9127_v7  ;;  %v7257_v19 = vld [vmem:[#allocation10 + $0x4a4] sm:$0xf0]  ;;  %v8654_v0 = vld [vmem:[#allocation10 + $0x7e8] sm:$0xf0]  ;;  %v8412_v62 = vld [vmem:[#allocation10 + $0x5c] sm:$0xf] }
 0x26a   :  { %5180 = vmatpush.bf16.msrb.mxu0 %v7776_v55  ;;  %5175 = vmatmul.bf16.vlgmr.msrb.gmra.mxu3 %v9153_v25  ;;  %v7260_v20 = vor.u32 %v8547_v16, %v7257_v19  ;;  %v7077_v55 = vld [vmem:[#allocation10 + $0x33c] sm:$0xf0]  ;;  %v7060_v16 = vor.u32 %v8497_v9, %v7057_v44  ;;  %v8677_v44 = vld [vmem:[#allocation10 + $0x8a4] sm:$0xf] }
 0x26b   :  { %5219 = vmatpush.bf16.msra.mxu3 %v6820_v59  ;;  %v7220_v59 = vor.u32 %v8537_v27, %v7217_v52  ;;  %v8487_v27 = vld [vmem:[#allocation10 + $0x2b4] sm:$0xf]  ;;  %v7017_v52 = vld [vmem:[#allocation10 + $0x2c4] sm:$0xf0] }
 0x26c   :  { %5196 = vmatpush.bf16.msrb.mxu1 %v7876_v10  ;;  %v6800_v10 = vor.u32 %v8432_v63, %v6797_v2  ;;  %v6717_v2 = vld [vmem:[#allocation10 + $0x6c] sm:$0xf0] }
 0x26d   :  { %5212 = vmatpush.bf16.msra.mxu2 %v7976_v29  ;;  %v7120_v29 = vor.u32 %v8512_v22, %v7117_v31  ;;  %v4955_v8 = vpop.f32.mrf.mxu2  ;;  %v6720_v18 = vor.u32 %v8412_v62, %v6717_v2  ;;  %v7917_v62 = vld [vmem:[#allocation10 + $0x9cc] sm:$0xf0] }
 0x26e   :  { %5181 = vmatpush.bf16.msrb.mxu0 %v7756_v6  ;;  %v9197_v63 = vadd.f32 %v4955_v8, %v9190_v37  ;;  %v8527_v37 = vld [vmem:[#allocation10 + $0x3f4] sm:$0xf]  ;;  %v6957_v8 = vld [vmem:[#allocation10 + $0x24c] sm:$0xf0] }
 0x26f   :  { %5220 = vmatpush.bf16.msra.mxu3 %v6800_v10  ;;  %v7200_v10 = vor.u32 %v8532_v4, %v7197_v30  ;;  %v8482_v4 = vld [vmem:[#allocation10 + $0x28c] sm:$0xf]  ;;  %v6997_v30 = vld [vmem:[#allocation10 + $0x29c] sm:$0xf0] }
 0x270   :  { %5197 = vmatpush.bf16.msrb.mxu1 %v7856_v33  ;;  %v6780_v33 = vor.u32 %v8427_v14, %v6777_v15  ;;  %v6697_v14 = vld [vmem:[#allocation10 + $0x44] sm:$0xf0] }
 0x271   :  { %5213 = vmatpush.bf16.msra.mxu2 %v7956_v54  ;;  %v8502_v54 = vld [vmem:[#allocation10 + $0x32c] sm:$0xf]  ;;  %v7177_v15 = vld [vmem:[#allocation10 + $0x404] sm:$0xf0]  ;;  %v6700_v31 = vor.u32 %v8407_v23, %v6697_v14  ;;  %v7000_v14 = vor.u32 %v8482_v4, %v6997_v30 }
 0x272   :  { %5182 = vmatpush.bf16.msrb.mxu0 %v7736_v28  ;;  %v7080_v17 = vor.u32 %v8502_v54, %v7077_v55  ;;  %v7635_v28 = vld [vmem:[#allocation10 + $0x788] sm:$0xf]  ;;  %v8472_v54 = vld [vmem:[#allocation10 + $0x23c] sm:$0xf] }
 0x273   :  { %5221 = vmatpush.bf16.msra.mxu3 %v6780_v33  ;;  %v7180_v33 = vor.u32 %v8527_v37, %v7177_v15  ;;  %v7417_v23 = vld [vmem:[#allocation10 + $0x5e4] sm:$0xf0]  ;;  %v8707_v37 = vld [vmem:[#allocation10 + $0x994] sm:$0xf] }
 0x274   :  { %5198 = vmatpush.bf16.msrb.mxu1 %v7836_v60  ;;  %5214 = vmatmul.bf16.vlgmr.msra.gmra.mxu2 %v9170_v1  ;;  %v8659_v60 = vld [vmem:[#allocation10 + $0x810] sm:$0xf0]  ;;  %v7897_v15 = vld [vmem:[#allocation10 + $0x9a4] sm:$0xf0] }
 0x275   :  { %5258 = vmatpush.bf16.msrb.mxu2 %v7300_v61  ;;  %v7696_v53 = vor.u32 %v8659_v60, %v7695_v49  ;;  %v7675_v61 = vld [vmem:[#allocation10 + $0x7d8] sm:$0xf]  ;;  %v4957_v22 = vpop.f32.mrf.mxu2  ;;  %v8717_v49 = vld [vmem:[#allocation10 + $0x9e4] sm:$0xf] }
 0x276   :  { %5183 = vmatpush.bf16.msrb.mxu0 %v7716_v42  ;;  %v7676_v6 = vor.u32 %v8654_v0, %v7675_v61  ;;  %v7457_v42 = vld [vmem:[#allocation10 + $0x634] sm:$0xf0]  ;;  %v7020_v61 = vor.u32 %v8487_v27, %v7017_v52  ;;  %v8712_v0 = vld [vmem:[#allocation10 + $0x9bc] sm:$0xf]  ;;  %v8462_v22 = vld [vmem:[#allocation10 + $0x1ec] sm:$0xf] }
 0x277   :  { %5222 = vmatpush.bf16.msra.mxu3 %v6760_v57  ;;  %v7937_v60 = vld [vmem:[#allocation10 + $0x9f4] sm:$0xf0] }
 0x278   :  { %5199 = vmatpush.bf16.msrb.mxu1 %v7816_v5  ;;  %v7940_v55 = vor.u32 %v8717_v49, %v7937_v60  ;;  %v8577_v49 = vld [vmem:[#allocation10 + $0x584] sm:$0xf]  ;;  %v7377_v60 = vld [vmem:[#allocation10 + $0x594] sm:$0xf0] }
 0x279   :  { %5259 = vmatpush.bf16.msrb.mxu2 %v7280_v11  ;;  %v7655_v11 = vld [vmem:[#allocation10 + $0x7b0] sm:$0xf] }
 0x27a   :  { %5184 = vmatpush.bf16.msrb.mxu0 %v7696_v53  ;;  %v7656_v19 = vor.u32 %v8649_v12, %v7655_v11  ;;  %v6937_v11 = vld [vmem:[#allocation10 + $0x224] sm:$0xf0]  ;;  %v8587_v12 = vld [vmem:[#allocation10 + $0x5d4] sm:$0xf] }
 0x27b   :  { %5223 = vmatpush.bf16.msra.mxu3 %v6740_v58  ;;  %v8592_v58 = vld [vmem:[#allocation10 + $0x5fc] sm:$0xf] }
 0x27c   :  { %5200 = vmatpush.bf16.msrb.mxu1 %v7796_v46  ;;  %v4994_v5 = vpop.f32.mrf.mxu1  ;;  %v8492_v46 = vld [vmem:[#allocation10 + $0x2dc] sm:$0xf]  ;;  %v7440_v9 = vor.u32 %v8592_v58, %v7437_v39 }
 0x27d   :  { %5260 = vmatpush.bf16.msrb.mxu2 %v7260_v20  ;;  %v8644_v20 = vld [vmem:[#allocation10 + $0x798] sm:$0xf0]  ;;  %v5007_v2 = vpop.f32.mrf.mxu2 }
 0x27e   :  { %5185 = vmatpush.bf16.msrb.mxu0 %v7676_v6  ;;  %v6960_v6 = vor.u32 %v8472_v54, %v6957_v8  ;;  %v8662_v54 = vld [vmem:[#allocation10 + $0x82c] sm:$0xf]  ;;  %v8452_v8 = vld [vmem:[#allocation10 + $0x19c] sm:$0xf] }
 0x27f   :  { %5201 = vmatmul.bf16.vlgmr.msrb.gmra.mxu1 %v9164_v32  ;;  %5224 = vmatpush.bf16.msra.mxu3 %v6720_v18  ;;  %v7777_v18 = vld [vmem:[#allocation10 + $0x8b4] sm:$0xf0] }
 0x280   :  { %5245 = vmatpush.bf16.msra.mxu1 %v7140_v21  ;;  %v7037_v21 = vld [vmem:[#allocation10 + $0x2ec] sm:$0xf0] }
 0x281   :  { %5261 = vmatpush.bf16.msrb.mxu2 %v7240_v47  ;;  %v7040_v57 = vor.u32 %v8492_v46, %v7037_v21  ;;  %v7636_v47 = vor.u32 %v8644_v20, %v7635_v28  ;;  %v7420_v46 = vor.u32 %v8587_v12, %v7417_v23  ;;  %v8672_v21 = vld [vmem:[#allocation10 + $0x87c] sm:$0xf]  ;;  %v7757_v28 = vld [vmem:[#allocation10 + $0x88c] sm:$0xf0]  ;;  %v8582_v20 = vld [vmem:[#allocation10 + $0x5ac] sm:$0xf] }
 0x282   :  { %5186 = vmatpush.bf16.msrb.mxu0 %v7656_v19  ;;  %v8567_v12 = vld [vmem:[#allocation10 + $0x534] sm:$0xf]  ;;  %v7337_v23 = vld [vmem:[#allocation10 + $0x544] sm:$0xf0] }
 0x283   :  { %5225 = vmatpush.bf16.msra.mxu3 %v6700_v31  ;;  %v7900_v31 = vor.u32 %v8707_v37, %v7897_v15  ;;  %v7817_v37 = vld [vmem:[#allocation10 + $0x904] sm:$0xf0] }
 0x284   :  { %5246 = vmatpush.bf16.msra.mxu1 %v7120_v29  ;;  %v8597_v29 = vld [vmem:[#allocation10 + $0x624] sm:$0xf]  ;;  %v4996_v45 = vpop.f32.mrf.mxu1 }
 0x285   :  { %5262 = vmatpush.bf16.msrb.mxu2 %v7220_v59  ;;  %v7460_v53 = vor.u32 %v8597_v29, %v7457_v42  ;;  %v4995_v59 = vadd.f32 %v4994_v5, %v2987_v43  ;;  %v7920_v5 = vor.u32 %v8712_v0, %v7917_v62  ;;  %v5009_v36 = vpop.f32.mrf.mxu2  ;;  %v7400_v29 = vor.u32 %v8582_v20, %v7397_v34  ;;  %v8667_v42 = vld [vmem:[#allocation10 + $0x854] sm:$0xf]  ;;  %v7737_v43 = vld [vmem:[#allocation10 + $0x864] sm:$0xf0]  ;;  %v8457_v45 = vld [vmem:[#allocation10 + $0x1c4] sm:$0xf] }
 0x286   :  { %5187 = vmatpush.bf16.msrb.mxu0 %v7636_v47  ;;  %v6897_v47 = vld [vmem:[#allocation10 + $0x1d4] sm:$0xf0]  ;;  %v7740_v27 = vor.u32 %v8667_v42, %v7737_v43  ;;  %v7357_v0 = vld [vmem:[#allocation10 + $0x56c] sm:$0xf0]  ;;  %v8692_v62 = vld [vmem:[#allocation10 + $0x91c] sm:$0xf] }
 0x287   :  { %5226 = vmatpush.bf16.msra.mxu3 %v6680_v50  ;;  %v8697_v50 = vld [vmem:[#allocation10 + $0x944] sm:$0xf]  ;;  %v7317_v34 = vld [vmem:[#allocation10 + $0x51c] sm:$0xf0]  ;;  %v8097_v43 = vld [vmem:[#allocation10 + $0xb34] sm:$0xf0] }
 0x288   :  { %5247 = vmatpush.bf16.msra.mxu1 %v7100_v35  ;;  %v6980_v35 = vor.u32 %v8477_v38, %v6977_v40  ;;  %v7760_v38 = vor.u32 %v8672_v21, %v7757_v28  ;;  %v7340_v28 = vor.u32 %v8567_v12, %v7337_v23  ;;  %v8637_v36 = vld [vmem:[#allocation10 + $0x764] sm:$0xf]  ;;  %v7577_v12 = vld [vmem:[#allocation10 + $0x724] sm:$0xf0]  ;;  %v8747_v23 = vld [vmem:[#allocation10 + $0xad4] sm:$0xf] }
 0x289   :  { %5263 = vmatpush.bf16.msrb.mxu2 %v7200_v10  ;;  %v8467_v10 = vld [vmem:[#allocation10 + $0x214] sm:$0xf]  ;;  %5188 = vmatmul.bf16.vlgmr.msrb.gmra.mxu0 %v9158_v41 }
 0x28a   :  { %5232 = vmatpush.bf16.msra.mxu0 %v6980_v35  ;;  %5227 = vmatmul.bf16.vlgmr.msra.gmra.mxu3 %v9123_v51  ;;  %v6940_v19 = vor.u32 %v8467_v10, %v6937_v11  ;;  %v6900_v35 = vor.u32 %v8457_v45, %v6897_v47  ;;  %v7697_v10 = vld [vmem:[#allocation10 + $0x814] sm:$0xf0]  ;;  %v6857_v11 = vld [vmem:[#allocation10 + $0x184] sm:$0xf0] }
 0x28b   :  { %5271 = vmatpush.bf16.msrb.mxu3 %v7460_v53  ;;  %v7380_v53 = vor.u32 %v8577_v49, %v7377_v60  ;;  %v7143_v45 = vld [vmem:[#allocation10 + $0x3a8] sm:$0xf] }
 0x28c   :  { %5248 = vmatpush.bf16.msra.mxu1 %v7080_v17  ;;  %v9200_v17 = vadd.f32 %v5007_v2, %v4995_v59  ;;  %v4968_v52 = vpop.f32.mrf.mxu3  ;;  %v6877_v59 = vld [vmem:[#allocation10 + $0x1ac] sm:$0xf0] }
 0x28d   :  { %5264 = vmatpush.bf16.msrb.mxu2 %v7180_v33  ;;  %v6917_v33 = vld [vmem:[#allocation10 + $0x1fc] sm:$0xf0]  ;;  %v9207_v58 = vadd.f32 %v4968_v52, %v9197_v63  ;;  %v7837_v2 = vld [vmem:[#allocation10 + $0x92c] sm:$0xf0]  ;;  %v8447_v63 = vld [vmem:[#allocation10 + $0x174] sm:$0xf] }
 0x28e   :  { %5233 = vmatpush.bf16.msra.mxu0 %v6960_v6  ;;  %v6920_v40 = vor.u32 %v8462_v22, %v6917_v33  ;;  %v6860_v21 = vor.u32 %v8447_v63, %v6857_v11  ;;  %v8442_v22 = vld [vmem:[#allocation10 + $0x14c] sm:$0xf]  ;;  %v7657_v52 = vld [vmem:[#allocation10 + $0x7c4] sm:$0xf0]  ;;  %v8627_v11 = vld [vmem:[#allocation10 + $0x714] sm:$0xf] }
 0x28f   :  { %5272 = vmatpush.bf16.msrb.mxu3 %v7440_v9  ;;  %v6880_v9 = vor.u32 %v8452_v8, %v6877_v59  ;;  %v8562_v33 = vld [vmem:[#allocation10 + $0x50c] sm:$0xf]  ;;  %v8752_v8 = vld [vmem:[#allocation10 + $0xafc] sm:$0xf]  ;;  %v7123_v59 = vld [vmem:[#allocation10 + $0x380] sm:$0xf] }
 0x290   :  { %5249 = vmatpush.bf16.msra.mxu1 %v7060_v16  ;;  %v7780_v16 = vor.u32 %v8677_v44, %v7777_v18  ;;  %v8657_v18 = vld [vmem:[#allocation10 + $0x804] sm:$0xf]  ;;  %v7320_v60 = vor.u32 %v8562_v33, %v7317_v34  ;;  %v7557_v33 = vld [vmem:[#allocation10 + $0x6fc] sm:$0xf0] }
 0x291   :  { %5265 = vmatpush.bf16.msrb.mxu2 %v7160_v3  ;;  %v7857_v3 = vld [vmem:[#allocation10 + $0x954] sm:$0xf0]  ;;  %v7700_v15 = vor.u32 %v8657_v18, %v7697_v10  ;;  %v6983_v18 = vld [vmem:[#allocation10 + $0x268] sm:$0xf]  ;;  %v8480_v10 = vld [vmem:[#allocation10 + $0x278] sm:$0xf0] }
 0x292   :  { %5234 = vmatpush.bf16.msra.mxu0 %v6940_v19  ;;  %v7860_v39 = vor.u32 %v8697_v50, %v7857_v3  ;;  %v7677_v19 = vld [vmem:[#allocation10 + $0x7ec] sm:$0xf0]  ;;  %v8037_v34 = vld [vmem:[#allocation10 + $0xabc] sm:$0xf0] }
 0x293   :  { %5273 = vmatpush.bf16.msrb.mxu3 %v7420_v46 }
 0x294   :  { %5250 = vmatpush.bf16.msra.mxu1 %v7040_v57  ;;  %5266 = vmatmul.bf16.vlgmr.msrb.gmra.mxu2 %v9132_v13  ;;  %v7880_v57 = vor.u32 %v8702_v26, %v7877_v24  ;;  %v4970_v46 = vpop.f32.mrf.mxu3  ;;  %v8682_v26 = vld [vmem:[#allocation10 + $0x8cc] sm:$0xf]  ;;  %v7797_v24 = vld [vmem:[#allocation10 + $0x8dc] sm:$0xf0] }
 0x295   :  { %5310 = vmatpush.bf16.msra.mxu2 %v7940_v55  ;;  %v7717_v55 = vld [vmem:[#allocation10 + $0x83c] sm:$0xf0]  ;;  %v7800_v50 = vor.u32 %v8682_v26, %v7797_v24  ;;  %v7083_v26 = vld [vmem:[#allocation10 + $0x330] sm:$0xf]  ;;  %v8505_v24 = vld [vmem:[#allocation10 + $0x340] sm:$0xf0] }
 0x296   :  { %5235 = vmatpush.bf16.msra.mxu0 %v6920_v40  ;;  %v7720_v30 = vor.u32 %v8662_v54, %v7717_v55  ;;  %v8757_v40 = vld [vmem:[#allocation10 + $0xb24] sm:$0xf]  ;;  %v8632_v54 = vld [vmem:[#allocation10 + $0x73c] sm:$0xf]  ;;  %v7597_v55 = vld [vmem:[#allocation10 + $0x74c] sm:$0xf0] }
 0x297   :  { %5274 = vmatpush.bf16.msrb.mxu3 %v7400_v29  ;;  %v9209_v4 = vpop.f32.mrf.mxu2  ;;  %v6963_v46 = vld [vmem:[#allocation10 + $0x240] sm:$0xf] }
 0x298   :  { %5251 = vmatpush.bf16.msra.mxu1 %v7020_v61  ;;  %v8572_v61 = vld [vmem:[#allocation10 + $0x55c] sm:$0xf] }
 0x299   :  { %5311 = vmatpush.bf16.msra.mxu2 %v7920_v5  ;;  %v7360_v44 = vor.u32 %v8572_v61, %v7357_v0  ;;  %v7840_v5 = vor.u32 %v8692_v62, %v7837_v2  ;;  %v8515_v61 = vld [vmem:[#allocation10 + $0x390] sm:$0xf0]  ;;  %v8642_v2 = vld [vmem:[#allocation10 + $0x78c] sm:$0xf] }
 0x29a   :  { %5236 = vmatpush.bf16.msra.mxu0 %v6900_v35  ;;  %v8100_v35 = vor.u32 %v8757_v40, %v8097_v43  ;;  %v6943_v43 = vld [vmem:[#allocation10 + $0x218] sm:$0xf] }
 0x29b   :  { %5275 = vmatpush.bf16.msrb.mxu3 %v7380_v53 }
 0x29c   :  { %5252 = vmatpush.bf16.msra.mxu1 %v7000_v14  ;;  %v9211_v6 = vpop.f32.mrf.mxu1  ;;  %v8687_v14 = vld [vmem:[#allocation10 + $0x8f4] sm:$0xf]  ;;  %v5020_v0 = vpop.f32.mrf.mxu3 }
 0x29d   :  { %5312 = vmatpush.bf16.msra.mxu2 %v7900_v31  ;;  %v6837_v31 = vld [vmem:[#allocation10 + $0x15c] sm:$0xf0]  ;;  %v7820_v20 = vor.u32 %v8687_v14, %v7817_v37  ;;  %v8057_v14 = vld [vmem:[#allocation10 + $0xae4] sm:$0xf0]  ;;  %v7103_v37 = vld [vmem:[#allocation10 + $0x358] sm:$0xf] }
 0x29e   :  { %5237 = vmatpush.bf16.msra.mxu0 %v6880_v9  ;;  %v6840_v49 = vor.u32 %v8442_v22, %v6837_v31  ;;  %v7600_v9 = vor.u32 %v8632_v54, %v7597_v55  ;;  %v8622_v31 = vld [vmem:[#allocation10 + $0x6ec] sm:$0xf]  ;;  %v8465_v54 = vld [vmem:[#allocation10 + $0x200] sm:$0xf0] }
 0x29f   :  { %5253 = vmatmul.bf16.vlgmr.msra.gmra.mxu1 %v9127_v7  ;;  %5276 = vmatpush.bf16.msrb.mxu3 %v7360_v44  ;;  %v5061_v29 = vpop.f32.mrf.mxu2  ;;  %v7637_v44 = vld [vmem:[#allocation10 + $0x79c] sm:$0xf0] }
 0x2a0   :  { %5297 = vmatpush.bf16.msrb.mxu1 %v7780_v16  ;;  %v8652_v16 = vld [vmem:[#allocation10 + $0x7dc] sm:$0xf] }
 0x2a1   :  { %5313 = vmatpush.bf16.msra.mxu2 %v7880_v57  ;;  %v7680_v42 = vor.u32 %v8652_v16, %v7677_v19  ;;  %v8520_v57 = vld [vmem:[#allocation10 + $0x3b8] sm:$0xf0]  ;;  %v6984_v16 = vor.u32 %v8480_v10, %v6983_v18  ;;  %v7580_v19 = vor.u32 %v8627_v11, %v7577_v12 }
 0x2a2   :  { %5238 = vmatpush.bf16.msra.mxu0 %v6860_v21  ;;  %v7144_v53 = vor.u32 %v8520_v57, %v7143_v45  ;;  %v8475_v21 = vld [vmem:[#allocation10 + $0x250] sm:$0xf0]  ;;  %v8470_v45 = vld [vmem:[#allocation10 + $0x228] sm:$0xf0]  ;;  %v8460_v11 = vld [vmem:[#allocation10 + $0x1d8] sm:$0xf0] }
 0x2a3   :  { %5277 = vmatpush.bf16.msrb.mxu3 %v7340_v28  ;;  %v8060_v28 = vor.u32 %v8747_v23, %v8057_v14  ;;  %v6964_v29 = vor.u32 %v8475_v21, %v6963_v46  ;;  %v8490_v46 = vld [vmem:[#allocation10 + $0x2c8] sm:$0xf0] }
 0x2a4   :  { %5298 = vmatpush.bf16.msrb.mxu1 %v7760_v38  ;;  %v7617_v38 = vld [vmem:[#allocation10 + $0x774] sm:$0xf0]  ;;  %v5048_v47 = vpop.f32.mrf.mxu1 }
 0x2a5   :  { %5314 = vmatpush.bf16.msra.mxu2 %v7860_v39  ;;  %v7620_v3 = vor.u32 %v8637_v36, %v7617_v38  ;;  %v8077_v39 = vld [vmem:[#allocation10 + $0xb0c] sm:$0xf0]  ;;  %v5022_v38 = vpop.f32.mrf.mxu3  ;;  %v7084_v47 = vor.u32 %v8505_v24, %v7083_v26  ;;  %v7477_v26 = vld [vmem:[#allocation10 + $0x65c] sm:$0xf0]  ;;  %v8722_v24 = vld [vmem:[#allocation10 + $0xa0c] sm:$0xf] }
 0x2a6   :  { %5239 = vmatpush.bf16.msra.mxu0 %v6840_v49  ;;  %v8080_v63 = vor.u32 %v8752_v8, %v8077_v39  ;;  %v4981_v36 = vpop.f32.mrf.mxu0  ;;  %v8617_v49 = vld [vmem:[#allocation10 + $0x6c4] sm:$0xf]  ;;  %v8612_v39 = vld [vmem:[#allocation10 + $0x69c] sm:$0xf]  ;;  %v7003_v38 = vld [vmem:[#allocation10 + $0x290] sm:$0xf] }
 0x2a7   :  { %5278 = vmatpush.bf16.msrb.mxu3 %v7320_v60  ;;  %v9220_v40 = vadd.f32 %v4981_v36, %v9207_v58  ;;  %v7537_v60 = vld [vmem:[#allocation10 + $0x6d4] sm:$0xf0]  ;;  %v6944_v58 = vor.u32 %v8470_v45, %v6943_v43  ;;  %v7957_v36 = vld [vmem:[#allocation10 + $0xa1c] sm:$0xf0] }
 0x2a8   :  { %5299 = vmatpush.bf16.msrb.mxu1 %v7740_v27  ;;  %v8647_v27 = vld [vmem:[#allocation10 + $0x7b4] sm:$0xf] }
 0x2a9   :  { %5315 = vmatpush.bf16.msra.mxu2 %v7840_v5  ;;  %v7660_v62 = vor.u32 %v8647_v27, %v7657_v52  ;;  %v7124_v5 = vor.u32 %v8515_v61, %v7123_v59  ;;  %5240 = vmatmul.bf16.vlgmr.msra.gmra.mxu0 %v9141_v56  ;;  %v7063_v27 = vld [vmem:[#allocation10 + $0x308] sm:$0xf]  ;;  %v8500_v52 = vld [vmem:[#allocation10 + $0x318] sm:$0xf0]  ;;  %v7517_v59 = vld [vmem:[#allocation10 + $0x6ac] sm:$0xf0] }
 0x2aa   :  { %5284 = vmatpush.bf16.msrb.mxu0 %v7620_v3  ;;  %5279 = vmatmul.bf16.vlgmr.msrb.gmra.mxu3 %v9148_v48  ;;  %v8017_v3 = vld [vmem:[#allocation10 + $0xa94] sm:$0xf0]  ;;  %v7064_v8 = vor.u32 %v8500_v52, %v7063_v27  ;;  %v8732_v61 = vld [vmem:[#allocation10 + $0xa5c] sm:$0xf]  ;;  %v7783_v52 = vld [vmem:[#allocation10 + $0x8a8] sm:$0xf] }
 0x2ab   :  { %5323 = vmatpush.bf16.msra.mxu3 %v8100_v35  ;;  %v7540_v35 = vor.u32 %v8617_v49, %v7537_v60  ;;  %v8560_v49 = vld [vmem:[#allocation10 + $0x4f8] sm:$0xf0] }
 0x2ac   :  { %5300 = vmatpush.bf16.msrb.mxu1 %v7720_v30  ;;  %v9214_v30 = vadd.f32 %v5020_v0, %v9200_v17  ;;  %v7640_v17 = vor.u32 %v8642_v2, %v7637_v44  ;;  %v7997_v0 = vld [vmem:[#allocation10 + $0xa6c] sm:$0xf0]  ;;  %v8495_v2 = vld [vmem:[#allocation10 + $0x2f0] sm:$0xf0] }
 0x2ad   :  { %5316 = vmatpush.bf16.msra.mxu2 %v7820_v20  ;;  %v8742_v20 = vld [vmem:[#allocation10 + $0xaac] sm:$0xf]  ;;  %v8000_v23 = vor.u32 %v8732_v61, %v7997_v0  ;;  %v6803_v0 = vld [vmem:[#allocation10 + $0x100] sm:$0xf] }
 0x2ae   :  { %5285 = vmatpush.bf16.msrb.mxu0 %v7600_v9  ;;  %v8040_v57 = vor.u32 %v8742_v20, %v8037_v34  ;;  %v4983_v9 = vpop.f32.mrf.mxu0  ;;  %v9225_v18 = vpop.f32.mrf.mxu3 }
 0x2af   :  { %5324 = vmatpush.bf16.msra.mxu3 %v8080_v63  ;;  %v7520_v63 = vor.u32 %v8612_v39, %v7517_v59  ;;  %v8555_v9 = vld [vmem:[#allocation10 + $0x4d0] sm:$0xf0] }
 0x2b0   :  { %5301 = vmatpush.bf16.msrb.mxu1 %v7700_v15  ;;  %v8510_v15 = vld [vmem:[#allocation10 + $0x368] sm:$0xf0] }
 0x2b1   :  { %5317 = vmatpush.bf16.msra.mxu2 %v7800_v50  ;;  %v7104_v22 = vor.u32 %v8510_v15, %v7103_v37  ;;  %v8737_v50 = vld [vmem:[#allocation10 + $0xa84] sm:$0xf]  ;;  %v8607_v37 = vld [vmem:[#allocation10 + $0x674] sm:$0xf]  ;;  %v7497_v15 = vld [vmem:[#allocation10 + $0x684] sm:$0xf0] }
 0x2b2   :  { %5286 = vmatpush.bf16.msrb.mxu0 %v7580_v19  ;;  %v8020_v55 = vor.u32 %v8737_v50, %v8017_v3  ;;  %v7023_v19 = vld [vmem:[#allocation10 + $0x2b8] sm:$0xf] }
 0x2b3   :  { %5325 = vmatpush.bf16.msra.mxu3 %v8060_v28  ;;  %v7500_v28 = vor.u32 %v8607_v37, %v7497_v15  ;;  %v7024_v34 = vor.u32 %v8490_v46, %v7023_v19  ;;  %v7623_v15 = vld [vmem:[#allocation10 + $0x768] sm:$0xf] }
 0x2b4   :  { %5302 = vmatpush.bf16.msrb.mxu1 %v7680_v42  ;;  %5318 = vmatmul.bf16.vlgmr.msra.gmra.mxu2 %v9164_v32  ;;  %v7560_v42 = vor.u32 %v8622_v31, %v7557_v33  ;;  %v8455_v31 = vld [vmem:[#allocation10 + $0x1b0] sm:$0xf0]  ;;  %v8602_v33 = vld [vmem:[#allocation10 + $0x64c] sm:$0xf] }
 0x2b5   :  { %5362 = vmatpush.bf16.msrb.mxu2 %v7144_v53  ;;  %v6923_v53 = vld [vmem:[#allocation10 + $0x1f0] sm:$0xf]  ;;  %v7480_v27 = vor.u32 %v8602_v33, %v7477_v26  ;;  %v7743_v33 = vld [vmem:[#allocation10 + $0x858] sm:$0xf] }
 0x2b6   :  { %5287 = vmatpush.bf16.msrb.mxu0 %v7560_v42  ;;  %v6924_v10 = vor.u32 %v8465_v54, %v6923_v53  ;;  %v6823_v42 = vld [vmem:[#allocation10 + $0x128] sm:$0xf]  ;;  %v5033_v43 = vpop.f32.mrf.mxu0  ;;  %v5074_v50 = vpop.f32.mrf.mxu3  ;;  %v7960_v53 = vor.u32 %v8722_v24, %v7957_v36  ;;  %v7603_v24 = vld [vmem:[#allocation10 + $0x740] sm:$0xf]  ;;  %v8635_v36 = vld [vmem:[#allocation10 + $0x750] sm:$0xf0] }
 0x2b7   :  { %5326 = vmatpush.bf16.msra.mxu3 %v8040_v57  ;;  %v9223_v44 = vpop.f32.mrf.mxu2  ;;  %v8440_v57 = vld [vmem:[#allocation10 + $0x138] sm:$0xf0]  ;;  %v5034_v60 = vadd.f32 %v5033_v43, %v9214_v30  ;;  %v7283_v30 = vld [vmem:[#allocation10 + $0x4c0] sm:$0xf]  ;;  %v7243_v43 = vld [vmem:[#allocation10 + $0x470] sm:$0xf] }
 0x2b8   :  { %5303 = vmatpush.bf16.msrb.mxu1 %v7660_v62  ;;  %v7043_v62 = vld [vmem:[#allocation10 + $0x2e0] sm:$0xf]  ;;  %v6824_v59 = vor.u32 %v8440_v57, %v6823_v42  ;;  %v7284_v37 = vor.u32 %v8555_v9, %v7283_v30  ;;  %v8425_v42 = vld [vmem:[#allocation10 + $0xc0] sm:$0xf0]  ;;  %v7723_v57 = vld [vmem:[#allocation10 + $0x830] sm:$0xf] }
 0x2b9   :  { %5363 = vmatpush.bf16.msrb.mxu2 %v7124_v5  ;;  %v6903_v5 = vld [vmem:[#allocation10 + $0x1c8] sm:$0xf]  ;;  %v7044_v14 = vor.u32 %v8495_v2, %v7043_v62  ;;  %v5047_v39 = vadd.f32 %v9211_v6, %v5034_v60  ;;  %v8435_v2 = vld [vmem:[#allocation10 + $0x110] sm:$0xf0]  ;;  %v7604_v60 = vor.u32 %v8635_v36, %v7603_v24  ;;  %v7563_v30 = vld [vmem:[#allocation10 + $0x6f0] sm:$0xf] }
 0x2ba   :  { %5288 = vmatpush.bf16.msrb.mxu0 %v7540_v35  ;;  %v6904_v21 = vor.u32 %v8460_v11, %v6903_v5  ;;  %v8675_v5 = vld [vmem:[#allocation10 + $0x890] sm:$0xf0]  ;;  %v6804_v6 = vor.u32 %v8435_v2, %v6803_v0  ;;  %v8625_v9 = vld [vmem:[#allocation10 + $0x700] sm:$0xf0]  ;;  %v7663_v24 = vld [vmem:[#allocation10 + $0x7b8] sm:$0xf] }
 0x2bb   :  { %5327 = vmatpush.bf16.msra.mxu3 %v8020_v55  ;;  %v6863_v55 = vld [vmem:[#allocation10 + $0x178] sm:$0xf]  ;;  %v5060_v11 = vadd.f32 %v9209_v4, %v5047_v39  ;;  %v7703_v39 = vld [vmem:[#allocation10 + $0x808] sm:$0xf]  ;;  %v8650_v36 = vld [vmem:[#allocation10 + $0x7c8] sm:$0xf0] }
 0x2bc   :  { %5304 = vmatpush.bf16.msrb.mxu1 %v7640_v17  ;;  %v9227_v12 = vpop.f32.mrf.mxu1  ;;  %v8727_v17 = vld [vmem:[#allocation10 + $0xa34] sm:$0xf]  ;;  %v7263_v4 = vld [vmem:[#allocation10 + $0x498] sm:$0xf] }
 0x2bd   :  { %5364 = vmatpush.bf16.msrb.mxu2 %v7104_v22  ;;  %v6883_v22 = vld [vmem:[#allocation10 + $0x1a0] sm:$0xf]  ;;  %v5073_v19 = vadd.f32 %v9225_v18, %v5060_v11  ;;  %v8415_v11 = vld [vmem:[#allocation10 + $0x70] sm:$0xf0] }
 0x2be   :  { %5289 = vmatpush.bf16.msrb.mxu0 %v7520_v63  ;;  %v6884_v3 = vor.u32 %v8455_v31, %v6883_v22  ;;  %v7763_v63 = vld [vmem:[#allocation10 + $0x880] sm:$0xf]  ;;  %v5035_v46 = vpop.f32.mrf.mxu0  ;;  %v8550_v22 = vld [vmem:[#allocation10 + $0x4a8] sm:$0xf0] }
 0x2bf   :  { %5305 = vmatmul.bf16.vlgmr.msrb.gmra.mxu1 %v9158_v41  ;;  %5328 = vmatpush.bf16.msra.mxu3 %v8000_v23  ;;  %v5113_v45 = vpop.f32.mrf.mxu2  ;;  %v6843_v23 = vld [vmem:[#allocation10 + $0x150] sm:$0xf]  ;;  %v7264_v26 = vor.u32 %v8550_v22, %v7263_v4  ;;  %v7564_v46 = vor.u32 %v8625_v9, %v7563_v30  ;;  %v8620_v4 = vld [vmem:[#allocation10 + $0x6d8] sm:$0xf0]  ;;  %v6703_v22 = vld [vmem:[#allocation10 + $0x38] sm:$0xf] }
 0x2c0   :  { %5349 = vmatpush.bf16.msra.mxu1 %v6984_v16  ;;  %v7977_v16 = vld [vmem:[#allocation10 + $0xa44] sm:$0xf0]  ;;  %v8545_v45 = vld [vmem:[#allocation10 + $0x480] sm:$0xf0]  ;;  %v7443_v9 = vld [vmem:[#allocation10 + $0x600] sm:$0xf] }
 0x2c1   :  { %5365 = vmatpush.bf16.msrb.mxu2 %v7084_v47  ;;  %v7980_v20 = vor.u32 %v8727_v17, %v7977_v16  ;;  %v7303_v47 = vld [vmem:[#allocation10 + $0x4e8] sm:$0xf]  ;;  %v8640_v17 = vld [vmem:[#allocation10 + $0x778] sm:$0xf0]  ;;  %v6783_v16 = vld [vmem:[#allocation10 + $0xd8] sm:$0xf] }
 0x2c2   :  { %5290 = vmatpush.bf16.msrb.mxu0 %v7500_v28  ;;  %v7304_v61 = vor.u32 %v8560_v49, %v7303_v47  ;;  %v8430_v28 = vld [vmem:[#allocation10 + $0xe8] sm:$0xf0]  ;;  %v8665_v47 = vld [vmem:[#allocation10 + $0x840] sm:$0xf0] }
 0x2c3   :  { %5329 = vmatpush.bf16.msra.mxu3 %v7980_v20  ;;  %v8670_v20 = vld [vmem:[#allocation10 + $0x868] sm:$0xf0]  ;;  %v6784_v18 = vor.u32 %v8430_v28, %v6783_v16  ;;  %v9236_v49 = vld [vmem:[#allocation12] sm:$0x1f]  ;;  %v7543_v28 = vld [vmem:[#allocation10 + $0x6c8] sm:$0xf] }
 0x2c4   :  { %5350 = vmatpush.bf16.msra.mxu1 %v6964_v29  ;;  %v8485_v29 = vld [vmem:[#allocation10 + $0x2a0] sm:$0xf0]  ;;  %v5100_v35 = vpop.f32.mrf.mxu1 }
 0x2c5   :  { %5366 = vmatpush.bf16.msrb.mxu2 %v7064_v8  ;;  %v7004_v54 = vor.u32 %v8485_v29, %v7003_v38  ;;  %v8450_v8 = vld [vmem:[#allocation10 + $0x188] sm:$0xf0]  ;;  %v6763_v38 = vld [vmem:[#allocation10 + $0xb0] sm:$0xf]  ;;  %v7744_v29 = vor.u32 %v8670_v20, %v7743_v33  ;;  %v7724_v35 = vor.u32 %v8665_v47, %v7723_v57  ;;  %v8405_v47 = vld [vmem:[#allocation10 + $0x20] sm:$0xf0] }
 0x2c6   :  { %5291 = vmatpush.bf16.msrb.mxu0 %v7480_v27  ;;  %v6764_v50 = vor.u32 %v8425_v42, %v6763_v38  ;;  %v7583_v27 = vld [vmem:[#allocation10 + $0x718] sm:$0xf]  ;;  %v8410_v20 = vld [vmem:[#allocation10 + $0x48] sm:$0xf0]  ;;  %v7544_v38 = vor.u32 %v8620_v4, %v7543_v28  ;;  %v6683_v57 = vld [vmem:[#allocation10 + $0x10] sm:$0xf] }
 0x2c7   :  { %5330 = vmatpush.bf16.msra.mxu3 %v7960_v53  ;;  %v8420_v53 = vld [vmem:[#allocation10 + $0x98] sm:$0xf0]  ;;  %v6704_v42 = vor.u32 %v8410_v20, %v6703_v22  ;;  %v7403_v4 = vld [vmem:[#allocation10 + $0x5b0] sm:$0xf]  ;;  %v8585_v22 = vld [vmem:[#allocation10 + $0x5c0] sm:$0xf0] }
 0x2c8   :  { %5351 = vmatpush.bf16.msra.mxu1 %v6944_v58  ;;  %v8680_v58 = vld [vmem:[#allocation10 + $0x8b8] sm:$0xf0]  ;;  %v8705_v20 = vld [vmem:[#allocation10 + $0x980] sm:$0xf0] }
 0x2c9   :  { %5367 = vmatpush.bf16.msrb.mxu2 %v7044_v14  ;;  %v7784_v62 = vor.u32 %v8680_v58, %v7783_v52  ;;  %v8445_v14 = vld [vmem:[#allocation10 + $0x160] sm:$0xf0]  ;;  %5292 = vmatmul.bf16.vlgmr.msrb.gmra.mxu0 %v9153_v25  ;;  %v8630_v52 = vld [vmem:[#allocation10 + $0x728] sm:$0xf0]  ;;  %v6743_v58 = vld [vmem:[#allocation10 + $0x88] sm:$0xf] }
 0x2ca   :  { %5336 = vmatpush.bf16.msra.mxu0 %v6824_v59  ;;  %5331 = vmatmul.bf16.vlgmr.msra.gmra.mxu3 %v9170_v1  ;;  %v6844_v31 = vor.u32 %v8445_v14, %v6843_v23  ;;  %v8660_v59 = vld [vmem:[#allocation10 + $0x818] sm:$0xf0]  ;;  %v7584_v0 = vor.u32 %v8630_v52, %v7583_v27  ;;  %v7203_v23 = vld [vmem:[#allocation10 + $0x420] sm:$0xf]  ;;  %v8535_v14 = vld [vmem:[#allocation10 + $0x430] sm:$0xf0] }
 0x2cb   :  { %5375 = vmatpush.bf16.msrb.mxu3 %v7304_v61  ;;  %v8645_v27 = vld [vmem:[#allocation10 + $0x7a0] sm:$0xf0]  ;;  %v7463_v52 = vld [vmem:[#allocation10 + $0x628] sm:$0xf] }
 0x2cc   :  { %5352 = vmatpush.bf16.msra.mxu1 %v6924_v10  ;;  %v6864_v10 = vor.u32 %v8450_v8, %v6863_v55  ;;  %v8540_v55 = vld [vmem:[#allocation10 + $0x458] sm:$0xf0]  ;;  %v5085_v8 = vpop.f32.mrf.mxu0 }
 0x2cd   :  { %5368 = vmatpush.bf16.msrb.mxu2 %v7024_v34  ;;  %v7624_v34 = vor.u32 %v8640_v17, %v7623_v15  ;;  %v5086_v61 = vadd.f32 %v5085_v8, %v5073_v19  ;;  %v8655_v15 = vld [vmem:[#allocation10 + $0x7f0] sm:$0xf0] }
 0x2ce   :  { %5337 = vmatpush.bf16.msra.mxu0 %v6804_v6  ;;  %v5124_v6 = vpop.f32.mrf.mxu3 }
 0x2cf   :  { %5376 = vmatpush.bf16.msrb.mxu3 %v7284_v37  ;;  %v7683_v37 = vld [vmem:[#allocation10 + $0x7e0] sm:$0xf] }
 0x2d0   :  { %5353 = vmatpush.bf16.msra.mxu1 %v6904_v21  ;;  %v7764_v21 = vor.u32 %v8675_v5, %v7763_v63  ;;  %v7704_v5 = vor.u32 %v8660_v59, %v7703_v39  ;;  %v7684_v33 = vor.u32 %v8655_v15, %v7683_v37  ;;  %v6684_v39 = vor.u32 %v8405_v47, %v6683_v57  ;;  %v7423_v37 = vld [vmem:[#allocation10 + $0x5d8] sm:$0xf]  ;;  %v8590_v15 = vld [vmem:[#allocation10 + $0x5e8] sm:$0xf0]  ;;  %v7843_v47 = vld [vmem:[#allocation10 + $0x920] sm:$0xf] }
 0x2d1   :  { %5369 = vmatpush.bf16.msrb.mxu2 %v7004_v54  ;;  %v7223_v54 = vld [vmem:[#allocation10 + $0x448] sm:$0xf] }
 0x2d2   :  { %5338 = vmatpush.bf16.msra.mxu0 %v6784_v18  ;;  %v7224_v2 = vor.u32 %v8540_v55, %v7223_v54  ;;  %v8530_v18 = vld [vmem:[#allocation10 + $0x408] sm:$0xf0]  ;;  %v7943_v54 = vld [vmem:[#allocation10 + $0x9e8] sm:$0xf]  ;;  %v8720_v55 = vld [vmem:[#allocation10 + $0x9f8] sm:$0xf0] }
 0x2d3   :  { %5377 = vmatpush.bf16.msrb.mxu3 %v7264_v26  ;;  %v7944_v30 = vor.u32 %v8720_v55, %v7943_v54  ;;  %v8565_v55 = vld [vmem:[#allocation10 + $0x520] sm:$0xf0] }
 0x2d4   :  { %5354 = vmatpush.bf16.msra.mxu1 %v6884_v3  ;;  %5370 = vmatmul.bf16.vlgmr.msrb.gmra.mxu2 %v9127_v7  ;;  %v2988_v7 = vperm.slane %v9236_v49, 2  ;;  %v7244_v3 = vor.u32 %v8545_v45, %v7243_v43  ;;  %v5087_v26 = vpop.f32.mrf.mxu0  ;;  %v8615_v45 = vld [vmem:[#allocation10 + $0x6b0] sm:$0xf0] }
 0x2d5   :  { %5414 = vmatpush.bf16.msra.mxu2 %v7784_v62  ;;  %v6744_v62 = vor.u32 %v8420_v53, %v6743_v58  ;;  %v8600_v58 = vld [vmem:[#allocation10 + $0x638] sm:$0xf0] }
 0x2d6   :  { %5339 = vmatpush.bf16.msra.mxu0 %v6764_v50  ;;  %v5112_v63 = vadd.f32 %v9223_v44, %v2988_v7  ;;  %v7163_v7 = vld [vmem:[#allocation10 + $0x3d0] sm:$0xf]  ;;  %v8580_v26 = vld [vmem:[#allocation10 + $0x598] sm:$0xf0] }
 0x2d7   :  { %5378 = vmatpush.bf16.msrb.mxu3 %v7244_v3  ;;  %v9244_v19 = vpop.f32.mrf.mxu2  ;;  %v7643_v50 = vld [vmem:[#allocation10 + $0x790] sm:$0xf]  ;;  %v5126_v3 = vpop.f32.mrf.mxu3 }
 0x2d8   :  { %5355 = vmatpush.bf16.msra.mxu1 %v6864_v10  ;;  %v6723_v10 = vld [vmem:[#allocation10 + $0x60] sm:$0xf]  ;;  %v9242_v16 = vadd.f32 %v5124_v6, %v5112_v63 }
 0x2d9   :  { %5415 = vmatpush.bf16.msra.mxu2 %v7764_v21  ;;  %v7204_v21 = vor.u32 %v8535_v14, %v7203_v23  ;;  %v7923_v63 = vld [vmem:[#allocation10 + $0x9c0] sm:$0xf]  ;;  %v7483_v23 = vld [vmem:[#allocation10 + $0x650] sm:$0xf]  ;;  %v8605_v14 = vld [vmem:[#allocation10 + $0x660] sm:$0xf0] }
 0x2da   :  { %5340 = vmatpush.bf16.msra.mxu0 %v6744_v62  ;;  %v7503_v62 = vld [vmem:[#allocation10 + $0x678] sm:$0xf] }
 0x2db   :  { %5379 = vmatpush.bf16.msrb.mxu3 %v7224_v2  ;;  %v8610_v2 = vld [vmem:[#allocation10 + $0x688] sm:$0xf0] }
 0x2dc   :  { %5356 = vmatpush.bf16.msra.mxu1 %v6844_v31  ;;  %v9246_v44 = vpop.f32.mrf.mxu1 }
 0x2dd   :  { %5416 = vmatpush.bf16.msra.mxu2 %v7744_v29  ;;  %v7523_v29 = vld [vmem:[#allocation10 + $0x6a0] sm:$0xf] }
 0x2de   :  { %v7524_v53 = vor.u32 %v8615_v45, %v7523_v29  ;;  %v8575_v45 = vld [vmem:[#allocation10 + $0x570] sm:$0xf0] }
 0x2df   :  { %5357 = vmatmul.bf16.vlgmr.msra.gmra.mxu1 %v9141_v56  ;;  %v5099_v56 = vadd.f32 %v9227_v12, %v5086_v61  ;;  %v6724_v12 = vor.u32 %v8415_v11, %v6723_v10  ;;  %5380 = vmatpush.bf16.msrb.mxu3 %v7204_v21  ;;  %v7644_v61 = vor.u32 %v8645_v27, %v7643_v50  ;;  %v8595_v10 = vld [vmem:[#allocation10 + $0x610] sm:$0xf0] }
 0x2e0   :  { %5401 = vmatpush.bf16.msrb.mxu1 %v7624_v34  ;;  %v7183_v34 = vld [vmem:[#allocation10 + $0x3f8] sm:$0xf]  ;;  %v7444_v11 = vor.u32 %v8595_v10, %v7443_v9  ;;  %v7424_v21 = vor.u32 %v8590_v15, %v7423_v37  ;;  %v8745_v37 = vld [vmem:[#allocation10 + $0xac0] sm:$0xf0] }
 0x2e1   :  { %5417 = vmatpush.bf16.msra.mxu2 %v7724_v35  ;;  %v5457_v17 = vrot.slane %v5099_v56, 6  ;;  %5341 = vmatpush.bf16.msra.mxu0 %v6724_v12  ;;  %v7184_v43 = vor.u32 %v8530_v18, %v7183_v34  ;;  %v5165_v35 = vpop.f32.mrf.mxu2  ;;  %v8715_v56 = vld [vmem:[#allocation10 + $0x9d0] sm:$0xf0]  ;;  %v7484_v12 = vor.u32 %v8605_v14, %v7483_v23  ;;  %v7404_v34 = vor.u32 %v8585_v22, %v7403_v4  ;;  %v7383_v18 = vld [vmem:[#allocation10 + $0x588] sm:$0xf] }
 0x2e2   :  { %v7924_v6 = vor.u32 %v8715_v56, %v7923_v63  ;;  %v7384_v29 = vor.u32 %v8580_v26, %v7383_v18  ;;  %v8690_v35 = vld [vmem:[#allocation10 + $0x908] sm:$0xf0]  ;;  %v8083_v63 = vld [vmem:[#allocation10 + $0xb00] sm:$0xf]  ;;  %v8755_v56 = vld [vmem:[#allocation10 + $0xb10] sm:$0xf0] }
 0x2e3   :  { %v9250_v31 = vsel %vm5460_vm1, %v9220_v40, %v5457_v17  ;;  %v7664_v40 = vor.u32 %v8650_v36, %v7663_v24  ;;  %5381 = vmatpush.bf16.msrb.mxu3 %v7184_v43  ;;  %v7903_v17 = vld [vmem:[#allocation10 + $0x998] sm:$0xf]  ;;  %v7863_v24 = vld [vmem:[#allocation10 + $0x948] sm:$0xf]  ;;  %v8700_v36 = vld [vmem:[#allocation10 + $0x958] sm:$0xf0] }
 0x2e4   :  { %5402 = vmatpush.bf16.msrb.mxu1 %v7604_v60  ;;  %v8525_v60 = vld [vmem:[#allocation10 + $0x3e0] sm:$0xf0]  ;;  %v5152_v8 = vpop.f32.mrf.mxu1  ;;  %v7363_v43 = vld [vmem:[#allocation10 + $0x560] sm:$0xf]  ;;  %v8750_v23 = vld [vmem:[#allocation10 + $0xae8] sm:$0xf0] }
 0x2e5   :  { %5418 = vmatpush.bf16.msra.mxu2 %v7704_v5  ;;  %5342 = vmatpush.bf16.msra.mxu0 %v6704_v42  ;;  %v7164_v59 = vor.u32 %v8525_v60, %v7163_v7  ;;  %v7504_v5 = vor.u32 %v8610_v2, %v7503_v62  ;;  %v7864_v42 = vor.u32 %v8700_v36, %v7863_v24  ;;  %v7803_v8 = vld [vmem:[#allocation10 + $0x8d0] sm:$0xf]  ;;  %v8003_v22 = vld [vmem:[#allocation10 + $0xa60] sm:$0xf]  ;;  %v8730_v18 = vld [vmem:[#allocation10 + $0xa48] sm:$0xf0] }
 0x2e6   :  { %v7364_v50 = vor.u32 %v8575_v45, %v7363_v43  ;;  %v7963_v24 = vld [vmem:[#allocation10 + $0xa10] sm:$0xf]  ;;  %v8725_v36 = vld [vmem:[#allocation10 + $0xa20] sm:$0xf0] }
 0x2e7   :  { %5382 = vmatpush.bf16.msrb.mxu3 %v7164_v59  ;;  %v8103_v59 = vld [vmem:[#allocation10 + $0xb28] sm:$0xf] }
 0x2e8   :  { %5403 = vmatpush.bf16.msrb.mxu1 %v7584_v0  ;;  %v7464_v0 = vor.u32 %v8600_v58, %v7463_v52  ;;  %v8570_v52 = vld [vmem:[#allocation10 + $0x548] sm:$0xf0]  ;;  %v7823_v58 = vld [vmem:[#allocation10 + $0x8f8] sm:$0xf] }
 0x2e9   :  { %5419 = vmatpush.bf16.msra.mxu2 %v7684_v33  ;;  %5343 = vmatpush.bf16.msra.mxu0 %v6684_v39  ;;  %v7883_v33 = vld [vmem:[#allocation10 + $0x970] sm:$0xf]  ;;  %v7824_v54 = vor.u32 %v8690_v35, %v7823_v58  ;;  %v8685_v39 = vld [vmem:[#allocation10 + $0x8e0] sm:$0xf0] }
 0x2ea   :  { %5383 = vmatmul.bf16.vlgmr.msrb.gmra.mxu3 %v9132_v13  ;;  %v7884_v13 = vor.u32 %v8705_v20, %v7883_v33  ;;  %v7804_v9 = vor.u32 %v8685_v39, %v7803_v8  ;;  %v8735_v33 = vld [vmem:[#allocation10 + $0xa70] sm:$0xf0] }
 0x2eb   :  { %5427 = vmatpush.bf16.msra.mxu3 %v7944_v30 }
 0x2ec   :  { %5404 = vmatpush.bf16.msrb.mxu1 %v7564_v46  ;;  %5344 = vmatmul.bf16.vlgmr.msra.gmra.mxu0 %v9123_v51  ;;  %v8710_v46 = vld [vmem:[#allocation10 + $0x9a8] sm:$0xf0]  ;;  %v5137_v51 = vpop.f32.mrf.mxu0 }
 0x2ed   :  { %5420 = vmatpush.bf16.msra.mxu2 %v7664_v40  ;;  %5388 = vmatpush.bf16.msrb.mxu0 %v7464_v0  ;;  %v7904_v28 = vor.u32 %v8710_v46, %v7903_v17  ;;  %v8695_v40 = vld [vmem:[#allocation10 + $0x930] sm:$0xf0]  ;;  %v5176_v7 = vpop.f32.mrf.mxu3  ;;  %v8023_v46 = vld [vmem:[#allocation10 + $0xa88] sm:$0xf] }
 0x2ee   :  { %v7844_v27 = vor.u32 %v8695_v40, %v7843_v47 }
 0x2ef   :  { %5428 = vmatpush.bf16.msra.mxu3 %v7924_v6  ;;  %v8043_v6 = vld [vmem:[#allocation10 + $0xab0] sm:$0xf] }
 0x2f0   :  { %5405 = vmatpush.bf16.msrb.mxu1 %v7544_v38  ;;  %v8044_v15 = vor.u32 %v8745_v37, %v8043_v6 }
 0x2f1   :  { %5421 = vmatpush.bf16.msra.mxu2 %v7644_v61  ;;  %5389 = vmatpush.bf16.msrb.mxu0 %v7444_v11  ;;  %v8760_v61 = vld [vmem:[#allocation10 + $0xb38] sm:$0xf0]  ;;  %v8063_v11 = vld [vmem:[#allocation10 + $0xad8] sm:$0xf] }
 0x2f2   :  { %v8104_v10 = vor.u32 %v8760_v61, %v8103_v59  ;;  %v8064_v14 = vor.u32 %v8750_v23, %v8063_v11 }
 0x2f3   :  { %5429 = vmatpush.bf16.msra.mxu3 %v7904_v28 }
 0x2f4   :  { %5406 = vmatpush.bf16.msrb.mxu1 %v7524_v53  ;;  %5422 = vmatmul.bf16.vlgmr.msra.gmra.mxu2 %v9158_v41  ;;  %v5138_v41 = vadd.f32 %v5137_v51, %v9242_v16  ;;  %v5139_v3 = vpop.f32.mrf.mxu0 }
 0x2f5   :  { %5390 = vmatpush.bf16.msrb.mxu0 %v7424_v21  ;;  %v5178_v0 = vpop.f32.mrf.mxu3 }
 0x2f6   :  { %v5151_v38 = vadd.f32 %v9246_v44, %v5138_v41  ;;  %v7343_v44 = vld [vmem:[#allocation10 + $0x538] sm:$0xf] }
 0x2f7   :  { %5430 = vmatpush.bf16.msra.mxu3 %v7884_v13  ;;  %v7344_v53 = vor.u32 %v8570_v52, %v7343_v44  ;;  %v7983_v13 = vld [vmem:[#allocation10 + $0xa38] sm:$0xf] }
 0x2f8   :  { %5407 = vmatpush.bf16.msrb.mxu1 %v7504_v5  ;;  %v5164_v57 = vadd.f32 %v9244_v19, %v5151_v38  ;;  %v7323_v19 = vld [vmem:[#allocation10 + $0x510] sm:$0xf]  ;;  %v8084_v5 = vor.u32 %v8755_v56, %v8083_v63  ;;  %v7984_v41 = vor.u32 %v8730_v18, %v7983_v13  ;;  %v2990_v63 = vperm.slane %v9236_v49, 4 }
 0x2f9   :  { %5391 = vmatpush.bf16.msrb.mxu0 %v7404_v34  ;;  %v7324_v2 = vor.u32 %v8565_v55, %v7323_v19  ;;  %v8004_v34 = vor.u32 %v8735_v33, %v8003_v22 }
 0x2fa   :  { %v5177_v60 = vadd.f32 %v5176_v7, %v5164_v57 }
 0x2fb   :  { %5431 = vmatpush.bf16.msra.mxu3 %v7864_v42 }
 0x2fc   :  { %5408 = vmatpush.bf16.msrb.mxu1 %v7484_v12  ;;  %v5202_v16 = vpop.f32.mrf.mxu1  ;;  %v8740_v12 = vld [vmem:[#allocation10 + $0xa98] sm:$0xf0] }
 0x2fd   :  { %5392 = vmatpush.bf16.msrb.mxu0 %v7384_v29  ;;  %v8024_v4 = vor.u32 %v8740_v12, %v8023_v46  ;;  %v7964_v29 = vor.u32 %v8725_v36, %v7963_v24 }
 0x2ff   :  { %5409 = vmatmul.bf16.vlgmr.msrb.gmra.mxu1 %v9153_v25  ;;  %v5215_v25 = vpop.f32.mrf.mxu2  ;;  %5432 = vmatpush.bf16.msra.mxu3 %v7844_v27 }
 0x301   :  { %5393 = vmatpush.bf16.msrb.mxu0 %v7364_v50 }
 0x303   :  { %5433 = vmatpush.bf16.msra.mxu3 %v7824_v54 }
 0x304   :  { %v5204_v30 = vpop.f32.mrf.mxu1 }
 0x305   :  { %5394 = vmatpush.bf16.msrb.mxu0 %v7344_v53 }
 0x306   :  { %v5189_v17 = vpop.f32.mrf.mxu0 }
 0x307   :  { %v5217_v62 = vpop.f32.mrf.mxu2  ;;  %5434 = vmatpush.bf16.msra.mxu3 %v7804_v9  ;;  %v5190_v21 = vadd.f32 %v5189_v17, %v5177_v60  ;;  %v2989_v60 = vperm.slane %v9236_v49, 3 }
 0x309   :  { %5395 = vmatpush.bf16.msrb.mxu0 %v7324_v2  ;;  %v5203_v28 = vadd.f32 %v5202_v16, %v5190_v21 }
 0x30a   :  { %5435 = vmatmul.bf16.vlgmr.msra.gmra.mxu3 %v9164_v32 }
 0x30b   :  { %v5216_v20 = vadd.f32 %v5215_v25, %v5203_v28 }
 0x30c   :  { %5396 = vmatmul.bf16.vlgmr.msrb.gmra.mxu0 %v9148_v48 }
 0x30d   :  { %5440 = vmatpush.bf16.msra.mxu0 %v8104_v10  ;;  %v5228_v48 = vpop.f32.mrf.mxu3  ;;  %v5458_v61 = vrot.slane %v5216_v20, 4 }
 0x30e   :  { %v5191_v26 = vpop.f32.mrf.mxu0  ;;  %v5229_v25 = vadd.f32 %v5228_v48, %v2989_v60 }
 0x311   :  { %5441 = vmatpush.bf16.msra.mxu0 %v8084_v5 }
 0x315   :  { %5442 = vmatpush.bf16.msra.mxu0 %v8064_v14  ;;  %v5230_v38 = vpop.f32.mrf.mxu3 }
 0x317   :  { %v5267_v32 = vpop.f32.mrf.mxu2 }
 0x319   :  { %5443 = vmatpush.bf16.msra.mxu0 %v8044_v15 }
 0x31c   :  { %v5254_v51 = vpop.f32.mrf.mxu1 }
 0x31d   :  { %5444 = vmatpush.bf16.msra.mxu0 %v8024_v4 }
 0x31f   :  { %v5269_v42 = vpop.f32.mrf.mxu2 }
 0x321   :  { %5445 = vmatpush.bf16.msra.mxu0 %v8004_v34 }
 0x324   :  { %v5256_v43 = vpop.f32.mrf.mxu1 }
 0x325   :  { %5446 = vmatpush.bf16.msra.mxu0 %v7984_v41 }
 0x326   :  { %v5241_v45 = vpop.f32.mrf.mxu0 }
 0x327   :  { %v5242_v3 = vadd.f32 %v5241_v45, %v5229_v25 }
 0x329   :  { %5447 = vmatpush.bf16.msra.mxu0 %v7964_v29  ;;  %v5255_v44 = vadd.f32 %v5254_v51, %v5242_v3 }
 0x32b   :  { %v5268_v52 = vadd.f32 %v5267_v32, %v5255_v44 }
 0x32c   :  { %5448 = vmatmul.bf16.vlgmr.msra.gmra.mxu0 %v9170_v1 }
 0x32d   :  { %v5280_v57 = vpop.f32.mrf.mxu3 }
 0x32e   :  { %v5243_v7 = vpop.f32.mrf.mxu0  ;;  %v5281_v58 = vadd.f32 %v5280_v57, %v5268_v52 }
 0x335   :  { %v5282_v50 = vpop.f32.mrf.mxu3 }
 0x337   :  { %v5319_v47 = vpop.f32.mrf.mxu2 }
 0x33c   :  { %v5306_v40 = vpop.f32.mrf.mxu1 }
 0x33f   :  { %v5321_v16 = vpop.f32.mrf.mxu2 }
 0x344   :  { %v5308_v27 = vpop.f32.mrf.mxu1 }
 0x346   :  { %v5293_v35 = vpop.f32.mrf.mxu0 }
 0x347   :  { %v5294_v53 = vadd.f32 %v5293_v35, %v5281_v58 }
 0x349   :  { %v5307_v54 = vadd.f32 %v5306_v40, %v5294_v53 }
 0x34b   :  { %v5320_v19 = vadd.f32 %v5319_v47, %v5307_v54 }
 0x34d   :  { %v5332_v1 = vpop.f32.mrf.mxu3 }
 0x34e   :  { %v5333_v55 = vadd.f32 %v5332_v1, %v5320_v19  ;;  %v5295_v59 = vpop.f32.mrf.mxu0 }
 0x350   :  { %v5459_v0 = vrot.slane %v5333_v55, 2 }
 0x352   :  { %v5463_v62 = vsel %vm5462_vm2, %v5458_v61, %v5459_v0 }
 0x353   :  { %v5465_v2 = vsel %vm5464_vm3, %v9250_v31, %v5463_v62 }
 0x354   :  { %5467 = vst [vmem:[%s9278_s7] sm:$0xff] %v5465_v2 }
 0x355   :  { %v5334_v30 = vpop.f32.mrf.mxu3 }
 0x357   :  { %v5371_v8 = vpop.f32.mrf.mxu2 }
 0x35c   :  { %v5358_v39 = vpop.f32.mrf.mxu1 }
 0x35f   :  { %v5373_v9 = vpop.f32.mrf.mxu2 }
 0x364   :  { %v5360_v10 = vpop.f32.mrf.mxu1 }
 0x369   :  { %v5345_v56 = vpop.f32.mrf.mxu0 }
 0x36a   :  { %v5346_v5 = vadd.f32 %v5345_v56, %v2990_v63 }
 0x36c   :  { %v5359_v11 = vadd.f32 %v5358_v39, %v5346_v5 }
 0x36d   :  { %v5384_v14 = vpop.f32.mrf.mxu3 }
 0x36e   :  { %v5372_v23 = vadd.f32 %v5371_v8, %v5359_v11 }
 0x370   :  { %v5385_v4 = vadd.f32 %v5384_v14, %v5372_v23 }
 0x371   :  { %v5347_v15 = vpop.f32.mrf.mxu0 }
 0x375   :  { %v5386_v17 = vpop.f32.mrf.mxu3 }
 0x377   :  { %v5423_v6 = vpop.f32.mrf.mxu2 }
 0x37c   :  { %v5410_v37 = vpop.f32.mrf.mxu1 }
 0x37f   :  { %v5425_v46 = vpop.f32.mrf.mxu2 }
 0x384   :  { %v5412_v31 = vpop.f32.mrf.mxu1 }
 0x389   :  { %v5397_v12 = vpop.f32.mrf.mxu0 }
 0x38a   :  { %v5398_v33 = vadd.f32 %v5397_v12, %v5385_v4 }
 0x38c   :  { %v5411_v20 = vadd.f32 %v5410_v37, %v5398_v33 }
 0x38d   :  { %v5436_v21 = vpop.f32.mrf.mxu3 }
 0x38e   :  { %v5424_v48 = vadd.f32 %v5423_v6, %v5411_v20 }
 0x390   :  { %v5437_v49 = vadd.f32 %v5436_v21, %v5424_v48 }
 0x391   :  { %v5399_v28 = vpop.f32.mrf.mxu0 }
 0x395   :  { %v5438_v22 = vpop.f32.mrf.mxu3 }
 0x3a9   :  { %v5449_v34 = vpop.f32.mrf.mxu0 }
 0x3aa   :  { %v5450_v32 = vadd.f32 %v5449_v34, %v5437_v49 }
 0x3ac   :  { %5468 = vst [vmem:[%s9278_s7 + $0x8] sm:$0x3] %v5450_v32 }
 0x3b1   :  { %v5451_v51 = vpop.f32.mrf.mxu0 }
 0x3b2   :  { %5473 = vsyncpa [#allocation3], 1 }
 0x3b3   :  { %5474 = vsyncpa [#allocation5], 1 }
 0x3b4   :  { %5475 = vsyncpa [#allocation8], 1 }
 0x3b5   :  { %5476 = vsyncpa [#allocation11], 1 }

</bundles_post_ra>
